<compile_context>
chip_gen: v6e
topology: v6e:2x2x1
jax: 0.10.0
libtpu: 0.0.40
codegen_flags: <defaults>
</compile_context>

<pallas_src>
import functools

import jax
import jax.numpy as jnp
import numpy as np
from jax.experimental import pallas as pl
from jax.experimental.pallas import tpu as pltpu

_EPS = 1e-5
_COMPUTE_DTYPE = jnp.bfloat16        # MXU operand dtype (accumulation stays f32)


def _infer_vmem_limit():
    """~0.75x of the queried per-core VMEM capacity (48 MiB v7x, 96 MiB v5e/v6e)."""
    try:
        cap = int(pltpu.get_tpu_info().vmem_capacity_bytes)
    except Exception:
        cap = 64 * 1024 * 1024       # conservative (v7x-sized) fallback
    return max(32 * 1024 * 1024, (cap * 3) // 4)


_VMEM_LIMIT = _infer_vmem_limit()
_TILE_BUDGET = _VMEM_LIMIT // 3      # per-call working-set budget (2x-buffered tiles)


# --------------------------------------------------------------------------- #
# Helpers
# --------------------------------------------------------------------------- #
def _round_up(x, m):
    return -(-x // m) * m


def _pad_rows(a, mp):
    m = a.shape[0]
    return a if m == mp else jnp.pad(a, ((0, mp - m), (0, 0)))


def _pick_tile_rows(m, bytes_per_row, const_bytes=0):
    """Largest row tile (multiple of 8) whose double-buffered in/out tiles plus the
    double-buffered constant blocks fit the per-generation tile budget."""
    budget = max(_TILE_BUDGET - 2 * const_bytes, 1 << 20)
    tm = budget // max(2 * bytes_per_row, 1)
    tm = min(tm, 32768, _round_up(m, 8))
    return max(8, (tm // 8) * 8)


# --------------------------------------------------------------------------- #
# Pallas kernels
# --------------------------------------------------------------------------- #
def _conv3x3_bn_kernel(*refs, taps, ho, wo):
    """Per-image fused 3x3 conv (+bias) and BatchNorm pass-1 partial statistics.

    refs = (*phase_refs, w_ref, b_ref, y_ref, sum_ref, ssq_ref)
      phase_refs[p]  : (Hp, Wp, Cin)  polyphase, spatially padded input (bf16)
      w_ref          : (9, Cin, Cout) conv weights, taps (kh,kw) row-major (bf16)
      b_ref          : (1, Cout)      conv bias (f32)
      y_ref          : (Ho*Wo, Cout)  raw conv output for this image (f32)
      sum_ref/ssq_ref: (1, Cout)      per-image partial sum / sum of squares (f32)
    """
    n_phase = len(refs) - 5
    phase_refs = refs[:n_phase]
    w_ref, b_ref, y_ref, sum_ref, ssq_ref = refs[n_phase:]
    hw = ho * wo
    cout = w_ref.shape[-1]

    acc = jnp.zeros((hw, cout), jnp.float32)
    # 3x3 taps read straight out of the VMEM-resident blocks (no HBM im2col slab).
    # TODO(synk): for Cin >= ~128, pack the 9 taps into one (hw, 9*Cin) VMEM buffer
    #             and issue a single K=9*Cin dot to fill v7x's 256-deep MXU.
    for t, (pi, oh, ow) in enumerate(taps):
        slab = phase_refs[pi][pl.ds(oh, ho), pl.ds(ow, wo), :]
        slab = slab.reshape(hw, slab.shape[-1])
        acc = acc + jnp.dot(slab, w_ref[t], preferred_element_type=jnp.float32)

    y = acc + b_ref[...]
    y_ref[...] = y
    # Fused BN pass-1 partials (reduced across images in the wrapper).
    sum_ref[...] = jnp.sum(y, axis=0, keepdims=True)
    ssq_ref[...] = jnp.sum(y * y, axis=0, keepdims=True)


def _matmul_bias_kernel(x_ref, w_ref, b_ref, o_ref):
    """One (tm, K) @ (K, Cout) + bias tile.  Used for the 1x1 projection shortcut."""
    o_ref[...] = (jnp.dot(x_ref[...], w_ref[...],
                          preferred_element_type=jnp.float32)
                  + b_ref[...]).astype(o_ref.dtype)


def _scale_shift_relu_kernel(y_ref, sc_ref, sh_ref, o_ref):
    """BN pass 2: y*scale + shift, ReLU (scale/shift precomputed per channel)."""
    o_ref[...] = jnp.maximum(y_ref[...] * sc_ref[...] + sh_ref[...],
                             0.0).astype(o_ref.dtype)


def _scale_shift_add_relu_kernel(y_ref, sc_ref, sh_ref, r_ref, o_ref):
    """BN pass 2 fused with the residual add + ReLU."""
    o_ref[...] = jnp.maximum(
        y_ref[...] * sc_ref[...] + sh_ref[...] + r_ref[...].astype(jnp.float32),
        0.0).astype(o_ref.dtype)


# --------------------------------------------------------------------------- #
# pallas_call wrappers
# --------------------------------------------------------------------------- #
def conv3x3_bn_stats(x, w9, b, *, strides):
    """3x3 conv (pad 1, stride `strides`) + bias, fused with BN pass-1 partials.

    x: (N,H,W,Cin) compute dtype; w9: (9,Cin,Cout) compute dtype; b: (1,Cout) f32.
    Returns (y_raw (N,Ho*Wo,Cout) f32, psum (N,1,Cout) f32, pssq (N,1,Cout) f32).
    """
    N, H, W, Cin = x.shape
    Cout = w9.shape[-1]
    s = strides
    Ho = (H - 1) // s + 1
    Wo = (W - 1) // s + 1

    xp = jnp.pad(x, ((0, 0), (1, 1), (1, 1), (0, 0)))
    # Polyphase split (s=1 -> a single phase = the padded image).  Total wrapper
    # traffic ~= one activation pass, vs 9x for an HBM im2col slab.
    phases = [xp[:, ph::s, pw::s, :] for ph in range(s) for pw in range(s)]
    Hp = max(p.shape[1] for p in phases)
    Wp = max(p.shape[2] for p in phases)
    phases = [jnp.pad(p, ((0, 0), (0, Hp - p.shape[1]),
                          (0, Wp - p.shape[2]), (0, 0))) for p in phases]
    # tap (kh,kw) -> (phase index, row offset, col offset) inside that phase
    taps = tuple(((kh % s) * s + (kw % s), kh // s, kw // s)
                 for kh in range(3) for kw in range(3))

    # TODO(synk): for very large H*W add an inner halo-row grid axis instead of one
    #             whole image per grid step (per-image blocks must fit VMEM).
    phase_spec = pl.BlockSpec((None, Hp, Wp, Cin), lambda n: (n, 0, 0, 0))
    return pl.pallas_call(
        functools.partial(_conv3x3_bn_kernel, taps=taps, ho=Ho, wo=Wo),
        out_shape=(jax.ShapeDtypeStruct((N, Ho * Wo, Cout), jnp.float32),
                   jax.ShapeDtypeStruct((N, 1, Cout), jnp.float32),
                   jax.ShapeDtypeStruct((N, 1, Cout), jnp.float32)),
        grid_spec=pltpu.PrefetchScalarGridSpec(
            num_scalar_prefetch=0,
            grid=(N,),
            in_specs=[phase_spec] * len(phases) + [
                pl.BlockSpec((9, Cin, Cout), lambda n: (0, 0, 0)),  # revisited ->
                pl.BlockSpec((1, Cout), lambda n: (0, 0))],         # not re-DMA'd
            out_specs=(pl.BlockSpec((None, Ho * Wo, Cout), lambda n: (n, 0, 0)),
                       pl.BlockSpec((None, 1, Cout), lambda n: (n, 0, 0)),
                       pl.BlockSpec((None, 1, Cout), lambda n: (n, 0, 0)))),
        compiler_params=pltpu.CompilerParams(
            dimension_semantics=("parallel",),   # per-image -> megacore on v7x
            vmem_limit_bytes=_VMEM_LIMIT),
    )(*phases, w9, b)


def matmul_bias(x, w, b):
    """Row-tiled (M,K)@(K,Cout)+bias -> f32 (1x1 projection shortcut)."""
    M, K = x.shape
    Cout = w.shape[1]
    row_bytes = K * x.dtype.itemsize + Cout * 4
    const_bytes = K * Cout * w.dtype.itemsize + Cout * 4
    tm = _pick_tile_rows(M, row_bytes, const_bytes)
    Mp = _round_up(M, tm)
    return pl.pallas_call(
        _matmul_bias_kernel,
        out_shape=jax.ShapeDtypeStruct((Mp, Cout), jnp.float32),
        grid_spec=pltpu.PrefetchScalarGridSpec(
            num_scalar_prefetch=0,
            grid=(Mp // tm,),
            in_specs=[pl.BlockSpec((tm, K), lambda i: (i, 0)),
                      pl.BlockSpec((K, Cout), lambda i: (0, 0)),
                      pl.BlockSpec((1, Cout), lambda i: (0, 0))],
            out_specs=pl.BlockSpec((tm, Cout), lambda i: (i, 0))),
        compiler_params=pltpu.CompilerParams(
            dimension_semantics=("parallel",),
            vmem_limit_bytes=_VMEM_LIMIT),
    )(_pad_rows(x, Mp), w, b)


def bn_apply_relu(y, scale, shift, *, out_dtype):
    """BN pass 2 (y*scale + shift) + ReLU, row-tiled; output in `out_dtype`."""
    M, C = y.shape
    row_bytes = C * 4 + C * jnp.dtype(out_dtype).itemsize
    tm = _pick_tile_rows(M, row_bytes, 2 * C * 4)
    Mp = _round_up(M, tm)
    tspec = pl.BlockSpec((tm, C), lambda i: (i, 0))
    cspec = pl.BlockSpec((1, C), lambda i: (0, 0))
    return pl.pallas_call(
        _scale_shift_relu_kernel,
        out_shape=jax.ShapeDtypeStruct((Mp, C), out_dtype),
        grid_spec=pltpu.PrefetchScalarGridSpec(
            num_scalar_prefetch=0, grid=(Mp // tm,),
            in_specs=[tspec, cspec, cspec], out_specs=tspec),
        compiler_params=pltpu.CompilerParams(
            dimension_semantics=("parallel",),
            vmem_limit_bytes=_VMEM_LIMIT),
    )(_pad_rows(y, Mp), scale, shift)


def bn_apply_add_relu(y, scale, shift, residual):
    """BN pass 2 fused with residual add + ReLU; overwrites y's buffer in place."""
    M, C = y.shape
    row_bytes = 3 * C * 4
    tm = _pick_tile_rows(M, row_bytes, 2 * C * 4)
    Mp = _round_up(M, tm)
    tspec = pl.BlockSpec((tm, C), lambda i: (i, 0))
    cspec = pl.BlockSpec((1, C), lambda i: (0, 0))
    return pl.pallas_call(
        _scale_shift_add_relu_kernel,
        out_shape=jax.ShapeDtypeStruct((Mp, C), jnp.float32),
        grid_spec=pltpu.PrefetchScalarGridSpec(
            num_scalar_prefetch=0, grid=(Mp // tm,),
            in_specs=[tspec, cspec, cspec, tspec], out_specs=tspec),
        input_output_aliases={0: 0},
        compiler_params=pltpu.CompilerParams(
            dimension_semantics=("parallel",),
            vmem_limit_bytes=_VMEM_LIMIT),
    )(_pad_rows(y, Mp), scale, shift, _pad_rows(residual, Mp))


def _bn_scale_shift(psum, pssq, count, gamma, beta):
    """Reduce per-image partials to per-channel scale/shift so that
       y*scale + shift == (y - mean) * gamma / sqrt(var + eps) + beta."""
    mean = jnp.sum(psum, axis=0) / count                           # (1, C)
    var = jnp.maximum(jnp.sum(pssq, axis=0) / count - mean * mean, 0.0)
    scale = gamma * jax.lax.rsqrt(var + _EPS)
    shift = beta - mean * scale
    return scale, shift


# --------------------------------------------------------------------------- #
# Forward pass (matches Residual.forward; NCHW in/out like PyTorch)
# --------------------------------------------------------------------------- #
def residual_forward_nchw(x_nchw, params, *, use_1x1conv, strides):
    x = jnp.transpose(x_nchw, (0, 2, 3, 1)).astype(jnp.float32)    # -> NHWC
    N, H, W, Cin = x.shape
    Cout = params["w1"].shape[-1]
    Ho = (H - 1) // strides + 1
    Wo = (W - 1) // strides + 1
    M = N * Ho * Wo
    cdt = _COMPUTE_DTYPE

    # conv1 (+ fused BN1 partial stats)
    y1_raw, s1, q1 = conv3x3_bn_stats(x.astype(cdt), params["w1"].astype(cdt),
                                      params["b1"], strides=strides)
    scale1, shift1 = _bn_scale_shift(s1, q1, M, params["g1"], params["be1"])

    # bn1 + relu  (stored in compute dtype: feeds conv2's MXU dots directly)
    y1 = bn_apply_relu(y1_raw.reshape(M, Cout), scale1, shift1, out_dtype=cdt)
    y1 = y1[:M].reshape(N, Ho, Wo, Cout)

    # conv2 (+ fused BN2 partial stats), stride 1
    y2_raw, s2, q2 = conv3x3_bn_stats(y1, params["w2"].astype(cdt),
                                      params["b2"], strides=1)
    scale2, shift2 = _bn_scale_shift(s2, q2, M, params["g2"], params["be2"])

    # shortcut
    if use_1x1conv:
        xs = x[:, ::strides, ::strides, :].reshape(M, Cin).astype(cdt)
        sc = matmul_bias(xs, params["w3"].astype(cdt), params["b3"])[:M]
    else:
        assert strides == 1 and Cin == Cout
        sc = x.reshape(M, Cin)

    # bn2 + residual add + relu (fused, in place over y2's buffer)
    out = bn_apply_add_relu(y2_raw.reshape(M, Cout), scale2, shift2, sc)
    out = out[:M].reshape(N, Ho, Wo, Cout)
    return jnp.transpose(out, (0, 3, 1, 2))                        # -> NCHW


# --------------------------------------------------------------------------- #
# Pure-JAX reference (same semantics) for validation
# --------------------------------------------------------------------------- #
def residual_ref_nchw(x_nchw, params, *, use_1x1conv, strides,
                      compute_dtype=jnp.float32):
    """`compute_dtype` controls the conv *operand* precision (accumulation stays
    f32), so the bf16-operand kernel can be checked tightly against a matched
    reference, and loosely against the pure-f32 reference."""
    x = jnp.transpose(x_nchw, (0, 2, 3, 1)).astype(jnp.float32)

    def conv(h, w9, b, s):
        w = w9.reshape(3, 3, w9.shape[1], w9.shape[2]).astype(compute_dtype)
        y = jax.lax.conv_general_dilated(
            h.astype(compute_dtype), w, (s, s), ((1, 1), (1, 1)),
            dimension_numbers=("NHWC", "HWIO", "NHWC"),
            preferred_element_type=jnp.float32)
        return y + b.reshape(1, 1, 1, -1)

    def bn(y, g, be):
        mean = y.mean(axis=(0, 1, 2), keepdims=True)
        var = y.var(axis=(0, 1, 2), keepdims=True)
        return (y - mean) / jnp.sqrt(var + _EPS) * g.reshape(1, 1, 1, -1) \
               + be.reshape(1, 1, 1, -1)

    y = jax.nn.relu(bn(conv(x, params["w1"], params["b1"], strides),
                       params["g1"], params["be1"]))
    y = bn(conv(y, params["w2"], params["b2"], 1), params["g2"], params["be2"])
    if use_1x1conv:
        w3 = params["w3"].reshape(1, 1, *params["w3"].shape).astype(compute_dtype)
        sc = jax.lax.conv_general_dilated(
            x.astype(compute_dtype), w3, (strides, strides), ((0, 0), (0, 0)),
            dimension_numbers=("NHWC", "HWIO", "NHWC"),
            preferred_element_type=jnp.float32)
        sc = sc + params["b3"].reshape(1, 1, 1, -1)
    else:
        sc = x
    out = jax.nn.relu(y + sc)
    return jnp.transpose(out, (0, 3, 1, 2))


# --------------------------------------------------------------------------- #
# Deterministic synthetic parameters (shapes from Residual.__init__)
# --------------------------------------------------------------------------- #
def init_params(key, cin, cout, use_1x1conv):
    ks = jax.random.split(key, 10)
    p = {
        # conv1: 3x3, cin -> cout (stored as (9, Cin, Cout), taps (kh,kw) row-major)
        "w1": 0.1 * jax.random.normal(ks[0], (9, cin, cout), jnp.float32),
        "b1": 0.1 * jax.random.normal(ks[1], (1, cout), jnp.float32),
        # conv2: 3x3, cout -> cout
        "w2": 0.1 * jax.random.normal(ks[2], (9, cout, cout), jnp.float32),
        "b2": 0.1 * jax.random.normal(ks[3], (1, cout), jnp.float32),
        # bn1 / bn2 affine params
        "g1": 1.0 + 0.1 * jax.random.normal(ks[4], (1, cout), jnp.float32),
        "be1": 0.1 * jax.random.normal(ks[5], (1, cout), jnp.float32),
        "g2": 1.0 + 0.1 * jax.random.normal(ks[6], (1, cout), jnp.float32),
        "be2": 0.1 * jax.random.normal(ks[7], (1, cout), jnp.float32),
    }
    if use_1x1conv:
        p["w3"] = 0.1 * jax.random.normal(ks[8], (cin, cout), jnp.float32)
        p["b3"] = 0.1 * jax.random.normal(ks[9], (1, cout), jnp.float32)
    return p


if __name__ == "__main__":
    key = jax.random.PRNGKey(0)
    kx, kp1, kp2 = jax.random.split(key, 3)

    N, C, H, W = 2, 4, 16, 16
    x = jax.random.normal(kx, (N, C, H, W), jnp.float32)      # NCHW like PyTorch

    # ---- Config 1: identity shortcut (use_1x1conv=False, strides=1) ----
    params1 = init_params(kp1, C, C, use_1x1conv=False)
    fwd1 = jax.jit(functools.partial(residual_forward_nchw,
                                     use_1x1conv=False, strides=1))
    out1 = jax.block_until_ready(fwd1(x, params1))
    assert out1.shape == (N, C, H, W)
    # tight check vs a reference run with the same MXU operand precision
    ref1 = residual_ref_nchw(x, params1, use_1x1conv=False, strides=1,
                             compute_dtype=_COMPUTE_DTYPE)
    np.testing.assert_allclose(np.asarray(out1), np.asarray(ref1),
                               rtol=5e-3, atol=5e-3)
    # loose sanity check vs the pure-f32 reference (bounds bf16-operand loss)
    ref1_f32 = residual_ref_nchw(x, params1, use_1x1conv=False, strides=1)
    np.testing.assert_allclose(np.asarray(out1), np.asarray(ref1_f32),
                               rtol=5e-2, atol=5e-2)

    # ---- Config 2: projection shortcut (use_1x1conv=True, strides=2) ----
    C2 = 8
    params2 = init_params(kp2, C, C2, use_1x1conv=True)
    fwd2 = jax.jit(functools.partial(residual_forward_nchw,
                                     use_1x1conv=True, strides=2))
    out2 = jax.block_until_ready(fwd2(x, params2))
    assert out2.shape == (N, C2, H // 2, W // 2)
    ref2 = residual_ref_nchw(x, params2, use_1x1conv=True, strides=2,
                             compute_dtype=_COMPUTE_DTYPE)
    np.testing.assert_allclose(np.asarray(out2), np.asarray(ref2),
                               rtol=5e-3, atol=5e-3)
    ref2_f32 = residual_ref_nchw(x, params2, use_1x1conv=True, strides=2)
    np.testing.assert_allclose(np.asarray(out2), np.asarray(ref2_f32),
                               rtol=5e-2, atol=5e-2)

    print("KERNEL_OK")
</pallas_src>

<mosaic_0001>
module attributes {stable_mosaic.version = 11 : i64} {
  func.func @_conv3x3_bn_kernel(%arg0: i32, %arg1: memref<1x18x18x4xbf16, #tpu.memory_space<vmem>>, %arg2: memref<9x4x4xbf16, #tpu.memory_space<vmem>>, %arg3: memref<1x4xf32, #tpu.memory_space<vmem>>, %arg4: memref<1x256x4xf32, #tpu.memory_space<vmem>>, %arg5: memref<1x1x4xf32, #tpu.memory_space<vmem>>, %arg6: memref<1x1x4xf32, #tpu.memory_space<vmem>>) attributes {dimension_semantics = [#tpu.dimension_semantics<parallel>], iteration_bounds = array<i64: 2>, scalar_prefetch = 0 : i64, scratch_operands = 0 : i64, tpu.core_type = #tpu.core_type<tc>, window_params = [{transform_indices = @transform_0, window_bounds = array<i64: 1, 18, 18, 4>}, {pipeline_mode = #tpu.pipeline_mode<synchronous>, transform_indices = @transform_1, window_bounds = array<i64: 9, 4, 4>}, {pipeline_mode = #tpu.pipeline_mode<synchronous>, transform_indices = @transform_2, window_bounds = array<i64: 1, 4>}, {transform_indices = @transform_3, window_bounds = array<i64: 1, 256, 4>}, {transform_indices = @transform_4, window_bounds = array<i64: 1, 1, 4>}, {transform_indices = @transform_5, window_bounds = array<i64: 1, 1, 4>}]} {
    %cst = arith.constant 0.000000e+00 : f32
    %0 = vector.broadcast %cst : f32 to vector<256x4xf32>
    %c0 = arith.constant 0 : index
    %c0_0 = arith.constant 0 : index
    %c0_1 = arith.constant 0 : index
    %c0_2 = arith.constant 0 : index
    %1 = vector.load %arg1[%c0, %c0_0, %c0_1, %c0_2] : memref<1x18x18x4xbf16, #tpu.memory_space<vmem>>, vector<1x16x16x4xbf16>
    %2 = vector.shape_cast %1 : vector<1x16x16x4xbf16> to vector<16x16x4xbf16>
    %3 = vector.shape_cast %2 : vector<16x16x4xbf16> to vector<256x4xbf16>
    %c0_3 = arith.constant 0 : index
    %c0_4 = arith.constant 0 : index
    %c0_5 = arith.constant 0 : index
    %4 = vector.load %arg2[%c0_3, %c0_4, %c0_5] : memref<9x4x4xbf16, #tpu.memory_space<vmem>>, vector<1x4x4xbf16>
    %5 = vector.shape_cast %4 : vector<1x4x4xbf16> to vector<4x4xbf16>
    %cst_6 = arith.constant dense<0.000000e+00> : vector<256x4xf32>
    %6 = tpu.matmul %3, %5, %cst_6 {dimension_numbers = #tpu.dot_dimension_numbers<[1], [0], [0], [1], [0, 0, 1, 1], [], []>} : vector<256x4xbf16>, vector<4x4xbf16>, vector<256x4xf32> -> vector<256x4xf32>
    %7 = arith.addf %0, %6 : vector<256x4xf32>
    %c0_7 = arith.constant 0 : index
    %c0_8 = arith.constant 0 : index
    %c1 = arith.constant 1 : index
    %c0_9 = arith.constant 0 : index
    %8 = vector.load %arg1[%c0_7, %c0_8, %c1, %c0_9] : memref<1x18x18x4xbf16, #tpu.memory_space<vmem>>, vector<1x16x16x4xbf16>
    %9 = vector.shape_cast %8 : vector<1x16x16x4xbf16> to vector<16x16x4xbf16>
    %10 = vector.shape_cast %9 : vector<16x16x4xbf16> to vector<256x4xbf16>
    %c1_10 = arith.constant 1 : index
    %c0_11 = arith.constant 0 : index
    %c0_12 = arith.constant 0 : index
    %11 = vector.load %arg2[%c1_10, %c0_11, %c0_12] : memref<9x4x4xbf16, #tpu.memory_space<vmem>>, vector<1x4x4xbf16>
    %12 = vector.shape_cast %11 : vector<1x4x4xbf16> to vector<4x4xbf16>
    %cst_13 = arith.constant dense<0.000000e+00> : vector<256x4xf32>
    %13 = tpu.matmul %10, %12, %cst_13 {dimension_numbers = #tpu.dot_dimension_numbers<[1], [0], [0], [1], [0, 0, 1, 1], [], []>} : vector<256x4xbf16>, vector<4x4xbf16>, vector<256x4xf32> -> vector<256x4xf32>
    %14 = arith.addf %7, %13 : vector<256x4xf32>
    %c0_14 = arith.constant 0 : index
    %c0_15 = arith.constant 0 : index
    %c2 = arith.constant 2 : index
    %c0_16 = arith.constant 0 : index
    %15 = vector.load %arg1[%c0_14, %c0_15, %c2, %c0_16] : memref<1x18x18x4xbf16, #tpu.memory_space<vmem>>, vector<1x16x16x4xbf16>
    %16 = vector.shape_cast %15 : vector<1x16x16x4xbf16> to vector<16x16x4xbf16>
    %17 = vector.shape_cast %16 : vector<16x16x4xbf16> to vector<256x4xbf16>
    %c2_17 = arith.constant 2 : index
    %c0_18 = arith.constant 0 : index
    %c0_19 = arith.constant 0 : index
    %18 = vector.load %arg2[%c2_17, %c0_18, %c0_19] : memref<9x4x4xbf16, #tpu.memory_space<vmem>>, vector<1x4x4xbf16>
    %19 = vector.shape_cast %18 : vector<1x4x4xbf16> to vector<4x4xbf16>
    %cst_20 = arith.constant dense<0.000000e+00> : vector<256x4xf32>
    %20 = tpu.matmul %17, %19, %cst_20 {dimension_numbers = #tpu.dot_dimension_numbers<[1], [0], [0], [1], [0, 0, 1, 1], [], []>} : vector<256x4xbf16>, vector<4x4xbf16>, vector<256x4xf32> -> vector<256x4xf32>
    %21 = arith.addf %14, %20 : vector<256x4xf32>
    %c0_21 = arith.constant 0 : index
    %c1_22 = arith.constant 1 : index
    %c0_23 = arith.constant 0 : index
    %c0_24 = arith.constant 0 : index
    %22 = vector.load %arg1[%c0_21, %c1_22, %c0_23, %c0_24] : memref<1x18x18x4xbf16, #tpu.memory_space<vmem>>, vector<1x16x16x4xbf16>
    %23 = vector.shape_cast %22 : vector<1x16x16x4xbf16> to vector<16x16x4xbf16>
    %24 = vector.shape_cast %23 : vector<16x16x4xbf16> to vector<256x4xbf16>
    %c3 = arith.constant 3 : index
    %c0_25 = arith.constant 0 : index
    %c0_26 = arith.constant 0 : index
    %25 = vector.load %arg2[%c3, %c0_25, %c0_26] : memref<9x4x4xbf16, #tpu.memory_space<vmem>>, vector<1x4x4xbf16>
    %26 = vector.shape_cast %25 : vector<1x4x4xbf16> to vector<4x4xbf16>
    %cst_27 = arith.constant dense<0.000000e+00> : vector<256x4xf32>
    %27 = tpu.matmul %24, %26, %cst_27 {dimension_numbers = #tpu.dot_dimension_numbers<[1], [0], [0], [1], [0, 0, 1, 1], [], []>} : vector<256x4xbf16>, vector<4x4xbf16>, vector<256x4xf32> -> vector<256x4xf32>
    %28 = arith.addf %21, %27 : vector<256x4xf32>
    %c0_28 = arith.constant 0 : index
    %c1_29 = arith.constant 1 : index
    %c1_30 = arith.constant 1 : index
    %c0_31 = arith.constant 0 : index
    %29 = vector.load %arg1[%c0_28, %c1_29, %c1_30, %c0_31] : memref<1x18x18x4xbf16, #tpu.memory_space<vmem>>, vector<1x16x16x4xbf16>
    %30 = vector.shape_cast %29 : vector<1x16x16x4xbf16> to vector<16x16x4xbf16>
    %31 = vector.shape_cast %30 : vector<16x16x4xbf16> to vector<256x4xbf16>
    %c4 = arith.constant 4 : index
    %c0_32 = arith.constant 0 : index
    %c0_33 = arith.constant 0 : index
    %32 = vector.load %arg2[%c4, %c0_32, %c0_33] : memref<9x4x4xbf16, #tpu.memory_space<vmem>>, vector<1x4x4xbf16>
    %33 = vector.shape_cast %32 : vector<1x4x4xbf16> to vector<4x4xbf16>
    %cst_34 = arith.constant dense<0.000000e+00> : vector<256x4xf32>
    %34 = tpu.matmul %31, %33, %cst_34 {dimension_numbers = #tpu.dot_dimension_numbers<[1], [0], [0], [1], [0, 0, 1, 1], [], []>} : vector<256x4xbf16>, vector<4x4xbf16>, vector<256x4xf32> -> vector<256x4xf32>
    %35 = arith.addf %28, %34 : vector<256x4xf32>
    %c0_35 = arith.constant 0 : index
    %c1_36 = arith.constant 1 : index
    %c2_37 = arith.constant 2 : index
    %c0_38 = arith.constant 0 : index
    %36 = vector.load %arg1[%c0_35, %c1_36, %c2_37, %c0_38] : memref<1x18x18x4xbf16, #tpu.memory_space<vmem>>, vector<1x16x16x4xbf16>
    %37 = vector.shape_cast %36 : vector<1x16x16x4xbf16> to vector<16x16x4xbf16>
    %38 = vector.shape_cast %37 : vector<16x16x4xbf16> to vector<256x4xbf16>
    %c5 = arith.constant 5 : index
    %c0_39 = arith.constant 0 : index
    %c0_40 = arith.constant 0 : index
    %39 = vector.load %arg2[%c5, %c0_39, %c0_40] : memref<9x4x4xbf16, #tpu.memory_space<vmem>>, vector<1x4x4xbf16>
    %40 = vector.shape_cast %39 : vector<1x4x4xbf16> to vector<4x4xbf16>
    %cst_41 = arith.constant dense<0.000000e+00> : vector<256x4xf32>
    %41 = tpu.matmul %38, %40, %cst_41 {dimension_numbers = #tpu.dot_dimension_numbers<[1], [0], [0], [1], [0, 0, 1, 1], [], []>} : vector<256x4xbf16>, vector<4x4xbf16>, vector<256x4xf32> -> vector<256x4xf32>
    %42 = arith.addf %35, %41 : vector<256x4xf32>
    %c0_42 = arith.constant 0 : index
    %c2_43 = arith.constant 2 : index
    %c0_44 = arith.constant 0 : index
    %c0_45 = arith.constant 0 : index
    %43 = vector.load %arg1[%c0_42, %c2_43, %c0_44, %c0_45] : memref<1x18x18x4xbf16, #tpu.memory_space<vmem>>, vector<1x16x16x4xbf16>
    %44 = vector.shape_cast %43 : vector<1x16x16x4xbf16> to vector<16x16x4xbf16>
    %45 = vector.shape_cast %44 : vector<16x16x4xbf16> to vector<256x4xbf16>
    %c6 = arith.constant 6 : index
    %c0_46 = arith.constant 0 : index
    %c0_47 = arith.constant 0 : index
    %46 = vector.load %arg2[%c6, %c0_46, %c0_47] : memref<9x4x4xbf16, #tpu.memory_space<vmem>>, vector<1x4x4xbf16>
    %47 = vector.shape_cast %46 : vector<1x4x4xbf16> to vector<4x4xbf16>
    %cst_48 = arith.constant dense<0.000000e+00> : vector<256x4xf32>
    %48 = tpu.matmul %45, %47, %cst_48 {dimension_numbers = #tpu.dot_dimension_numbers<[1], [0], [0], [1], [0, 0, 1, 1], [], []>} : vector<256x4xbf16>, vector<4x4xbf16>, vector<256x4xf32> -> vector<256x4xf32>
    %49 = arith.addf %42, %48 : vector<256x4xf32>
    %c0_49 = arith.constant 0 : index
    %c2_50 = arith.constant 2 : index
    %c1_51 = arith.constant 1 : index
    %c0_52 = arith.constant 0 : index
    %50 = vector.load %arg1[%c0_49, %c2_50, %c1_51, %c0_52] : memref<1x18x18x4xbf16, #tpu.memory_space<vmem>>, vector<1x16x16x4xbf16>
    %51 = vector.shape_cast %50 : vector<1x16x16x4xbf16> to vector<16x16x4xbf16>
    %52 = vector.shape_cast %51 : vector<16x16x4xbf16> to vector<256x4xbf16>
    %c7 = arith.constant 7 : index
    %c0_53 = arith.constant 0 : index
    %c0_54 = arith.constant 0 : index
    %53 = vector.load %arg2[%c7, %c0_53, %c0_54] : memref<9x4x4xbf16, #tpu.memory_space<vmem>>, vector<1x4x4xbf16>
    %54 = vector.shape_cast %53 : vector<1x4x4xbf16> to vector<4x4xbf16>
    %cst_55 = arith.constant dense<0.000000e+00> : vector<256x4xf32>
    %55 = tpu.matmul %52, %54, %cst_55 {dimension_numbers = #tpu.dot_dimension_numbers<[1], [0], [0], [1], [0, 0, 1, 1], [], []>} : vector<256x4xbf16>, vector<4x4xbf16>, vector<256x4xf32> -> vector<256x4xf32>
    %56 = arith.addf %49, %55 : vector<256x4xf32>
    %c0_56 = arith.constant 0 : index
    %c2_57 = arith.constant 2 : index
    %c2_58 = arith.constant 2 : index
    %c0_59 = arith.constant 0 : index
    %57 = vector.load %arg1[%c0_56, %c2_57, %c2_58, %c0_59] : memref<1x18x18x4xbf16, #tpu.memory_space<vmem>>, vector<1x16x16x4xbf16>
    %58 = vector.shape_cast %57 : vector<1x16x16x4xbf16> to vector<16x16x4xbf16>
    %59 = vector.shape_cast %58 : vector<16x16x4xbf16> to vector<256x4xbf16>
    %c8 = arith.constant 8 : index
    %c0_60 = arith.constant 0 : index
    %c0_61 = arith.constant 0 : index
    %60 = vector.load %arg2[%c8, %c0_60, %c0_61] : memref<9x4x4xbf16, #tpu.memory_space<vmem>>, vector<1x4x4xbf16>
    %61 = vector.shape_cast %60 : vector<1x4x4xbf16> to vector<4x4xbf16>
    %cst_62 = arith.constant dense<0.000000e+00> : vector<256x4xf32>
    %62 = tpu.matmul %59, %61, %cst_62 {dimension_numbers = #tpu.dot_dimension_numbers<[1], [0], [0], [1], [0, 0, 1, 1], [], []>} : vector<256x4xbf16>, vector<4x4xbf16>, vector<256x4xf32> -> vector<256x4xf32>
    %63 = arith.addf %56, %62 : vector<256x4xf32>
    %c0_63 = arith.constant 0 : index
    %c0_64 = arith.constant 0 : index
    %64 = vector.load %arg3[%c0_63, %c0_64] : memref<1x4xf32, #tpu.memory_space<vmem>>, vector<1x4xf32>
    %65 = vector.broadcast %64 : vector<1x4xf32> to vector<256x4xf32>
    %66 = arith.addf %63, %65 : vector<256x4xf32>
    %c0_65 = arith.constant 0 : index
    %c0_66 = arith.constant 0 : index
    %c0_67 = arith.constant 0 : index
    %67 = vector.load %arg4[%c0_65, %c0_66, %c0_67] : memref<1x256x4xf32, #tpu.memory_space<vmem>>, vector<1x256x4xf32>
    %68 = vector.shape_cast %67 : vector<1x256x4xf32> to vector<256x4xf32>
    %69 = vector.shape_cast %66 : vector<256x4xf32> to vector<1x256x4xf32>
    tpu.vector_store %arg4[%c0_65, %c0_66, %c0_67], %69 {strides = array<i32>} : memref<1x256x4xf32, #tpu.memory_space<vmem>>, vector<1x256x4xf32>,
    %cst_68 = arith.constant dense<0.000000e+00> : vector<4xf32>
    %70 = vector.multi_reduction <add>, %66, %cst_68 [0] : vector<256x4xf32> to vector<4xf32>
    %71 = vector.shape_cast %70 : vector<4xf32> to vector<1x4xf32>
    %c0_69 = arith.constant 0 : index
    %c0_70 = arith.constant 0 : index
    %c0_71 = arith.constant 0 : index
    %72 = vector.load %arg5[%c0_69, %c0_70, %c0_71] : memref<1x1x4xf32, #tpu.memory_space<vmem>>, vector<1x1x4xf32>
    %73 = vector.shape_cast %72 : vector<1x1x4xf32> to vector<1x4xf32>
    %74 = vector.shape_cast %71 : vector<1x4xf32> to vector<1x1x4xf32>
    tpu.vector_store %arg5[%c0_69, %c0_70, %c0_71], %74 {strides = array<i32>} : memref<1x1x4xf32, #tpu.memory_space<vmem>>, vector<1x1x4xf32>,
    %75 = arith.mulf %66, %66 : vector<256x4xf32>
    %cst_72 = arith.constant dense<0.000000e+00> : vector<4xf32>
    %76 = vector.multi_reduction <add>, %75, %cst_72 [0] : vector<256x4xf32> to vector<4xf32>
    %77 = vector.shape_cast %76 : vector<4xf32> to vector<1x4xf32>
    %c0_73 = arith.constant 0 : index
    %c0_74 = arith.constant 0 : index
    %c0_75 = arith.constant 0 : index
    %78 = vector.load %arg6[%c0_73, %c0_74, %c0_75] : memref<1x1x4xf32, #tpu.memory_space<vmem>>, vector<1x1x4xf32>
    %79 = vector.shape_cast %78 : vector<1x1x4xf32> to vector<1x4xf32>
    %80 = vector.shape_cast %77 : vector<1x4xf32> to vector<1x1x4xf32>
    tpu.vector_store %arg6[%c0_73, %c0_74, %c0_75], %80 {strides = array<i32>} : memref<1x1x4xf32, #tpu.memory_space<vmem>>, vector<1x1x4xf32>,
    return
  }
  func.func @transform_0(%arg0: i32) -> (i32, i32, i32, i32) {
    %c0_i32 = arith.constant 0 : i32
    %c0_i32_0 = arith.constant 0 : i32
    %c0_i32_1 = arith.constant 0 : i32
    %c0_i32_2 = arith.constant 0 : i32
    return %arg0, %c0_i32, %c0_i32_0, %c0_i32_1 : i32, i32, i32, i32
  }
  func.func @transform_1(%arg0: i32) -> (i32, i32, i32) {
    %c0_i32 = arith.constant 0 : i32
    %c0_i32_0 = arith.constant 0 : i32
    %c0_i32_1 = arith.constant 0 : i32
    %c0_i32_2 = arith.constant 0 : i32
    return %c0_i32, %c0_i32_0, %c0_i32_1 : i32, i32, i32
  }
  func.func @transform_2(%arg0: i32) -> (i32, i32) {
    %c0_i32 = arith.constant 0 : i32
    %c0_i32_0 = arith.constant 0 : i32
    %c0_i32_1 = arith.constant 0 : i32
    return %c0_i32, %c0_i32_0 : i32, i32
  }
  func.func @transform_3(%arg0: i32) -> (i32, i32, i32) {
    %c0_i32 = arith.constant 0 : i32
    %c0_i32_0 = arith.constant 0 : i32
    %c0_i32_1 = arith.constant 0 : i32
    return %arg0, %c0_i32, %c0_i32_0 : i32, i32, i32
  }
  func.func @transform_4(%arg0: i32) -> (i32, i32, i32) {
    %c0_i32 = arith.constant 0 : i32
    %c0_i32_0 = arith.constant 0 : i32
    %c0_i32_1 = arith.constant 0 : i32
    return %arg0, %c0_i32, %c0_i32_0 : i32, i32, i32
  }
  func.func @transform_5(%arg0: i32) -> (i32, i32, i32) {
    %c0_i32 = arith.constant 0 : i32
    %c0_i32_0 = arith.constant 0 : i32
    %c0_i32_1 = arith.constant 0 : i32
    return %arg0, %c0_i32, %c0_i32_0 : i32, i32, i32
  }
}

module attributes {stable_mosaic.version = 11 : i64} {
  func.func @_scale_shift_relu_kernel(%arg0: i32, %arg1: memref<512x4xf32, #tpu.memory_space<vmem>>, %arg2: memref<1x4xf32, #tpu.memory_space<vmem>>, %arg3: memref<1x4xf32, #tpu.memory_space<vmem>>, %arg4: memref<512x4xbf16, #tpu.memory_space<vmem>>) attributes {dimension_semantics = [#tpu.dimension_semantics<parallel>], iteration_bounds = array<i64: 1>, scalar_prefetch = 0 : i64, scratch_operands = 0 : i64, tpu.core_type = #tpu.core_type<tc>, window_params = [{transform_indices = @transform_0, window_bounds = array<i64: 512, 4>}, {pipeline_mode = #tpu.pipeline_mode<synchronous>, transform_indices = @transform_1, window_bounds = array<i64: 1, 4>}, {pipeline_mode = #tpu.pipeline_mode<synchronous>, transform_indices = @transform_2, window_bounds = array<i64: 1, 4>}, {transform_indices = @transform_3, window_bounds = array<i64: 512, 4>}]} {
    %c0 = arith.constant 0 : index
    %c0_0 = arith.constant 0 : index
    %0 = vector.load %arg1[%c0, %c0_0] : memref<512x4xf32, #tpu.memory_space<vmem>>, vector<512x4xf32>
    %c0_1 = arith.constant 0 : index
    %c0_2 = arith.constant 0 : index
    %1 = vector.load %arg2[%c0_1, %c0_2] : memref<1x4xf32, #tpu.memory_space<vmem>>, vector<1x4xf32>
    %2 = vector.broadcast %1 : vector<1x4xf32> to vector<512x4xf32>
    %3 = arith.mulf %0, %2 : vector<512x4xf32>
    %c0_3 = arith.constant 0 : index
    %c0_4 = arith.constant 0 : index
    %4 = vector.load %arg3[%c0_3, %c0_4] : memref<1x4xf32, #tpu.memory_space<vmem>>, vector<1x4xf32>
    %5 = vector.broadcast %4 : vector<1x4xf32> to vector<512x4xf32>
    %6 = arith.addf %3, %5 : vector<512x4xf32>
    %cst = arith.constant 0.000000e+00 : f32
    %7 = vector.broadcast %cst : f32 to vector<512x4xf32>
    %8 = arith.maximumf %6, %7 : vector<512x4xf32>
    %9 = arith.truncf %8 : vector<512x4xf32> to vector<512x4xbf16>
    %c0_5 = arith.constant 0 : index
    %c0_6 = arith.constant 0 : index
    %10 = vector.load %arg4[%c0_5, %c0_6] : memref<512x4xbf16, #tpu.memory_space<vmem>>, vector<512x4xbf16>
    tpu.vector_store %arg4[%c0_5, %c0_6], %9 {strides = array<i32>} : memref<512x4xbf16, #tpu.memory_space<vmem>>, vector<512x4xbf16>,
    return
  }
  func.func @transform_0(%arg0: i32) -> (i32, i32) {
    %c0_i32 = arith.constant 0 : i32
    %c0_i32_0 = arith.constant 0 : i32
    return %arg0, %c0_i32 : i32, i32
  }
  func.func @transform_1(%arg0: i32) -> (i32, i32) {
    %c0_i32 = arith.constant 0 : i32
    %c0_i32_0 = arith.constant 0 : i32
    %c0_i32_1 = arith.constant 0 : i32
    return %c0_i32, %c0_i32_0 : i32, i32
  }
  func.func @transform_2(%arg0: i32) -> (i32, i32) {
    %c0_i32 = arith.constant 0 : i32
    %c0_i32_0 = arith.constant 0 : i32
    %c0_i32_1 = arith.constant 0 : i32
    return %c0_i32, %c0_i32_0 : i32, i32
  }
  func.func @transform_3(%arg0: i32) -> (i32, i32) {
    %c0_i32 = arith.constant 0 : i32
    %c0_i32_0 = arith.constant 0 : i32
    return %arg0, %c0_i32 : i32, i32
  }
}

module attributes {stable_mosaic.version = 11 : i64} {
  func.func @_scale_shift_add_relu_kernel(%arg0: i32, %arg1: memref<512x4xf32, #tpu.memory_space<vmem>>, %arg2: memref<1x4xf32, #tpu.memory_space<vmem>>, %arg3: memref<1x4xf32, #tpu.memory_space<vmem>>, %arg4: memref<512x4xf32, #tpu.memory_space<vmem>>, %arg5: memref<512x4xf32, #tpu.memory_space<vmem>>) attributes {dimension_semantics = [#tpu.dimension_semantics<parallel>], iteration_bounds = array<i64: 1>, scalar_prefetch = 0 : i64, scratch_operands = 0 : i64, tpu.core_type = #tpu.core_type<tc>, window_params = [{transform_indices = @transform_0, window_bounds = array<i64: 512, 4>}, {pipeline_mode = #tpu.pipeline_mode<synchronous>, transform_indices = @transform_1, window_bounds = array<i64: 1, 4>}, {pipeline_mode = #tpu.pipeline_mode<synchronous>, transform_indices = @transform_2, window_bounds = array<i64: 1, 4>}, {transform_indices = @transform_3, window_bounds = array<i64: 512, 4>}, {transform_indices = @transform_4, window_bounds = array<i64: 512, 4>}]} {
    %c0 = arith.constant 0 : index
    %c0_0 = arith.constant 0 : index
    %0 = vector.load %arg1[%c0, %c0_0] : memref<512x4xf32, #tpu.memory_space<vmem>>, vector<512x4xf32>
    %c0_1 = arith.constant 0 : index
    %c0_2 = arith.constant 0 : index
    %1 = vector.load %arg2[%c0_1, %c0_2] : memref<1x4xf32, #tpu.memory_space<vmem>>, vector<1x4xf32>
    %2 = vector.broadcast %1 : vector<1x4xf32> to vector<512x4xf32>
    %3 = arith.mulf %0, %2 : vector<512x4xf32>
    %c0_3 = arith.constant 0 : index
    %c0_4 = arith.constant 0 : index
    %4 = vector.load %arg3[%c0_3, %c0_4] : memref<1x4xf32, #tpu.memory_space<vmem>>, vector<1x4xf32>
    %5 = vector.broadcast %4 : vector<1x4xf32> to vector<512x4xf32>
    %6 = arith.addf %3, %5 : vector<512x4xf32>
    %c0_5 = arith.constant 0 : index
    %c0_6 = arith.constant 0 : index
    %7 = vector.load %arg4[%c0_5, %c0_6] : memref<512x4xf32, #tpu.memory_space<vmem>>, vector<512x4xf32>
    %8 = arith.addf %6, %7 : vector<512x4xf32>
    %cst = arith.constant 0.000000e+00 : f32
    %9 = vector.broadcast %cst : f32 to vector<512x4xf32>
    %10 = arith.maximumf %8, %9 : vector<512x4xf32>
    %c0_7 = arith.constant 0 : index
    %c0_8 = arith.constant 0 : index
    %11 = vector.load %arg5[%c0_7, %c0_8] : memref<512x4xf32, #tpu.memory_space<vmem>>, vector<512x4xf32>
    tpu.vector_store %arg5[%c0_7, %c0_8], %10 {strides = array<i32>} : memref<512x4xf32, #tpu.memory_space<vmem>>, vector<512x4xf32>,
    return
  }
  func.func @transform_0(%arg0: i32) -> (i32, i32) {
    %c0_i32 = arith.constant 0 : i32
    %c0_i32_0 = arith.constant 0 : i32
    return %arg0, %c0_i32 : i32, i32
  }
  func.func @transform_1(%arg0: i32) -> (i32, i32) {
    %c0_i32 = arith.constant 0 : i32
    %c0_i32_0 = arith.constant 0 : i32
    %c0_i32_1 = arith.constant 0 : i32
    return %c0_i32, %c0_i32_0 : i32, i32
  }
  func.func @transform_2(%arg0: i32) -> (i32, i32) {
    %c0_i32 = arith.constant 0 : i32
    %c0_i32_0 = arith.constant 0 : i32
    %c0_i32_1 = arith.constant 0 : i32
    return %c0_i32, %c0_i32_0 : i32, i32
  }
  func.func @transform_3(%arg0: i32) -> (i32, i32) {
    %c0_i32 = arith.constant 0 : i32
    %c0_i32_0 = arith.constant 0 : i32
    return %arg0, %c0_i32 : i32, i32
  }
  func.func @transform_4(%arg0: i32) -> (i32, i32) {
    %c0_i32 = arith.constant 0 : i32
    %c0_i32_0 = arith.constant 0 : i32
    return %arg0, %c0_i32 : i32, i32
  }
}

</mosaic_0001>

<bundles_post_ra>
// kernel: residual_forward_nchw.5
= control target key start
LH: loop header
LB: loop body
LE: loop exit
PB: predicated region body
PF: predicated region fallthrough
CT: control target
= control target key end

     0   :  { %vm540_vm0 = vcmask 27648   ;;  %s1345_s0 = inlined_call_operand.vmem [shape: f32[512,4], index: 0, kind: input, shape index: {}]   ;;  %s1346_s1 = inlined_call_operand.vmem [shape: f32[1,4], index: 1, kind: input, shape index: {}]   ;;  %s1347_s2 = inlined_call_operand.vmem [shape: f32[1,4], index: 2, kind: input, shape index: {}]   ;;  %s1348_s3 = inlined_call_operand.vmem [shape: bf16[512,4], index: 3, kind: output, shape index: {}]  }
   0x1   :  { %v14_v0 = vld [vmem:[%s1345_s0] sm:$0xff]  ;;  %v15_v4 = vld [vmem:[%s1345_s0 + $0x8] sm:$0xff]  ;;  %v16_v5 = vld [vmem:[%s1345_s0 + $0x10] sm:$0xff] }
   0x2   :  { %v765_v1 = vld [vmem:[%s1346_s1] ss:$0 sm:$0xff]  ;;  %v17_v6 = vld [vmem:[%s1345_s0 + $0x18] sm:$0xff]  ;;  %v19_v11 = vld [vmem:[%s1345_s0 + $0x28] sm:$0xff] }
   0x3   :  { %v770_v2 = vld [vmem:[%s1347_s2] ss:$0 sm:$0xff]  ;;  %v85_v3 = vmul.f32 %v765_v1, %v14_v0  ;;  %v86_v7 = vmul.f32 %v765_v1, %v15_v4  ;;  %v87_v8 = vmul.f32 %v765_v1, %v16_v5  ;;  %v88_v9 = vmul.f32 %v765_v1, %v17_v6  ;;  %v20_v12 = vld [vmem:[%s1345_s0 + $0x30] sm:$0xff]  ;;  %v21_v17 = vld [vmem:[%s1345_s0 + $0x38] sm:$0xff] }
   0x4   :  { %v18_v10 = vld [vmem:[%s1345_s0 + $0x20] sm:$0xff]  ;;  %v90_v15 = vmul.f32 %v765_v1, %v19_v11  ;;  %v91_v16 = vmul.f32 %v765_v1, %v20_v12  ;;  %v92_v21 = vmul.f32 %v765_v1, %v21_v17  ;;  %v23_v35 = vld [vmem:[%s1345_s0 + $0x48] sm:$0xff]  ;;  %v24_v36 = vld [vmem:[%s1345_s0 + $0x50] sm:$0xff] }
   0x5   :  { %v156_v13 = vadd.f32 %v770_v2, %v85_v3  ;;  %v89_v14 = vmul.f32 %v765_v1, %v18_v10  ;;  %v157_v18 = vadd.f32 %v770_v2, %v86_v7  ;;  %v158_v19 = vadd.f32 %v770_v2, %v87_v8  ;;  %v22_v30 = vld [vmem:[%s1345_s0 + $0x40] sm:$0xff]  ;;  %v25_v37 = vld [vmem:[%s1345_s0 + $0x58] sm:$0xff]  ;;  %v27_v43 = vld [vmem:[%s1345_s0 + $0x68] sm:$0xff] }
   0x6   :  { %v159_v20 = vadd.f32 %v770_v2, %v88_v9  ;;  %v161_v24 = vadd.f32 %v770_v2, %v90_v15  ;;  %v162_v25 = vadd.f32 %v770_v2, %v91_v16  ;;  %v163_v29 = vadd.f32 %v770_v2, %v92_v21  ;;  %v26_v42 = vld [vmem:[%s1345_s0 + $0x60] sm:$0xff]  ;;  %v28_v44 = vld [vmem:[%s1345_s0 + $0x70] sm:$0xff]  ;;  %v29_v49 = vld [vmem:[%s1345_s0 + $0x78] sm:$0xff] }
   0x7   :  { %v220_v22 = vmax.f32 %v156_v13, 0.0  ;;  %v160_v23 = vadd.f32 %v770_v2, %v89_v14  ;;  %v221_v26 = vmax.f32 %v157_v18, 0.0  ;;  %v222_v27 = vmax.f32 %v158_v19, 0.0  ;;  %v30_v8 = vld [vmem:[%s1345_s0 + $0x80] sm:$0xff]  ;;  %v31_v13 = vld [vmem:[%s1345_s0 + $0x88] sm:$0xff]  ;;  %v32_v14 = vld [vmem:[%s1345_s0 + $0x90] sm:$0xff] }
   0x8   :  { %v223_v28 = vmax.f32 %v159_v20, 0.0  ;;  %v225_v33 = vmax.f32 %v161_v24, 0.0  ;;  %v226_v34 = vmax.f32 %v162_v25, 0.0  ;;  %v227_v41 = vmax.f32 %v163_v29, 0.0  ;;  %v33_v15 = vld [vmem:[%s1345_s0 + $0x98] sm:$0xff]  ;;  %v34_v20 = vld [vmem:[%s1345_s0 + $0xa0] sm:$0xff] }
   0x9   :  { %v675_v31 = vpack.c.bf16 %v220_v22, %v220_v22  ;;  %v224_v32 = vmax.f32 %v160_v23, 0.0  ;;  %v676_v38 = vpack.c.bf16 %v221_v26, %v221_v26  ;;  %v677_v39 = vpack.c.bf16 %v222_v27, %v222_v27  ;;  %v35_v21 = vld [vmem:[%s1345_s0 + $0xa8] sm:$0xff]  ;;  %v36_v22 = vld [vmem:[%s1345_s0 + $0xb0] sm:$0xff]  ;;  %v37_v27 = vld [vmem:[%s1345_s0 + $0xb8] sm:$0xff] }
   0xa   :  { %v678_v40 = vpack.c.bf16 %v223_v28, %v223_v28  ;;  %v680_v46 = vpack.c.bf16 %v225_v33, %v225_v33  ;;  %v681_v47 = vpack.c.bf16 %v226_v34, %v226_v34  ;;  %v93_v48 = vmul.f32 %v765_v1, %v22_v30 }
   0xb   :  { %541 = vst.msk [vmem:[%s1348_s3] sm:$0xf] %vm540_vm0, %v675_v31  ;;  %v679_v45 = vpack.c.bf16 %v224_v32, %v224_v32  ;;  %542 = vst.msk [vmem:[%s1348_s3 + $0x4] sm:$0xf] %vm540_vm0, %v676_v38  ;;  %v682_v50 = vpack.c.bf16 %v227_v41, %v227_v41  ;;  %v94_v51 = vmul.f32 %v765_v1, %v23_v35 }
   0xc   :  { %543 = vst.msk [vmem:[%s1348_s3 + $0x8] sm:$0xf] %vm540_vm0, %v677_v39  ;;  %544 = vst.msk [vmem:[%s1348_s3 + $0xc] sm:$0xf] %vm540_vm0, %v678_v40  ;;  %v95_v52 = vmul.f32 %v765_v1, %v24_v36  ;;  %v96_v53 = vmul.f32 %v765_v1, %v25_v37  ;;  %v164_v54 = vadd.f32 %v770_v2, %v93_v48  ;;  %v38_v48 = vld [vmem:[%s1345_s0 + $0xc0] sm:$0xff] }
   0xd   :  { %545 = vst.msk [vmem:[%s1348_s3 + $0x10] sm:$0xf] %vm540_vm0, %v679_v45  ;;  %546 = vst.msk [vmem:[%s1348_s3 + $0x14] sm:$0xf] %vm540_vm0, %v680_v46  ;;  %v97_v55 = vmul.f32 %v765_v1, %v26_v42  ;;  %v98_v56 = vmul.f32 %v765_v1, %v27_v43  ;;  %v99_v57 = vmul.f32 %v765_v1, %v28_v44 }
   0xe   :  { %547 = vst.msk [vmem:[%s1348_s3 + $0x18] sm:$0xf] %vm540_vm0, %v681_v47  ;;  %548 = vst.msk [vmem:[%s1348_s3 + $0x1c] sm:$0xf] %vm540_vm0, %v682_v50  ;;  %v165_v58 = vadd.f32 %v770_v2, %v94_v51  ;;  %v166_v59 = vadd.f32 %v770_v2, %v95_v52  ;;  %v167_v60 = vadd.f32 %v770_v2, %v96_v53  ;;  %v228_v62 = vmax.f32 %v164_v54, 0.0  ;;  %v39_v53 = vld [vmem:[%s1345_s0 + $0xc8] sm:$0xff] }
   0xf   :  { %v100_v61 = vmul.f32 %v765_v1, %v29_v49  ;;  %v168_v63 = vadd.f32 %v770_v2, %v97_v55  ;;  %v169_v0 = vadd.f32 %v770_v2, %v98_v56  ;;  %v170_v3 = vadd.f32 %v770_v2, %v99_v57  ;;  %v40_v54 = vld [vmem:[%s1345_s0 + $0xd0] sm:$0xff]  ;;  %v41_v55 = vld [vmem:[%s1345_s0 + $0xd8] sm:$0xff] }
  0x10   :  { %v229_v4 = vmax.f32 %v165_v58, 0.0  ;;  %v230_v5 = vmax.f32 %v166_v59, 0.0  ;;  %v231_v6 = vmax.f32 %v167_v60, 0.0  ;;  %v683_v9 = vpack.c.bf16 %v228_v62, %v228_v62  ;;  %v42_v60 = vld [vmem:[%s1345_s0 + $0xe0] sm:$0xff]  ;;  %v44_v62 = vld [vmem:[%s1345_s0 + $0xf0] sm:$0xff] }
  0x11   :  { %v171_v7 = vadd.f32 %v770_v2, %v100_v61  ;;  %v232_v10 = vmax.f32 %v168_v63, 0.0  ;;  %v233_v11 = vmax.f32 %v169_v0, 0.0  ;;  %v234_v12 = vmax.f32 %v170_v3, 0.0  ;;  %v43_v61 = vld [vmem:[%s1345_s0 + $0xe8] sm:$0xff] }
  0x12   :  { %v684_v16 = vpack.c.bf16 %v229_v4, %v229_v4  ;;  %v685_v17 = vpack.c.bf16 %v230_v5, %v230_v5  ;;  %v686_v18 = vpack.c.bf16 %v231_v6, %v231_v6  ;;  %549 = vst.msk [vmem:[%s1348_s3 + $0x20] sm:$0xf] %vm540_vm0, %v683_v9  ;;  %v101_v26 = vmul.f32 %v765_v1, %v30_v8  ;;  %v45_v5 = vld [vmem:[%s1345_s0 + $0xf8] sm:$0xff] }
  0x13   :  { %v235_v19 = vmax.f32 %v171_v7, 0.0  ;;  %v687_v23 = vpack.c.bf16 %v232_v10, %v232_v10  ;;  %v688_v24 = vpack.c.bf16 %v233_v11, %v233_v11  ;;  %v689_v25 = vpack.c.bf16 %v234_v12, %v234_v12 }
  0x14   :  { %550 = vst.msk [vmem:[%s1348_s3 + $0x24] sm:$0xf] %vm540_vm0, %v684_v16  ;;  %551 = vst.msk [vmem:[%s1348_s3 + $0x28] sm:$0xf] %vm540_vm0, %v685_v17  ;;  %v102_v29 = vmul.f32 %v765_v1, %v31_v13  ;;  %v103_v30 = vmul.f32 %v765_v1, %v32_v14  ;;  %v104_v31 = vmul.f32 %v765_v1, %v33_v15 }
  0x15   :  { %552 = vst.msk [vmem:[%s1348_s3 + $0x2c] sm:$0xf] %vm540_vm0, %v686_v18  ;;  %v690_v28 = vpack.c.bf16 %v235_v19, %v235_v19  ;;  %553 = vst.msk [vmem:[%s1348_s3 + $0x30] sm:$0xf] %vm540_vm0, %v687_v23  ;;  %v172_v32 = vadd.f32 %v770_v2, %v101_v26  ;;  %v105_v33 = vmul.f32 %v765_v1, %v34_v20  ;;  %v46_v26 = vld [vmem:[%s1345_s0 + $0x100] sm:$0xff] }
  0x16   :  { %554 = vst.msk [vmem:[%s1348_s3 + $0x34] sm:$0xf] %vm540_vm0, %v688_v24  ;;  %555 = vst.msk [vmem:[%s1348_s3 + $0x38] sm:$0xf] %vm540_vm0, %v689_v25  ;;  %v106_v34 = vmul.f32 %v765_v1, %v35_v21  ;;  %v107_v35 = vmul.f32 %v765_v1, %v36_v22  ;;  %v173_v36 = vadd.f32 %v770_v2, %v102_v29 }
  0x17   :  { %556 = vst.msk [vmem:[%s1348_s3 + $0x3c] sm:$0xf] %vm540_vm0, %v690_v28  ;;  %v174_v37 = vadd.f32 %v770_v2, %v103_v30  ;;  %v175_v38 = vadd.f32 %v770_v2, %v104_v31  ;;  %v108_v39 = vmul.f32 %v765_v1, %v37_v27  ;;  %v236_v40 = vmax.f32 %v172_v32, 0.0  ;;  %v47_v31 = vld [vmem:[%s1345_s0 + $0x108] sm:$0xff]  ;;  %v48_v32 = vld [vmem:[%s1345_s0 + $0x110] sm:$0xff] }
  0x18   :  { %v176_v41 = vadd.f32 %v770_v2, %v105_v33  ;;  %v177_v42 = vadd.f32 %v770_v2, %v106_v34  ;;  %v178_v43 = vadd.f32 %v770_v2, %v107_v35  ;;  %v237_v44 = vmax.f32 %v173_v36, 0.0  ;;  %v49_v33 = vld [vmem:[%s1345_s0 + $0x118] sm:$0xff] }
  0x19   :  { %v238_v45 = vmax.f32 %v174_v37, 0.0  ;;  %v239_v46 = vmax.f32 %v175_v38, 0.0  ;;  %v179_v47 = vadd.f32 %v770_v2, %v108_v39  ;;  %v691_v49 = vpack.c.bf16 %v236_v40, %v236_v40  ;;  %v50_v38 = vld [vmem:[%s1345_s0 + $0x120] sm:$0xff]  ;;  %v51_v39 = vld [vmem:[%s1345_s0 + $0x128] sm:$0xff]  ;;  %v52_v40 = vld [vmem:[%s1345_s0 + $0x130] sm:$0xff] }
  0x1a   :  { %v240_v50 = vmax.f32 %v176_v41, 0.0  ;;  %v241_v51 = vmax.f32 %v177_v42, 0.0  ;;  %v242_v52 = vmax.f32 %v178_v43, 0.0  ;;  %v692_v56 = vpack.c.bf16 %v237_v44, %v237_v44 }
  0x1b   :  { %v693_v57 = vpack.c.bf16 %v238_v45, %v238_v45  ;;  %v694_v58 = vpack.c.bf16 %v239_v46, %v239_v46  ;;  %v243_v59 = vmax.f32 %v179_v47, 0.0  ;;  %557 = vst.msk [vmem:[%s1348_s3 + $0x40] sm:$0xf] %vm540_vm0, %v691_v49  ;;  %v109_v4 = vmul.f32 %v765_v1, %v38_v48  ;;  %v53_v45 = vld [vmem:[%s1345_s0 + $0x138] sm:$0xff] }
  0x1c   :  { %v695_v63 = vpack.c.bf16 %v240_v50, %v240_v50  ;;  %v696_v0 = vpack.c.bf16 %v241_v51, %v241_v51  ;;  %v697_v3 = vpack.c.bf16 %v242_v52, %v242_v52  ;;  %558 = vst.msk [vmem:[%s1348_s3 + $0x44] sm:$0xf] %vm540_vm0, %v692_v56  ;;  %v110_v7 = vmul.f32 %v765_v1, %v39_v53 }
  0x1d   :  { %559 = vst.msk [vmem:[%s1348_s3 + $0x48] sm:$0xf] %vm540_vm0, %v693_v57  ;;  %560 = vst.msk [vmem:[%s1348_s3 + $0x4c] sm:$0xf] %vm540_vm0, %v694_v58  ;;  %v698_v6 = vpack.c.bf16 %v243_v59, %v243_v59  ;;  %v111_v8 = vmul.f32 %v765_v1, %v40_v54  ;;  %v112_v9 = vmul.f32 %v765_v1, %v41_v55 }
  0x1e   :  { %561 = vst.msk [vmem:[%s1348_s3 + $0x50] sm:$0xf] %vm540_vm0, %v695_v63  ;;  %562 = vst.msk [vmem:[%s1348_s3 + $0x54] sm:$0xf] %vm540_vm0, %v696_v0  ;;  %v180_v10 = vadd.f32 %v770_v2, %v109_v4  ;;  %v113_v11 = vmul.f32 %v765_v1, %v42_v60  ;;  %v114_v12 = vmul.f32 %v765_v1, %v43_v61  ;;  %v54_v4 = vld [vmem:[%s1345_s0 + $0x140] sm:$0xff] }
  0x1f   :  { %563 = vst.msk [vmem:[%s1348_s3 + $0x58] sm:$0xf] %vm540_vm0, %v697_v3  ;;  %v115_v13 = vmul.f32 %v765_v1, %v44_v62  ;;  %564 = vst.msk [vmem:[%s1348_s3 + $0x5c] sm:$0xf] %vm540_vm0, %v698_v6  ;;  %v181_v14 = vadd.f32 %v770_v2, %v110_v7  ;;  %v182_v15 = vadd.f32 %v770_v2, %v111_v8 }
  0x20   :  { %v183_v16 = vadd.f32 %v770_v2, %v112_v9  ;;  %v116_v17 = vmul.f32 %v765_v1, %v45_v5  ;;  %v244_v18 = vmax.f32 %v180_v10, 0.0  ;;  %v184_v19 = vadd.f32 %v770_v2, %v113_v11  ;;  %v55_v9 = vld [vmem:[%s1345_s0 + $0x148] sm:$0xff]  ;;  %v56_v10 = vld [vmem:[%s1345_s0 + $0x150] sm:$0xff]  ;;  %v57_v11 = vld [vmem:[%s1345_s0 + $0x158] sm:$0xff] }
  0x21   :  { %v185_v20 = vadd.f32 %v770_v2, %v114_v12  ;;  %v186_v21 = vadd.f32 %v770_v2, %v115_v13  ;;  %v245_v22 = vmax.f32 %v181_v14, 0.0  ;;  %v246_v23 = vmax.f32 %v182_v15, 0.0 }
  0x22   :  { %v247_v24 = vmax.f32 %v183_v16, 0.0  ;;  %v187_v25 = vadd.f32 %v770_v2, %v116_v17  ;;  %v699_v27 = vpack.c.bf16 %v244_v18, %v244_v18  ;;  %v248_v28 = vmax.f32 %v184_v19, 0.0  ;;  %v58_v16 = vld [vmem:[%s1345_s0 + $0x160] sm:$0xff]  ;;  %v59_v17 = vld [vmem:[%s1345_s0 + $0x168] sm:$0xff]  ;;  %v60_v18 = vld [vmem:[%s1345_s0 + $0x170] sm:$0xff] }
  0x23   :  { %v249_v29 = vmax.f32 %v185_v20, 0.0  ;;  %v250_v30 = vmax.f32 %v186_v21, 0.0  ;;  %v700_v34 = vpack.c.bf16 %v245_v22, %v245_v22  ;;  %v701_v35 = vpack.c.bf16 %v246_v23, %v246_v23  ;;  %v61_v23 = vld [vmem:[%s1345_s0 + $0x178] sm:$0xff] }
  0x24   :  { %v702_v36 = vpack.c.bf16 %v247_v24, %v247_v24  ;;  %v251_v37 = vmax.f32 %v187_v25, 0.0  ;;  %565 = vst.msk [vmem:[%s1348_s3 + $0x60] sm:$0xf] %vm540_vm0, %v699_v27  ;;  %v703_v41 = vpack.c.bf16 %v248_v28, %v248_v28  ;;  %v117_v44 = vmul.f32 %v765_v1, %v46_v26 }
  0x25   :  { %v704_v42 = vpack.c.bf16 %v249_v29, %v249_v29  ;;  %v705_v43 = vpack.c.bf16 %v250_v30, %v250_v30  ;;  %566 = vst.msk [vmem:[%s1348_s3 + $0x64] sm:$0xf] %vm540_vm0, %v700_v34  ;;  %567 = vst.msk [vmem:[%s1348_s3 + $0x68] sm:$0xf] %vm540_vm0, %v701_v35  ;;  %v118_v47 = vmul.f32 %v765_v1, %v47_v31 }
  0x26   :  { %568 = vst.msk [vmem:[%s1348_s3 + $0x6c] sm:$0xf] %vm540_vm0, %v702_v36  ;;  %v706_v46 = vpack.c.bf16 %v251_v37, %v251_v37  ;;  %v119_v48 = vmul.f32 %v765_v1, %v48_v32  ;;  %v120_v49 = vmul.f32 %v765_v1, %v49_v33  ;;  %569 = vst.msk [vmem:[%s1348_s3 + $0x70] sm:$0xf] %vm540_vm0, %v703_v41 }
  0x27   :  { %570 = vst.msk [vmem:[%s1348_s3 + $0x74] sm:$0xf] %vm540_vm0, %v704_v42  ;;  %571 = vst.msk [vmem:[%s1348_s3 + $0x78] sm:$0xf] %vm540_vm0, %v705_v43  ;;  %v188_v50 = vadd.f32 %v770_v2, %v117_v44  ;;  %v121_v51 = vmul.f32 %v765_v1, %v50_v38  ;;  %v122_v52 = vmul.f32 %v765_v1, %v51_v39  ;;  %v62_v44 = vld [vmem:[%s1345_s0 + $0x180] sm:$0xff] }
  0x28   :  { %v123_v53 = vmul.f32 %v765_v1, %v52_v40  ;;  %572 = vst.msk [vmem:[%s1348_s3 + $0x7c] sm:$0xf] %vm540_vm0, %v706_v46  ;;  %v189_v54 = vadd.f32 %v770_v2, %v118_v47  ;;  %v190_v55 = vadd.f32 %v770_v2, %v119_v48  ;;  %v191_v56 = vadd.f32 %v770_v2, %v120_v49  ;;  %v63_v49 = vld [vmem:[%s1345_s0 + $0x188] sm:$0xff] }
  0x29   :  { %v124_v57 = vmul.f32 %v765_v1, %v53_v45  ;;  %v252_v58 = vmax.f32 %v188_v50, 0.0  ;;  %v192_v59 = vadd.f32 %v770_v2, %v121_v51  ;;  %v193_v60 = vadd.f32 %v770_v2, %v122_v52  ;;  %v64_v50 = vld [vmem:[%s1345_s0 + $0x190] sm:$0xff]  ;;  %v65_v51 = vld [vmem:[%s1345_s0 + $0x198] sm:$0xff] }
  0x2a   :  { %v194_v61 = vadd.f32 %v770_v2, %v123_v53  ;;  %v253_v62 = vmax.f32 %v189_v54, 0.0  ;;  %v254_v63 = vmax.f32 %v190_v55, 0.0  ;;  %v255_v0 = vmax.f32 %v191_v56, 0.0  ;;  %v66_v56 = vld [vmem:[%s1345_s0 + $0x1a0] sm:$0xff] }
  0x2b   :  { %v195_v3 = vadd.f32 %v770_v2, %v124_v57  ;;  %v707_v5 = vpack.c.bf16 %v252_v58, %v252_v58  ;;  %v256_v6 = vmax.f32 %v192_v59, 0.0  ;;  %v257_v7 = vmax.f32 %v193_v60, 0.0  ;;  %v67_v57 = vld [vmem:[%s1345_s0 + $0x1a8] sm:$0xff]  ;;  %v68_v58 = vld [vmem:[%s1345_s0 + $0x1b0] sm:$0xff] }
  0x2c   :  { %v258_v8 = vmax.f32 %v194_v61, 0.0  ;;  %v708_v12 = vpack.c.bf16 %v253_v62, %v253_v62  ;;  %v709_v13 = vpack.c.bf16 %v254_v63, %v254_v63  ;;  %v710_v14 = vpack.c.bf16 %v255_v0, %v255_v0  ;;  %v69_v63 = vld [vmem:[%s1345_s0 + $0x1b8] sm:$0xff] }
  0x2d   :  { %v259_v15 = vmax.f32 %v195_v3, 0.0  ;;  %573 = vst.msk [vmem:[%s1348_s3 + $0x80] sm:$0xf] %vm540_vm0, %v707_v5  ;;  %v711_v19 = vpack.c.bf16 %v256_v6, %v256_v6  ;;  %v712_v20 = vpack.c.bf16 %v257_v7, %v257_v7  ;;  %v125_v22 = vmul.f32 %v765_v1, %v54_v4 }
  0x2e   :  { %v713_v21 = vpack.c.bf16 %v258_v8, %v258_v8  ;;  %574 = vst.msk [vmem:[%s1348_s3 + $0x84] sm:$0xf] %vm540_vm0, %v708_v12  ;;  %575 = vst.msk [vmem:[%s1348_s3 + $0x88] sm:$0xf] %vm540_vm0, %v709_v13  ;;  %v126_v25 = vmul.f32 %v765_v1, %v55_v9  ;;  %v127_v26 = vmul.f32 %v765_v1, %v56_v10 }
  0x2f   :  { %576 = vst.msk [vmem:[%s1348_s3 + $0x8c] sm:$0xf] %vm540_vm0, %v710_v14  ;;  %v714_v24 = vpack.c.bf16 %v259_v15, %v259_v15  ;;  %v128_v27 = vmul.f32 %v765_v1, %v57_v11  ;;  %577 = vst.msk [vmem:[%s1348_s3 + $0x90] sm:$0xf] %vm540_vm0, %v711_v19  ;;  %v196_v28 = vadd.f32 %v770_v2, %v125_v22  ;;  %v70_v22 = vld [vmem:[%s1345_s0 + $0x1c0] sm:$0xff] }
  0x30   :  { %578 = vst.msk [vmem:[%s1348_s3 + $0x94] sm:$0xf] %vm540_vm0, %v712_v20  ;;  %579 = vst.msk [vmem:[%s1348_s3 + $0x98] sm:$0xf] %vm540_vm0, %v713_v21  ;;  %v129_v29 = vmul.f32 %v765_v1, %v58_v16  ;;  %v130_v30 = vmul.f32 %v765_v1, %v59_v17  ;;  %v131_v31 = vmul.f32 %v765_v1, %v60_v18 }
  0x31   :  { %580 = vst.msk [vmem:[%s1348_s3 + $0x9c] sm:$0xf] %vm540_vm0, %v714_v24  ;;  %v197_v32 = vadd.f32 %v770_v2, %v126_v25  ;;  %v198_v33 = vadd.f32 %v770_v2, %v127_v26  ;;  %v199_v34 = vadd.f32 %v770_v2, %v128_v27  ;;  %v132_v35 = vmul.f32 %v765_v1, %v61_v23  ;;  %v71_v27 = vld [vmem:[%s1345_s0 + $0x1c8] sm:$0xff] }
  0x32   :  { %v260_v36 = vmax.f32 %v196_v28, 0.0  ;;  %v200_v37 = vadd.f32 %v770_v2, %v129_v29  ;;  %v201_v38 = vadd.f32 %v770_v2, %v130_v30  ;;  %v202_v39 = vadd.f32 %v770_v2, %v131_v31  ;;  %v72_v28 = vld [vmem:[%s1345_s0 + $0x1d0] sm:$0xff]  ;;  %v73_v29 = vld [vmem:[%s1345_s0 + $0x1d8] sm:$0xff] }
  0x33   :  { %v261_v40 = vmax.f32 %v197_v32, 0.0  ;;  %v262_v41 = vmax.f32 %v198_v33, 0.0  ;;  %v263_v42 = vmax.f32 %v199_v34, 0.0  ;;  %v203_v43 = vadd.f32 %v770_v2, %v132_v35  ;;  %v74_v34 = vld [vmem:[%s1345_s0 + $0x1e0] sm:$0xff]  ;;  %v75_v35 = vld [vmem:[%s1345_s0 + $0x1e8] sm:$0xff] }
  0x34   :  { %v715_v45 = vpack.c.bf16 %v260_v36, %v260_v36  ;;  %v264_v46 = vmax.f32 %v200_v37, 0.0  ;;  %v265_v47 = vmax.f32 %v201_v38, 0.0  ;;  %v266_v48 = vmax.f32 %v202_v39, 0.0  ;;  %v76_v36 = vld [vmem:[%s1345_s0 + $0x1f0] sm:$0xff] }
  0x35   :  { %v716_v52 = vpack.c.bf16 %v261_v40, %v261_v40  ;;  %v717_v53 = vpack.c.bf16 %v262_v41, %v262_v41  ;;  %v718_v54 = vpack.c.bf16 %v263_v42, %v263_v42  ;;  %v267_v55 = vmax.f32 %v203_v43, 0.0  ;;  %v77_v41 = vld [vmem:[%s1345_s0 + $0x1f8] sm:$0xff] }
  0x36   :  { %581 = vst.msk [vmem:[%s1348_s3 + $0xa0] sm:$0xf] %vm540_vm0, %v715_v45  ;;  %v719_v59 = vpack.c.bf16 %v264_v46, %v264_v46  ;;  %v720_v60 = vpack.c.bf16 %v265_v47, %v265_v47  ;;  %v721_v61 = vpack.c.bf16 %v266_v48, %v266_v48  ;;  %v133_v62 = vmul.f32 %v765_v1, %v62_v44 }
  0x37   :  { %582 = vst.msk [vmem:[%s1348_s3 + $0xa4] sm:$0xf] %vm540_vm0, %v716_v52  ;;  %583 = vst.msk [vmem:[%s1348_s3 + $0xa8] sm:$0xf] %vm540_vm0, %v717_v53  ;;  %v722_v0 = vpack.c.bf16 %v267_v55, %v267_v55  ;;  %v134_v3 = vmul.f32 %v765_v1, %v63_v49  ;;  %v135_v4 = vmul.f32 %v765_v1, %v64_v50 }
  0x38   :  { %584 = vst.msk [vmem:[%s1348_s3 + $0xac] sm:$0xf] %vm540_vm0, %v718_v54  ;;  %v136_v5 = vmul.f32 %v765_v1, %v65_v51  ;;  %585 = vst.msk [vmem:[%s1348_s3 + $0xb0] sm:$0xf] %vm540_vm0, %v719_v59  ;;  %v204_v6 = vadd.f32 %v770_v2, %v133_v62  ;;  %v137_v7 = vmul.f32 %v765_v1, %v66_v56 }
  0x39   :  { %586 = vst.msk [vmem:[%s1348_s3 + $0xb4] sm:$0xf] %vm540_vm0, %v720_v60  ;;  %587 = vst.msk [vmem:[%s1348_s3 + $0xb8] sm:$0xf] %vm540_vm0, %v721_v61  ;;  %v138_v8 = vmul.f32 %v765_v1, %v67_v57  ;;  %v139_v9 = vmul.f32 %v765_v1, %v68_v58  ;;  %v205_v10 = vadd.f32 %v770_v2, %v134_v3 }
  0x3a   :  { %588 = vst.msk [vmem:[%s1348_s3 + $0xbc] sm:$0xf] %vm540_vm0, %v722_v0  ;;  %v206_v11 = vadd.f32 %v770_v2, %v135_v4  ;;  %v207_v12 = vadd.f32 %v770_v2, %v136_v5  ;;  %v140_v13 = vmul.f32 %v765_v1, %v69_v63  ;;  %v268_v14 = vmax.f32 %v204_v6, 0.0 }
  0x3b   :  { %v208_v15 = vadd.f32 %v770_v2, %v137_v7  ;;  %v209_v16 = vadd.f32 %v770_v2, %v138_v8  ;;  %v210_v17 = vadd.f32 %v770_v2, %v139_v9  ;;  %v269_v18 = vmax.f32 %v205_v10, 0.0 }
  0x3c   :  { %v270_v19 = vmax.f32 %v206_v11, 0.0  ;;  %v271_v20 = vmax.f32 %v207_v12, 0.0  ;;  %v211_v21 = vadd.f32 %v770_v2, %v140_v13  ;;  %v723_v23 = vpack.c.bf16 %v268_v14, %v268_v14 }
  0x3d   :  { %v272_v24 = vmax.f32 %v208_v15, 0.0  ;;  %v273_v25 = vmax.f32 %v209_v16, 0.0  ;;  %v274_v26 = vmax.f32 %v210_v17, 0.0  ;;  %v724_v30 = vpack.c.bf16 %v269_v18, %v269_v18 }
  0x3e   :  { %v725_v31 = vpack.c.bf16 %v270_v19, %v270_v19  ;;  %v726_v32 = vpack.c.bf16 %v271_v20, %v271_v20  ;;  %v275_v33 = vmax.f32 %v211_v21, 0.0  ;;  %589 = vst.msk [vmem:[%s1348_s3 + $0xc0] sm:$0xf] %vm540_vm0, %v723_v23  ;;  %v141_v40 = vmul.f32 %v765_v1, %v70_v22 }
  0x3f   :  { %v727_v37 = vpack.c.bf16 %v272_v24, %v272_v24  ;;  %v728_v38 = vpack.c.bf16 %v273_v25, %v273_v25  ;;  %v729_v39 = vpack.c.bf16 %v274_v26, %v274_v26  ;;  %590 = vst.msk [vmem:[%s1348_s3 + $0xc4] sm:$0xf] %vm540_vm0, %v724_v30  ;;  %v142_v43 = vmul.f32 %v765_v1, %v71_v27 }
  0x40   :  { %591 = vst.msk [vmem:[%s1348_s3 + $0xc8] sm:$0xf] %vm540_vm0, %v725_v31  ;;  %592 = vst.msk [vmem:[%s1348_s3 + $0xcc] sm:$0xf] %vm540_vm0, %v726_v32  ;;  %v730_v42 = vpack.c.bf16 %v275_v33, %v275_v33  ;;  %v143_v44 = vmul.f32 %v765_v1, %v72_v28  ;;  %v144_v45 = vmul.f32 %v765_v1, %v73_v29 }
  0x41   :  { %593 = vst.msk [vmem:[%s1348_s3 + $0xd0] sm:$0xf] %vm540_vm0, %v727_v37  ;;  %594 = vst.msk [vmem:[%s1348_s3 + $0xd4] sm:$0xf] %vm540_vm0, %v728_v38  ;;  %v212_v46 = vadd.f32 %v770_v2, %v141_v40  ;;  %v145_v47 = vmul.f32 %v765_v1, %v74_v34  ;;  %v146_v48 = vmul.f32 %v765_v1, %v75_v35 }
  0x42   :  { %595 = vst.msk [vmem:[%s1348_s3 + $0xd8] sm:$0xf] %vm540_vm0, %v729_v39  ;;  %v147_v49 = vmul.f32 %v765_v1, %v76_v36  ;;  %596 = vst.msk [vmem:[%s1348_s3 + $0xdc] sm:$0xf] %vm540_vm0, %v730_v42  ;;  %v213_v50 = vadd.f32 %v770_v2, %v142_v43  ;;  %v214_v51 = vadd.f32 %v770_v2, %v143_v44 }
  0x43   :  { %v215_v52 = vadd.f32 %v770_v2, %v144_v45  ;;  %v148_v53 = vmul.f32 %v765_v1, %v77_v41  ;;  %v276_v54 = vmax.f32 %v212_v46, 0.0  ;;  %v216_v55 = vadd.f32 %v770_v2, %v145_v47 }
  0x44   :  { %v217_v56 = vadd.f32 %v770_v2, %v146_v48  ;;  %v218_v57 = vadd.f32 %v770_v2, %v147_v49  ;;  %v277_v58 = vmax.f32 %v213_v50, 0.0  ;;  %v278_v59 = vmax.f32 %v214_v51, 0.0 }
  0x45   :  { %v279_v60 = vmax.f32 %v215_v52, 0.0  ;;  %v219_v61 = vadd.f32 %v770_v2, %v148_v53  ;;  %v731_v62 = vpack.c.bf16 %v276_v54, %v276_v54  ;;  %v280_v63 = vmax.f32 %v216_v55, 0.0 }
  0x46   :  { %v281_v0 = vmax.f32 %v217_v56, 0.0  ;;  %v282_v3 = vmax.f32 %v218_v57, 0.0  ;;  %v732_v4 = vpack.c.bf16 %v277_v58, %v277_v58  ;;  %v733_v5 = vpack.c.bf16 %v278_v59, %v278_v59 }
  0x47   :  { %v734_v6 = vpack.c.bf16 %v279_v60, %v279_v60  ;;  %v283_v1 = vmax.f32 %v219_v61, 0.0  ;;  %597 = vst.msk [vmem:[%s1348_s3 + $0xe0] sm:$0xf] %vm540_vm0, %v731_v62  ;;  %v735_v7 = vpack.c.bf16 %v280_v63, %v280_v63 }
  0x48   :  { %v736_v8 = vpack.c.bf16 %v281_v0, %v281_v0  ;;  %v737_v9 = vpack.c.bf16 %v282_v3, %v282_v3  ;;  %598 = vst.msk [vmem:[%s1348_s3 + $0xe4] sm:$0xf] %vm540_vm0, %v732_v4  ;;  %599 = vst.msk [vmem:[%s1348_s3 + $0xe8] sm:$0xf] %vm540_vm0, %v733_v5 }
  0x49   :  { %600 = vst.msk [vmem:[%s1348_s3 + $0xec] sm:$0xf] %vm540_vm0, %v734_v6  ;;  %v738_v2 = vpack.c.bf16 %v283_v1, %v283_v1  ;;  %601 = vst.msk [vmem:[%s1348_s3 + $0xf0] sm:$0xf] %vm540_vm0, %v735_v7 }
  0x4a   :  { %602 = vst.msk [vmem:[%s1348_s3 + $0xf4] sm:$0xf] %vm540_vm0, %v736_v8  ;;  %603 = vst.msk [vmem:[%s1348_s3 + $0xf8] sm:$0xf] %vm540_vm0, %v737_v9 }
  0x4b   :  { %604 = vst.msk [vmem:[%s1348_s3 + $0xfc] sm:$0xf] %vm540_vm0, %v738_v2 }

// kernel: residual_forward_nchw.7
= control target key start
LH: loop header
LB: loop body
LE: loop exit
PB: predicated region body
PF: predicated region fallthrough
CT: control target
= control target key end

     0   :  { %vm415_vm0 = vcmask 31744   ;;  %s1289_s0 = inlined_call_operand.vmem [shape: f32[512,4], index: 0, kind: input, shape index: {}, may-alias: {0,4}]   ;;  %s1290_s1 = inlined_call_operand.vmem [shape: f32[1,4], index: 1, kind: input, shape index: {}]   ;;  %s1291_s2 = inlined_call_operand.vmem [shape: f32[1,4], index: 2, kind: input, shape index: {}]   ;;  %s1292_s3 = inlined_call_operand.vmem [shape: f32[512,4], index: 3, kind: input, shape index: {}]   ;;  %s1293_s4 = inlined_call_operand.vmem [shape: f32[512,4], index: 4, kind: output, shape index: {}, may-alias: {0,4}]  }
   0x1   :  { %v17_v0 = vld [vmem:[%s1289_s0] sm:$0xff]  ;;  %v18_v4 = vld [vmem:[%s1289_s0 + $0x8] sm:$0xff]  ;;  %v19_v7 = vld [vmem:[%s1289_s0 + $0x10] sm:$0xff] }
   0x2   :  { %v517_v1 = vld [vmem:[%s1290_s1] ss:$0 sm:$0xff]  ;;  %v20_v8 = vld [vmem:[%s1289_s0 + $0x18] sm:$0xff]  ;;  %v224_v10 = vld [vmem:[%s1292_s3 + $0x8] sm:$0xff] }
   0x3   :  { %v522_v2 = vld [vmem:[%s1291_s2] ss:$0 sm:$0xff]  ;;  %v88_v3 = vmul.f32 %v517_v1, %v17_v0  ;;  %v89_v6 = vmul.f32 %v517_v1, %v18_v4  ;;  %v90_v11 = vmul.f32 %v517_v1, %v19_v7  ;;  %v225_v12 = vld [vmem:[%s1292_s3 + $0x10] sm:$0xff]  ;;  %v91_v13 = vmul.f32 %v517_v1, %v20_v8  ;;  %v226_v16 = vld [vmem:[%s1292_s3 + $0x18] sm:$0xff] }
   0x4   :  { %v223_v5 = vld [vmem:[%s1292_s3] sm:$0xff]  ;;  %v22_v18 = vld [vmem:[%s1289_s0 + $0x28] sm:$0xff]  ;;  %v23_v19 = vld [vmem:[%s1289_s0 + $0x30] sm:$0xff] }
   0x5   :  { %v159_v9 = vadd.f32 %v522_v2, %v88_v3  ;;  %v21_v14 = vld [vmem:[%s1289_s0 + $0x20] sm:$0xff]  ;;  %v160_v15 = vadd.f32 %v522_v2, %v89_v6  ;;  %v161_v21 = vadd.f32 %v522_v2, %v90_v11  ;;  %v162_v22 = vadd.f32 %v522_v2, %v91_v13  ;;  %v24_v25 = vld [vmem:[%s1289_s0 + $0x38] sm:$0xff]  ;;  %v228_v28 = vld [vmem:[%s1292_s3 + $0x28] sm:$0xff] }
   0x6   :  { %v92_v17 = vmul.f32 %v517_v1, %v21_v14  ;;  %v227_v23 = vld [vmem:[%s1292_s3 + $0x20] sm:$0xff]  ;;  %v93_v24 = vmul.f32 %v517_v1, %v22_v18  ;;  %v94_v29 = vmul.f32 %v517_v1, %v23_v19  ;;  %v95_v30 = vmul.f32 %v517_v1, %v24_v25  ;;  %v229_v36 = vld [vmem:[%s1292_s3 + $0x30] sm:$0xff]  ;;  %v230_v37 = vld [vmem:[%s1292_s3 + $0x38] sm:$0xff] }
   0x7   :  { %v287_v20 = vadd.f32 %v223_v5, %v159_v9  ;;  %v288_v26 = vadd.f32 %v224_v10, %v160_v15  ;;  %v25_v31 = vld [vmem:[%s1289_s0 + $0x40] sm:$0xff]  ;;  %v289_v33 = vadd.f32 %v225_v12, %v161_v21  ;;  %v290_v34 = vadd.f32 %v226_v16, %v162_v22  ;;  %v26_v38 = vld [vmem:[%s1289_s0 + $0x48] sm:$0xff]  ;;  %v27_v43 = vld [vmem:[%s1289_s0 + $0x50] sm:$0xff] }
   0x8   :  { %v163_v27 = vadd.f32 %v522_v2, %v92_v17  ;;  %v164_v35 = vadd.f32 %v522_v2, %v93_v24  ;;  %v165_v41 = vadd.f32 %v522_v2, %v94_v29  ;;  %v166_v42 = vadd.f32 %v522_v2, %v95_v30  ;;  %v28_v44 = vld [vmem:[%s1289_s0 + $0x58] sm:$0xff]  ;;  %v231_v53 = vld [vmem:[%s1292_s3 + $0x40] sm:$0xff]  ;;  %v232_v58 = vld [vmem:[%s1292_s3 + $0x48] sm:$0xff] }
   0x9   :  { %v351_v32 = vmax.f32 %v287_v20, 0.0  ;;  %v352_v39 = vmax.f32 %v288_v26, 0.0  ;;  %v353_v45 = vmax.f32 %v289_v33, 0.0  ;;  %v354_v46 = vmax.f32 %v290_v34, 0.0  ;;  %v233_v4 = vld [vmem:[%s1292_s3 + $0x50] sm:$0xff]  ;;  %v234_v5 = vld [vmem:[%s1292_s3 + $0x58] sm:$0xff] }
   0xa   :  { %v291_v40 = vadd.f32 %v227_v23, %v163_v27  ;;  %v292_v47 = vadd.f32 %v228_v28, %v164_v35  ;;  %v96_v48 = vmul.f32 %v517_v1, %v25_v31  ;;  %v293_v51 = vadd.f32 %v229_v36, %v165_v41  ;;  %v235_v10 = vld [vmem:[%s1292_s3 + $0x60] sm:$0xff]  ;;  %v236_v14 = vld [vmem:[%s1292_s3 + $0x68] sm:$0xff]  ;;  %v237_v22 = vld [vmem:[%s1292_s3 + $0x70] sm:$0xff] }
   0xb   :  { %416 = vst.msk [vmem:[%s1293_s4] sm:$0xff] %vm415_vm0, %v351_v32  ;;  %v294_v52 = vadd.f32 %v230_v37, %v166_v42  ;;  %v97_v54 = vmul.f32 %v517_v1, %v26_v38  ;;  %v98_v59 = vmul.f32 %v517_v1, %v27_v43  ;;  %v99_v60 = vmul.f32 %v517_v1, %v28_v44  ;;  %v238_v23 = vld [vmem:[%s1292_s3 + $0x78] sm:$0xff]  ;;  %v240_v44 = vld [vmem:[%s1292_s3 + $0x88] sm:$0xff] }
   0xc   :  { %v355_v50 = vmax.f32 %v291_v40, 0.0  ;;  %v356_v56 = vmax.f32 %v292_v47, 0.0  ;;  %v167_v57 = vadd.f32 %v522_v2, %v96_v48  ;;  %v357_v63 = vmax.f32 %v293_v51, 0.0 }
   0xd   :  { %v358_v0 = vmax.f32 %v294_v52, 0.0  ;;  %v168_v3 = vadd.f32 %v522_v2, %v97_v54  ;;  %v169_v8 = vadd.f32 %v522_v2, %v98_v59  ;;  %v170_v9 = vadd.f32 %v522_v2, %v99_v60  ;;  %v241_v52 = vld [vmem:[%s1292_s3 + $0x90] sm:$0xff] }
   0xe   :  { %v295_v7 = vadd.f32 %v231_v53, %v167_v57  ;;  %v242_v53 = vld [vmem:[%s1292_s3 + $0x98] sm:$0xff] }
   0xf   :  { %v296_v12 = vadd.f32 %v232_v58, %v168_v3  ;;  %v297_v19 = vadd.f32 %v233_v4, %v169_v8  ;;  %v298_v20 = vadd.f32 %v234_v5, %v170_v9  ;;  %v243_v58 = vld [vmem:[%s1292_s3 + $0xa0] sm:$0xff]  ;;  %v245_v8 = vld [vmem:[%s1292_s3 + $0xb0] sm:$0xff]  ;;  %v246_v9 = vld [vmem:[%s1292_s3 + $0xb8] sm:$0xff] }
  0x10   :  { %v359_v18 = vmax.f32 %v295_v7, 0.0 }
  0x11   :  { %v360_v25 = vmax.f32 %v296_v12, 0.0  ;;  %v361_v31 = vmax.f32 %v297_v19, 0.0  ;;  %v362_v32 = vmax.f32 %v298_v20, 0.0 }
  0x12   :  { %v29_v49 = vld [vmem:[%s1289_s0 + $0x60] sm:$0xff] }
  0x13   :  { %417 = vst.msk [vmem:[%s1293_s4 + $0x8] sm:$0xff] %vm415_vm0, %v352_v39  ;;  %v100_v6 = vmul.f32 %v517_v1, %v29_v49  ;;  %v239_v39 = vld [vmem:[%s1292_s3 + $0x80] sm:$0xff] }
  0x15   :  { %v171_v13 = vadd.f32 %v522_v2, %v100_v6 }
  0x17   :  { %v299_v26 = vadd.f32 %v235_v10, %v171_v13 }
  0x19   :  { %v363_v36 = vmax.f32 %v299_v26, 0.0 }
  0x1a   :  { %v30_v55 = vld [vmem:[%s1289_s0 + $0x68] sm:$0xff] }
  0x1b   :  { %418 = vst.msk [vmem:[%s1293_s4 + $0x10] sm:$0xff] %vm415_vm0, %v353_v45  ;;  %419 = vst.msk [vmem:[%s1293_s4 + $0x18] sm:$0xff] %vm415_vm0, %v354_v46  ;;  %v101_v11 = vmul.f32 %v517_v1, %v30_v55 }
  0x1d   :  { %v172_v21 = vadd.f32 %v522_v2, %v101_v11 }
  0x1f   :  { %v300_v33 = vadd.f32 %v236_v14, %v172_v21 }
  0x21   :  { %v364_v42 = vmax.f32 %v300_v33, 0.0 }
  0x22   :  { %v31_v61 = vld [vmem:[%s1289_s0 + $0x70] sm:$0xff]  ;;  %v32_v62 = vld [vmem:[%s1289_s0 + $0x78] sm:$0xff] }
  0x23   :  { %420 = vst.msk [vmem:[%s1293_s4 + $0x20] sm:$0xff] %vm415_vm0, %v355_v50  ;;  %421 = vst.msk [vmem:[%s1293_s4 + $0x28] sm:$0xff] %vm415_vm0, %v356_v56  ;;  %v102_v15 = vmul.f32 %v517_v1, %v31_v61  ;;  %v103_v16 = vmul.f32 %v517_v1, %v32_v62  ;;  %v244_v62 = vld [vmem:[%s1292_s3 + $0xa8] sm:$0xff] }
  0x24   :  { %422 = vst.msk [vmem:[%s1293_s4 + $0x30] sm:$0xff] %vm415_vm0, %v357_v63  ;;  %423 = vst.msk [vmem:[%s1293_s4 + $0x38] sm:$0xff] %vm415_vm0, %v358_v0 }
  0x25   :  { %v173_v27 = vadd.f32 %v522_v2, %v102_v15  ;;  %v174_v28 = vadd.f32 %v522_v2, %v103_v16 }
  0x27   :  { %v301_v37 = vadd.f32 %v237_v22, %v173_v27  ;;  %v302_v38 = vadd.f32 %v238_v23, %v174_v28 }
  0x29   :  { %v365_v49 = vmax.f32 %v301_v37, 0.0  ;;  %v366_v50 = vmax.f32 %v302_v38, 0.0  ;;  %v249_v38 = vld [vmem:[%s1292_s3 + $0xd0] sm:$0xff] }
  0x2b   :  { %v33_v17 = vld [vmem:[%s1289_s0 + $0x80] sm:$0xff]  ;;  %v34_v24 = vld [vmem:[%s1289_s0 + $0x88] sm:$0xff]  ;;  %v35_v29 = vld [vmem:[%s1289_s0 + $0x90] sm:$0xff] }
  0x2c   :  { %v36_v30 = vld [vmem:[%s1289_s0 + $0x98] sm:$0xff]  ;;  %v104_v34 = vmul.f32 %v517_v1, %v33_v17  ;;  %v105_v40 = vmul.f32 %v517_v1, %v34_v24  ;;  %v106_v45 = vmul.f32 %v517_v1, %v35_v29 }
  0x2d   :  { %424 = vst.msk [vmem:[%s1293_s4 + $0x40] sm:$0xff] %vm415_vm0, %v359_v18  ;;  %v107_v46 = vmul.f32 %v517_v1, %v36_v30  ;;  %v248_v30 = vld [vmem:[%s1292_s3 + $0xc8] sm:$0xff] }
  0x2e   :  { %v175_v43 = vadd.f32 %v522_v2, %v104_v34  ;;  %v176_v51 = vadd.f32 %v522_v2, %v105_v40  ;;  %v177_v56 = vadd.f32 %v522_v2, %v106_v45 }
  0x2f   :  { %v178_v57 = vadd.f32 %v522_v2, %v107_v46 }
  0x30   :  { %v303_v55 = vadd.f32 %v239_v39, %v175_v43  ;;  %v304_v60 = vadd.f32 %v240_v44, %v176_v51  ;;  %v305_v5 = vadd.f32 %v241_v52, %v177_v56  ;;  %v250_v39 = vld [vmem:[%s1292_s3 + $0xd8] sm:$0xff]  ;;  %v251_v44 = vld [vmem:[%s1292_s3 + $0xe0] sm:$0xff]  ;;  %v253_v56 = vld [vmem:[%s1292_s3 + $0xf0] sm:$0xff] }
  0x31   :  { %v306_v6 = vadd.f32 %v242_v53, %v178_v57  ;;  %v254_v57 = vld [vmem:[%s1292_s3 + $0xf8] sm:$0xff] }
  0x32   :  { %v367_v4 = vmax.f32 %v303_v55, 0.0  ;;  %v368_v11 = vmax.f32 %v304_v60, 0.0  ;;  %v369_v17 = vmax.f32 %v305_v5, 0.0 }
  0x33   :  { %v370_v18 = vmax.f32 %v306_v6, 0.0 }
  0x34   :  { %v37_v35 = vld [vmem:[%s1289_s0 + $0xa0] sm:$0xff] }
  0x35   :  { %425 = vst.msk [vmem:[%s1293_s4 + $0x48] sm:$0xff] %vm415_vm0, %v360_v25  ;;  %v108_v54 = vmul.f32 %v517_v1, %v37_v35  ;;  %v247_v25 = vld [vmem:[%s1292_s3 + $0xc0] sm:$0xff] }
  0x37   :  { %v179_v61 = vadd.f32 %v522_v2, %v108_v54 }
  0x39   :  { %v307_v12 = vadd.f32 %v243_v58, %v179_v61 }
  0x3b   :  { %v371_v22 = vmax.f32 %v307_v12, 0.0 }
  0x3c   :  { %v38_v41 = vld [vmem:[%s1289_s0 + $0xa8] sm:$0xff] }
  0x3d   :  { %426 = vst.msk [vmem:[%s1293_s4 + $0x50] sm:$0xff] %vm415_vm0, %v361_v31  ;;  %427 = vst.msk [vmem:[%s1293_s4 + $0x58] sm:$0xff] %vm415_vm0, %v362_v32  ;;  %v109_v59 = vmul.f32 %v517_v1, %v38_v41 }
  0x3f   :  { %v180_v7 = vadd.f32 %v522_v2, %v109_v59 }
  0x41   :  { %v308_v19 = vadd.f32 %v244_v62, %v180_v7 }
  0x43   :  { %v372_v28 = vmax.f32 %v308_v19, 0.0 }
  0x44   :  { %v39_v47 = vld [vmem:[%s1289_s0 + $0xb0] sm:$0xff]  ;;  %v40_v48 = vld [vmem:[%s1289_s0 + $0xb8] sm:$0xff] }
  0x45   :  { %428 = vst.msk [vmem:[%s1293_s4 + $0x60] sm:$0xff] %vm415_vm0, %v363_v36  ;;  %429 = vst.msk [vmem:[%s1293_s4 + $0x68] sm:$0xff] %vm415_vm0, %v364_v42  ;;  %v110_v63 = vmul.f32 %v517_v1, %v39_v47  ;;  %v111_v0 = vmul.f32 %v517_v1, %v40_v48  ;;  %v252_v48 = vld [vmem:[%s1292_s3 + $0xe8] sm:$0xff] }
  0x46   :  { %430 = vst.msk [vmem:[%s1293_s4 + $0x70] sm:$0xff] %vm415_vm0, %v365_v49  ;;  %431 = vst.msk [vmem:[%s1293_s4 + $0x78] sm:$0xff] %vm415_vm0, %v366_v50 }
  0x47   :  { %v181_v13 = vadd.f32 %v522_v2, %v110_v63  ;;  %v182_v14 = vadd.f32 %v522_v2, %v111_v0 }
  0x49   :  { %v309_v23 = vadd.f32 %v245_v8, %v181_v13  ;;  %v310_v24 = vadd.f32 %v246_v9, %v182_v14 }
  0x4b   :  { %v373_v35 = vmax.f32 %v309_v23, 0.0  ;;  %v374_v36 = vmax.f32 %v310_v24, 0.0  ;;  %v257_v24 = vld [vmem:[%s1292_s3 + $0x110] sm:$0xff] }
  0x4d   :  { %v41_v3 = vld [vmem:[%s1289_s0 + $0xc0] sm:$0xff]  ;;  %v42_v10 = vld [vmem:[%s1289_s0 + $0xc8] sm:$0xff]  ;;  %v43_v15 = vld [vmem:[%s1289_s0 + $0xd0] sm:$0xff] }
  0x4e   :  { %v44_v16 = vld [vmem:[%s1289_s0 + $0xd8] sm:$0xff]  ;;  %v112_v20 = vmul.f32 %v517_v1, %v41_v3  ;;  %v113_v26 = vmul.f32 %v517_v1, %v42_v10  ;;  %v114_v31 = vmul.f32 %v517_v1, %v43_v15 }
  0x4f   :  { %432 = vst.msk [vmem:[%s1293_s4 + $0x80] sm:$0xff] %vm415_vm0, %v367_v4  ;;  %v115_v32 = vmul.f32 %v517_v1, %v44_v16  ;;  %v256_v16 = vld [vmem:[%s1292_s3 + $0x108] sm:$0xff] }
  0x50   :  { %v183_v29 = vadd.f32 %v522_v2, %v112_v20  ;;  %v184_v37 = vadd.f32 %v522_v2, %v113_v26  ;;  %v185_v42 = vadd.f32 %v522_v2, %v114_v31 }
  0x51   :  { %v186_v43 = vadd.f32 %v522_v2, %v115_v32 }
  0x52   :  { %v311_v41 = vadd.f32 %v247_v25, %v183_v29  ;;  %v312_v46 = vadd.f32 %v248_v30, %v184_v37  ;;  %v313_v53 = vadd.f32 %v249_v38, %v185_v42  ;;  %v258_v25 = vld [vmem:[%s1292_s3 + $0x118] sm:$0xff]  ;;  %v259_v30 = vld [vmem:[%s1292_s3 + $0x120] sm:$0xff]  ;;  %v261_v42 = vld [vmem:[%s1292_s3 + $0x130] sm:$0xff] }
  0x53   :  { %v314_v54 = vadd.f32 %v250_v39, %v186_v43  ;;  %v262_v43 = vld [vmem:[%s1292_s3 + $0x138] sm:$0xff] }
  0x54   :  { %v375_v52 = vmax.f32 %v311_v41, 0.0  ;;  %v376_v59 = vmax.f32 %v312_v46, 0.0  ;;  %v377_v3 = vmax.f32 %v313_v53, 0.0 }
  0x55   :  { %v378_v4 = vmax.f32 %v314_v54, 0.0 }
  0x56   :  { %v45_v21 = vld [vmem:[%s1289_s0 + $0xe0] sm:$0xff] }
  0x57   :  { %433 = vst.msk [vmem:[%s1293_s4 + $0x88] sm:$0xff] %vm415_vm0, %v368_v11  ;;  %v116_v40 = vmul.f32 %v517_v1, %v45_v21  ;;  %v255_v11 = vld [vmem:[%s1292_s3 + $0x100] sm:$0xff] }
  0x59   :  { %v187_v47 = vadd.f32 %v522_v2, %v116_v40 }
  0x5b   :  { %v315_v60 = vadd.f32 %v251_v44, %v187_v47 }
  0x5d   :  { %v379_v8 = vmax.f32 %v315_v60, 0.0 }
  0x5e   :  { %v46_v27 = vld [vmem:[%s1289_s0 + $0xe8] sm:$0xff] }
  0x5f   :  { %434 = vst.msk [vmem:[%s1293_s4 + $0x90] sm:$0xff] %vm415_vm0, %v369_v17  ;;  %435 = vst.msk [vmem:[%s1293_s4 + $0x98] sm:$0xff] %vm415_vm0, %v370_v18  ;;  %v117_v45 = vmul.f32 %v517_v1, %v46_v27 }
  0x61   :  { %v188_v55 = vadd.f32 %v522_v2, %v117_v45 }
  0x63   :  { %v316_v5 = vadd.f32 %v252_v48, %v188_v55 }
  0x65   :  { %v380_v14 = vmax.f32 %v316_v5, 0.0 }
  0x66   :  { %v47_v33 = vld [vmem:[%s1289_s0 + $0xf0] sm:$0xff]  ;;  %v48_v34 = vld [vmem:[%s1289_s0 + $0xf8] sm:$0xff] }
  0x67   :  { %436 = vst.msk [vmem:[%s1293_s4 + $0xa0] sm:$0xff] %vm415_vm0, %v371_v22  ;;  %437 = vst.msk [vmem:[%s1293_s4 + $0xa8] sm:$0xff] %vm415_vm0, %v372_v28  ;;  %v118_v49 = vmul.f32 %v517_v1, %v47_v33  ;;  %v119_v50 = vmul.f32 %v517_v1, %v48_v34  ;;  %v260_v34 = vld [vmem:[%s1292_s3 + $0x128] sm:$0xff] }
  0x68   :  { %438 = vst.msk [vmem:[%s1293_s4 + $0xb0] sm:$0xff] %vm415_vm0, %v373_v35  ;;  %439 = vst.msk [vmem:[%s1293_s4 + $0xb8] sm:$0xff] %vm415_vm0, %v374_v36 }
  0x69   :  { %v189_v61 = vadd.f32 %v522_v2, %v118_v49  ;;  %v190_v62 = vadd.f32 %v522_v2, %v119_v50 }
  0x6b   :  { %v317_v9 = vadd.f32 %v253_v56, %v189_v61  ;;  %v318_v10 = vadd.f32 %v254_v57, %v190_v62 }
  0x6d   :  { %v381_v21 = vmax.f32 %v317_v9, 0.0  ;;  %v382_v22 = vmax.f32 %v318_v10, 0.0  ;;  %v265_v10 = vld [vmem:[%s1292_s3 + $0x150] sm:$0xff] }
  0x6f   :  { %v49_v51 = vld [vmem:[%s1289_s0 + $0x100] sm:$0xff]  ;;  %v50_v58 = vld [vmem:[%s1289_s0 + $0x108] sm:$0xff]  ;;  %v51_v63 = vld [vmem:[%s1289_s0 + $0x110] sm:$0xff] }
  0x70   :  { %v52_v0 = vld [vmem:[%s1289_s0 + $0x118] sm:$0xff]  ;;  %v120_v6 = vmul.f32 %v517_v1, %v49_v51  ;;  %v121_v12 = vmul.f32 %v517_v1, %v50_v58  ;;  %v122_v17 = vmul.f32 %v517_v1, %v51_v63 }
  0x71   :  { %440 = vst.msk [vmem:[%s1293_s4 + $0xc0] sm:$0xff] %vm415_vm0, %v375_v52  ;;  %v123_v18 = vmul.f32 %v517_v1, %v52_v0  ;;  %v264_v0 = vld [vmem:[%s1292_s3 + $0x148] sm:$0xff] }
  0x72   :  { %v191_v15 = vadd.f32 %v522_v2, %v120_v6  ;;  %v192_v23 = vadd.f32 %v522_v2, %v121_v12  ;;  %v193_v28 = vadd.f32 %v522_v2, %v122_v17 }
  0x73   :  { %v194_v29 = vadd.f32 %v522_v2, %v123_v18 }
  0x74   :  { %v319_v27 = vadd.f32 %v255_v11, %v191_v15  ;;  %v320_v32 = vadd.f32 %v256_v16, %v192_v23  ;;  %v321_v39 = vadd.f32 %v257_v24, %v193_v28  ;;  %v266_v11 = vld [vmem:[%s1292_s3 + $0x158] sm:$0xff]  ;;  %v267_v16 = vld [vmem:[%s1292_s3 + $0x160] sm:$0xff]  ;;  %v269_v28 = vld [vmem:[%s1292_s3 + $0x170] sm:$0xff] }
  0x75   :  { %v322_v40 = vadd.f32 %v258_v25, %v194_v29  ;;  %v270_v29 = vld [vmem:[%s1292_s3 + $0x178] sm:$0xff] }
  0x76   :  { %v383_v38 = vmax.f32 %v319_v27, 0.0  ;;  %v384_v45 = vmax.f32 %v320_v32, 0.0  ;;  %v385_v51 = vmax.f32 %v321_v39, 0.0 }
  0x77   :  { %v386_v52 = vmax.f32 %v322_v40, 0.0 }
  0x78   :  { %v53_v7 = vld [vmem:[%s1289_s0 + $0x120] sm:$0xff] }
  0x79   :  { %441 = vst.msk [vmem:[%s1293_s4 + $0xc8] sm:$0xff] %vm415_vm0, %v376_v59  ;;  %v124_v26 = vmul.f32 %v517_v1, %v53_v7  ;;  %v263_v59 = vld [vmem:[%s1292_s3 + $0x140] sm:$0xff] }
  0x7b   :  { %v195_v33 = vadd.f32 %v522_v2, %v124_v26 }
  0x7d   :  { %v323_v46 = vadd.f32 %v259_v30, %v195_v33 }
  0x7f   :  { %v387_v56 = vmax.f32 %v323_v46, 0.0 }
  0x80   :  { %v54_v13 = vld [vmem:[%s1289_s0 + $0x128] sm:$0xff] }
  0x81   :  { %442 = vst.msk [vmem:[%s1293_s4 + $0xd0] sm:$0xff] %vm415_vm0, %v377_v3  ;;  %443 = vst.msk [vmem:[%s1293_s4 + $0xd8] sm:$0xff] %vm415_vm0, %v378_v4  ;;  %v125_v31 = vmul.f32 %v517_v1, %v54_v13 }
  0x83   :  { %v196_v41 = vadd.f32 %v522_v2, %v125_v31 }
  0x85   :  { %v324_v53 = vadd.f32 %v260_v34, %v196_v41 }
  0x87   :  { %v388_v62 = vmax.f32 %v324_v53, 0.0 }
  0x88   :  { %v55_v19 = vld [vmem:[%s1289_s0 + $0x130] sm:$0xff]  ;;  %v56_v20 = vld [vmem:[%s1289_s0 + $0x138] sm:$0xff] }
  0x89   :  { %444 = vst.msk [vmem:[%s1293_s4 + $0xe0] sm:$0xff] %vm415_vm0, %v379_v8  ;;  %445 = vst.msk [vmem:[%s1293_s4 + $0xe8] sm:$0xff] %vm415_vm0, %v380_v14  ;;  %v126_v35 = vmul.f32 %v517_v1, %v55_v19  ;;  %v127_v36 = vmul.f32 %v517_v1, %v56_v20  ;;  %v268_v20 = vld [vmem:[%s1292_s3 + $0x168] sm:$0xff] }
  0x8a   :  { %446 = vst.msk [vmem:[%s1293_s4 + $0xf0] sm:$0xff] %vm415_vm0, %v381_v21  ;;  %447 = vst.msk [vmem:[%s1293_s4 + $0xf8] sm:$0xff] %vm415_vm0, %v382_v22 }
  0x8b   :  { %v197_v47 = vadd.f32 %v522_v2, %v126_v35  ;;  %v198_v48 = vadd.f32 %v522_v2, %v127_v36 }
  0x8d   :  { %v325_v57 = vadd.f32 %v261_v42, %v197_v47  ;;  %v326_v58 = vadd.f32 %v262_v43, %v198_v48 }
  0x8f   :  { %v389_v7 = vmax.f32 %v325_v57, 0.0  ;;  %v390_v8 = vmax.f32 %v326_v58, 0.0  ;;  %v273_v58 = vld [vmem:[%s1292_s3 + $0x190] sm:$0xff] }
  0x91   :  { %v57_v37 = vld [vmem:[%s1289_s0 + $0x140] sm:$0xff]  ;;  %v58_v44 = vld [vmem:[%s1289_s0 + $0x148] sm:$0xff]  ;;  %v59_v49 = vld [vmem:[%s1289_s0 + $0x150] sm:$0xff] }
  0x92   :  { %v60_v50 = vld [vmem:[%s1289_s0 + $0x158] sm:$0xff]  ;;  %v128_v54 = vmul.f32 %v517_v1, %v57_v37  ;;  %v129_v60 = vmul.f32 %v517_v1, %v58_v44  ;;  %v130_v3 = vmul.f32 %v517_v1, %v59_v49 }
  0x93   :  { %448 = vst.msk [vmem:[%s1293_s4 + $0x100] sm:$0xff] %vm415_vm0, %v383_v38  ;;  %v131_v4 = vmul.f32 %v517_v1, %v60_v50  ;;  %v272_v50 = vld [vmem:[%s1292_s3 + $0x188] sm:$0xff] }
  0x94   :  { %v199_v63 = vadd.f32 %v522_v2, %v128_v54  ;;  %v200_v9 = vadd.f32 %v522_v2, %v129_v60  ;;  %v201_v14 = vadd.f32 %v522_v2, %v130_v3 }
  0x95   :  { %v202_v15 = vadd.f32 %v522_v2, %v131_v4 }
  0x96   :  { %v327_v13 = vadd.f32 %v263_v59, %v199_v63  ;;  %v328_v18 = vadd.f32 %v264_v0, %v200_v9  ;;  %v329_v25 = vadd.f32 %v265_v10, %v201_v14  ;;  %v274_v59 = vld [vmem:[%s1292_s3 + $0x198] sm:$0xff]  ;;  %v275_v0 = vld [vmem:[%s1292_s3 + $0x1a0] sm:$0xff]  ;;  %v277_v14 = vld [vmem:[%s1292_s3 + $0x1b0] sm:$0xff] }
  0x97   :  { %v330_v26 = vadd.f32 %v266_v11, %v202_v15  ;;  %v278_v15 = vld [vmem:[%s1292_s3 + $0x1b8] sm:$0xff] }
  0x98   :  { %v391_v24 = vmax.f32 %v327_v13, 0.0  ;;  %v392_v31 = vmax.f32 %v328_v18, 0.0  ;;  %v393_v37 = vmax.f32 %v329_v25, 0.0 }
  0x99   :  { %v394_v38 = vmax.f32 %v330_v26, 0.0 }
  0x9a   :  { %v61_v55 = vld [vmem:[%s1289_s0 + $0x160] sm:$0xff] }
  0x9b   :  { %449 = vst.msk [vmem:[%s1293_s4 + $0x108] sm:$0xff] %vm415_vm0, %v384_v45  ;;  %v132_v12 = vmul.f32 %v517_v1, %v61_v55  ;;  %v271_v45 = vld [vmem:[%s1292_s3 + $0x180] sm:$0xff] }
  0x9d   :  { %v203_v19 = vadd.f32 %v522_v2, %v132_v12 }
  0x9f   :  { %v331_v32 = vadd.f32 %v267_v16, %v203_v19 }
  0xa1   :  { %v395_v42 = vmax.f32 %v331_v32, 0.0 }
  0xa2   :  { %v62_v61 = vld [vmem:[%s1289_s0 + $0x168] sm:$0xff] }
  0xa3   :  { %450 = vst.msk [vmem:[%s1293_s4 + $0x110] sm:$0xff] %vm415_vm0, %v385_v51  ;;  %451 = vst.msk [vmem:[%s1293_s4 + $0x118] sm:$0xff] %vm415_vm0, %v386_v52  ;;  %v133_v17 = vmul.f32 %v517_v1, %v62_v61 }
  0xa5   :  { %v204_v27 = vadd.f32 %v522_v2, %v133_v17 }
  0xa7   :  { %v332_v39 = vadd.f32 %v268_v20, %v204_v27 }
  0xa9   :  { %v396_v48 = vmax.f32 %v332_v39, 0.0 }
  0xaa   :  { %v63_v5 = vld [vmem:[%s1289_s0 + $0x170] sm:$0xff]  ;;  %v64_v6 = vld [vmem:[%s1289_s0 + $0x178] sm:$0xff] }
  0xab   :  { %452 = vst.msk [vmem:[%s1293_s4 + $0x120] sm:$0xff] %vm415_vm0, %v387_v56  ;;  %453 = vst.msk [vmem:[%s1293_s4 + $0x128] sm:$0xff] %vm415_vm0, %v388_v62  ;;  %v134_v21 = vmul.f32 %v517_v1, %v63_v5  ;;  %v135_v22 = vmul.f32 %v517_v1, %v64_v6  ;;  %v276_v6 = vld [vmem:[%s1292_s3 + $0x1a8] sm:$0xff] }
  0xac   :  { %454 = vst.msk [vmem:[%s1293_s4 + $0x130] sm:$0xff] %vm415_vm0, %v389_v7  ;;  %455 = vst.msk [vmem:[%s1293_s4 + $0x138] sm:$0xff] %vm415_vm0, %v390_v8 }
  0xad   :  { %v205_v33 = vadd.f32 %v522_v2, %v134_v21  ;;  %v206_v34 = vadd.f32 %v522_v2, %v135_v22 }
  0xaf   :  { %v333_v43 = vadd.f32 %v269_v28, %v205_v33  ;;  %v334_v44 = vadd.f32 %v270_v29, %v206_v34 }
  0xb1   :  { %v397_v55 = vmax.f32 %v333_v43, 0.0  ;;  %v398_v56 = vmax.f32 %v334_v44, 0.0  ;;  %v281_v44 = vld [vmem:[%s1292_s3 + $0x1d0] sm:$0xff] }
  0xb3   :  { %v65_v23 = vld [vmem:[%s1289_s0 + $0x180] sm:$0xff]  ;;  %v66_v30 = vld [vmem:[%s1289_s0 + $0x188] sm:$0xff]  ;;  %v67_v35 = vld [vmem:[%s1289_s0 + $0x190] sm:$0xff] }
  0xb4   :  { %v68_v36 = vld [vmem:[%s1289_s0 + $0x198] sm:$0xff]  ;;  %v136_v40 = vmul.f32 %v517_v1, %v65_v23  ;;  %v137_v46 = vmul.f32 %v517_v1, %v66_v30  ;;  %v138_v51 = vmul.f32 %v517_v1, %v67_v35 }
  0xb5   :  { %456 = vst.msk [vmem:[%s1293_s4 + $0x140] sm:$0xff] %vm415_vm0, %v391_v24  ;;  %v139_v52 = vmul.f32 %v517_v1, %v68_v36  ;;  %v280_v36 = vld [vmem:[%s1292_s3 + $0x1c8] sm:$0xff] }
  0xb6   :  { %v207_v49 = vadd.f32 %v522_v2, %v136_v40  ;;  %v208_v57 = vadd.f32 %v522_v2, %v137_v46  ;;  %v209_v62 = vadd.f32 %v522_v2, %v138_v51 }
  0xb7   :  { %v210_v63 = vadd.f32 %v522_v2, %v139_v52 }
  0xb8   :  { %v335_v61 = vadd.f32 %v271_v45, %v207_v49  ;;  %v336_v4 = vadd.f32 %v272_v50, %v208_v57  ;;  %v337_v11 = vadd.f32 %v273_v58, %v209_v62  ;;  %v282_v45 = vld [vmem:[%s1292_s3 + $0x1d8] sm:$0xff]  ;;  %v283_v50 = vld [vmem:[%s1292_s3 + $0x1e0] sm:$0xff] }
  0xb9   :  { %v338_v12 = vadd.f32 %v274_v59, %v210_v63  ;;  %v286_v62 = vld [vmem:[%s1292_s3 + $0x1f8] sm:$0xff] }
  0xba   :  { %v399_v10 = vmax.f32 %v335_v61, 0.0  ;;  %v400_v17 = vmax.f32 %v336_v4, 0.0  ;;  %v401_v23 = vmax.f32 %v337_v11, 0.0  ;;  %v285_v61 = vld [vmem:[%s1292_s3 + $0x1f0] sm:$0xff] }
  0xbb   :  { %v402_v24 = vmax.f32 %v338_v12, 0.0 }
  0xbc   :  { %v69_v41 = vld [vmem:[%s1289_s0 + $0x1a0] sm:$0xff] }
  0xbd   :  { %457 = vst.msk [vmem:[%s1293_s4 + $0x148] sm:$0xff] %vm415_vm0, %v392_v31  ;;  %v140_v60 = vmul.f32 %v517_v1, %v69_v41  ;;  %v279_v31 = vld [vmem:[%s1292_s3 + $0x1c0] sm:$0xff] }
  0xbf   :  { %v211_v5 = vadd.f32 %v522_v2, %v140_v60 }
  0xc1   :  { %v339_v18 = vadd.f32 %v275_v0, %v211_v5 }
  0xc3   :  { %v403_v28 = vmax.f32 %v339_v18, 0.0 }
  0xc4   :  { %v70_v47 = vld [vmem:[%s1289_s0 + $0x1a8] sm:$0xff] }
  0xc5   :  { %458 = vst.msk [vmem:[%s1293_s4 + $0x150] sm:$0xff] %vm415_vm0, %v393_v37  ;;  %459 = vst.msk [vmem:[%s1293_s4 + $0x158] sm:$0xff] %vm415_vm0, %v394_v38  ;;  %v141_v3 = vmul.f32 %v517_v1, %v70_v47 }
  0xc7   :  { %v212_v13 = vadd.f32 %v522_v2, %v141_v3 }
  0xc9   :  { %v340_v25 = vadd.f32 %v276_v6, %v212_v13 }
  0xcb   :  { %v404_v34 = vmax.f32 %v340_v25, 0.0 }
  0xcc   :  { %v71_v53 = vld [vmem:[%s1289_s0 + $0x1b0] sm:$0xff]  ;;  %v72_v54 = vld [vmem:[%s1289_s0 + $0x1b8] sm:$0xff] }
  0xcd   :  { %460 = vst.msk [vmem:[%s1293_s4 + $0x160] sm:$0xff] %vm415_vm0, %v395_v42  ;;  %461 = vst.msk [vmem:[%s1293_s4 + $0x168] sm:$0xff] %vm415_vm0, %v396_v48  ;;  %v142_v7 = vmul.f32 %v517_v1, %v71_v53  ;;  %v143_v8 = vmul.f32 %v517_v1, %v72_v54  ;;  %v284_v54 = vld [vmem:[%s1292_s3 + $0x1e8] sm:$0xff] }
  0xce   :  { %462 = vst.msk [vmem:[%s1293_s4 + $0x170] sm:$0xff] %vm415_vm0, %v397_v55  ;;  %463 = vst.msk [vmem:[%s1293_s4 + $0x178] sm:$0xff] %vm415_vm0, %v398_v56 }
  0xcf   :  { %v213_v19 = vadd.f32 %v522_v2, %v142_v7  ;;  %v214_v20 = vadd.f32 %v522_v2, %v143_v8 }
  0xd1   :  { %v341_v29 = vadd.f32 %v277_v14, %v213_v19  ;;  %v342_v30 = vadd.f32 %v278_v15, %v214_v20 }
  0xd3   :  { %v405_v41 = vmax.f32 %v341_v29, 0.0  ;;  %v406_v42 = vmax.f32 %v342_v30, 0.0 }
  0xd5   :  { %v73_v9 = vld [vmem:[%s1289_s0 + $0x1c0] sm:$0xff]  ;;  %v74_v16 = vld [vmem:[%s1289_s0 + $0x1c8] sm:$0xff]  ;;  %v75_v21 = vld [vmem:[%s1289_s0 + $0x1d0] sm:$0xff] }
  0xd6   :  { %v76_v22 = vld [vmem:[%s1289_s0 + $0x1d8] sm:$0xff]  ;;  %v144_v26 = vmul.f32 %v517_v1, %v73_v9  ;;  %v145_v32 = vmul.f32 %v517_v1, %v74_v16  ;;  %v146_v37 = vmul.f32 %v517_v1, %v75_v21 }
  0xd7   :  { %464 = vst.msk [vmem:[%s1293_s4 + $0x180] sm:$0xff] %vm415_vm0, %v399_v10  ;;  %v147_v38 = vmul.f32 %v517_v1, %v76_v22 }
  0xd8   :  { %v215_v35 = vadd.f32 %v522_v2, %v144_v26  ;;  %v216_v43 = vadd.f32 %v522_v2, %v145_v32  ;;  %v217_v48 = vadd.f32 %v522_v2, %v146_v37 }
  0xd9   :  { %v218_v49 = vadd.f32 %v522_v2, %v147_v38 }
  0xda   :  { %v343_v47 = vadd.f32 %v279_v31, %v215_v35  ;;  %v344_v52 = vadd.f32 %v280_v36, %v216_v43  ;;  %v345_v58 = vadd.f32 %v281_v44, %v217_v48 }
  0xdb   :  { %v346_v59 = vadd.f32 %v282_v45, %v218_v49 }
  0xdc   :  { %v407_v57 = vmax.f32 %v343_v47, 0.0  ;;  %v408_v63 = vmax.f32 %v344_v52, 0.0 }
  0xdd   :  { %v410_v5 = vmax.f32 %v346_v59, 0.0 }
  0xde   :  { %v77_v27 = vld [vmem:[%s1289_s0 + $0x1e0] sm:$0xff] }
  0xdf   :  { %465 = vst.msk [vmem:[%s1293_s4 + $0x188] sm:$0xff] %vm415_vm0, %v400_v17  ;;  %v148_v46 = vmul.f32 %v517_v1, %v77_v27 }
  0xe1   :  { %v219_v53 = vadd.f32 %v522_v2, %v148_v46 }
  0xe3   :  { %v347_v0 = vadd.f32 %v283_v50, %v219_v53 }
  0xe5   :  { %v411_v7 = vmax.f32 %v347_v0, 0.0 }
  0xe6   :  { %v78_v33 = vld [vmem:[%s1289_s0 + $0x1e8] sm:$0xff] }
  0xe7   :  { %466 = vst.msk [vmem:[%s1293_s4 + $0x190] sm:$0xff] %vm415_vm0, %v401_v23  ;;  %467 = vst.msk [vmem:[%s1293_s4 + $0x198] sm:$0xff] %vm415_vm0, %v402_v24  ;;  %v149_v51 = vmul.f32 %v517_v1, %v78_v33 }
  0xe9   :  { %v220_v60 = vadd.f32 %v522_v2, %v149_v51 }
  0xeb   :  { %v348_v6 = vadd.f32 %v284_v54, %v220_v60 }
  0xee   :  { %v79_v39 = vld [vmem:[%s1289_s0 + $0x1f0] sm:$0xff]  ;;  %v80_v40 = vld [vmem:[%s1289_s0 + $0x1f8] sm:$0xff] }
  0xef   :  { %468 = vst.msk [vmem:[%s1293_s4 + $0x1a0] sm:$0xff] %vm415_vm0, %v403_v28  ;;  %469 = vst.msk [vmem:[%s1293_s4 + $0x1a8] sm:$0xff] %vm415_vm0, %v404_v34  ;;  %v150_v55 = vmul.f32 %v517_v1, %v79_v39  ;;  %v151_v56 = vmul.f32 %v517_v1, %v80_v40  ;;  %v409_v1 = vmax.f32 %v345_v58, 0.0 }
  0xf0   :  { %470 = vst.msk [vmem:[%s1293_s4 + $0x1b0] sm:$0xff] %vm415_vm0, %v405_v41  ;;  %471 = vst.msk [vmem:[%s1293_s4 + $0x1b8] sm:$0xff] %vm415_vm0, %v406_v42 }
  0xf1   :  { %v221_v3 = vadd.f32 %v522_v2, %v150_v55  ;;  %v222_v4 = vadd.f32 %v522_v2, %v151_v56  ;;  %472 = vst.msk [vmem:[%s1293_s4 + $0x1c0] sm:$0xff] %vm415_vm0, %v407_v57  ;;  %473 = vst.msk [vmem:[%s1293_s4 + $0x1c8] sm:$0xff] %vm415_vm0, %v408_v63  ;;  %v412_v2 = vmax.f32 %v348_v6, 0.0 }
  0xf2   :  { %474 = vst.msk [vmem:[%s1293_s4 + $0x1d0] sm:$0xff] %vm415_vm0, %v409_v1  ;;  %475 = vst.msk [vmem:[%s1293_s4 + $0x1d8] sm:$0xff] %vm415_vm0, %v410_v5 }
  0xf3   :  { %v349_v8 = vadd.f32 %v285_v61, %v221_v3  ;;  %v350_v9 = vadd.f32 %v286_v62, %v222_v4  ;;  %476 = vst.msk [vmem:[%s1293_s4 + $0x1e0] sm:$0xff] %vm415_vm0, %v411_v7  ;;  %477 = vst.msk [vmem:[%s1293_s4 + $0x1e8] sm:$0xff] %vm415_vm0, %v412_v2 }
  0xf5   :  { %v413_v10 = vmax.f32 %v349_v8, 0.0  ;;  %v414_v11 = vmax.f32 %v350_v9, 0.0 }
  0xf7   :  { %478 = vst.msk [vmem:[%s1293_s4 + $0x1f0] sm:$0xff] %vm415_vm0, %v413_v10  ;;  %479 = vst.msk [vmem:[%s1293_s4 + $0x1f8] sm:$0xff] %vm415_vm0, %v414_v11 }

// kernel: residual_forward_nchw.4
= control target key start
LH: loop header
LB: loop body
LE: loop exit
PB: predicated region body
PF: predicated region fallthrough
CT: control target
= control target key end

     0   :  { %s6267_s18 = smov 0   ;;  %s9049_s0 = inlined_call_operand.vmem [shape: bf16[2,18,18,4], index: 0, kind: input, shape index: {}]   ;;  %s9050_s1 = inlined_call_operand.vmem [shape: bf16[9,4,4], index: 1, kind: input, shape index: {}]   ;;  %s9051_s2 = inlined_call_operand.vmem [shape: f32[1,4], index: 2, kind: input, shape index: {}]   ;;  %s9052_s3 = inlined_call_operand.vmem [shape: f32[2,256,4], index: 3, kind: output, shape index: {0}]   ;;  %s9053_s4 = inlined_call_operand.vmem [shape: f32[2,1,4], index: 4, kind: output, shape index: {1}]   ;;  %s9054_s5 = inlined_call_operand.vmem [shape: f32[2,1,4], index: 5, kind: output, shape index: {2}]  }
   0x1 LB: > { %s5151_s19 = sadd.s32 4294967295, %s6235_s18   ;;  %p5155_p0 = scmp.ge.s32.totalorder %s6235_s18, 1  ;;  %s6235_s18 = sphi %s6267_s18, %s16_s18  }
   0x2   : > { %p192_p1 = scmp.lt.s32.totalorder %s6235_s18, 3 }
   0x4   : > { %p193_p2 = pnand %p5155_p0, %p192_p1 }
   0x6   : > { %196 = sbr.rel (%p193_p2) target bundleno = 575 (0x23f), region = 32 }
   0xb   : > { %v5159_v0 = vld [vmem:[%s9050_s1 + $0x2] sm:$0x3]  ;;  %vm778_vm0 = vcmask 1041408   ;;  %p226_p3 = scmp.lt.s32.totalorder %s5151_s19, 1  ;;  %v275_v2 = vld [vmem:[%s9050_s1] sm:$0x3] }
   0xc   : > { %6161 = vmatprep.subr.msk.bf16.mxu1 %vm778_vm0, %v5159_v0  ;;  %6160 = vmatprep.subr.msk.bf16.mxu0 %vm778_vm0, %v5159_v0  ;;  %v780_v1 = vsel %vm778_vm0, %v5159_v0, 0  ;;  %v5240_v3 = vld [vmem:[%s9050_s1 + $0x4] sm:$0x3]  ;;  %vm292_vm1 = vsmask.f32 3328  ;;  %v6298_v4 = vsel %vm778_vm0, %v275_v2, 0 }
   0xd   : > { %6159 = vmatpush3.bf16.msra.mxu1 %v780_v1  ;;  %5853 = vmatpush3.bf16.msra.mxu0 %v780_v1  ;;  %s9316_s19 = smov (!%p226_p3, %s5151_s19), 1  ;;  %vm293_vm2 = vsmask.f32 7440  ;;  %vm729_vm3 = vcmask 31744   ;;  %v6324_v16 = vsel %vm778_vm0, %v5240_v3, 0  ;;  %vm1283_vm5 = vcmask 1042432  }
   0xe   : > { %6162 = vmatprep.subr.msk.bf16.mxu1 %vm778_vm0, %v275_v2  ;;  %6163 = vmatprep.subr.msk.bf16.mxu0 %vm778_vm0, %v5240_v3  ;;  %s6170_s26 = smul.u32 216, %s9316_s19  ;;  %vm6339_vm4 = vmor %vm292_vm1, %vm293_vm2  ;;  %vm1284_vm6 = vcmask 1046532   ;;  %s5698_s17 = sshll.u32 %s9316_s19, 8  ;;  %vm4942_vm8 = vcmask 24576  }
   0xf   : > { %vm6625_vm7 = vmor %vm1283_vm5, %vm1284_vm6  ;;  %s8796_s24 = scalar_lea.vmem %s9052_s3, %s5698_s17  ;;  %s238_s27 = scalar_lea.vmem %s9053_s4, %s9316_s19 }
  0x10   : > { %s6295_s29 = scalar_lea.vmem %s9049_s0, %s6170_s26  ;;  %s241_s30 = scalar_lea.vmem %s9054_s5, %s9316_s19 }
  0x11   : > { %v6301_v5 = vld [vmem:[%s6295_s29] sm:$0xf]  ;;  %v6304_v6 = vld [vmem:[%s6295_s29 + $0x4] sm:$0xf]  ;;  %v6307_v7 = vld [vmem:[%s6295_s29 + $0x8] sm:$0x1] }
  0x12   : > { %v296_v8 = vshrl.u32 %v6301_v5, 16  ;;  %v299_v9 = vshll.u32 %v6301_v5, 16  ;;  %v305_v10 = vshll.u32 %v6304_v6, 16  ;;  %v309_v11 = vshrl.u32 %v6304_v6, 16  ;;  %v6314_v12 = vld [vmem:[%s6295_s29 + $0x60] sm:$0xf] }
  0x13   : > { %v315_v13 = vshll.u32 %v6307_v7, 16  ;;  %v6318_v14 = vld [vmem:[%s6295_s29 + $0x64] sm:$0xf]  ;;  %v6321_v15 = vld [vmem:[%s6295_s29 + $0x68] sm:$0x1]  ;;  %v488_v22 = vshrl.u32 %v6314_v12, 16 }
  0x14   : > { %v298_v17 = vrot.slane %v296_v8, 4  ;;  %v301_v18 = vrot.slane %v299_v9, 5  ;;  %v307_v19 = vrot.slane %v305_v10, 5  ;;  %v311_v20 = vrot.slane %v309_v11, 4  ;;  %v6332_v29 = vld [vmem:[%s6295_s29 + $0xc] sm:$0xf] }
  0x15   : > { %v317_v21 = vrot.slane %v315_v13, 5  ;;  %v491_v23 = vshll.u32 %v6314_v12, 16  ;;  %v497_v24 = vshll.u32 %v6318_v14, 16  ;;  %v501_v27 = vshrl.u32 %v6318_v14, 16  ;;  %v6335_v30 = vld [vmem:[%s6295_s29 + $0x10] sm:$0xf] }
  0x16   : > { %v302_v25 = vor.u32 %v301_v18, %v298_v17  ;;  %v312_v26 = vor.u32 %v311_v20, %v307_v19  ;;  %v507_v28 = vshll.u32 %v6321_v15, 16  ;;  %v490_v33 = vrot.slane %v488_v22, 4  ;;  %v6345_v41 = vld [vmem:[%s6295_s29 + $0x14] sm:$0x1]  ;;  %v6356_v53 = vld [vmem:[%s6295_s29 + $0x6c] sm:$0xf] }
  0x17   : > { %v493_v34 = vrot.slane %v491_v23, 5  ;;  %v499_v35 = vrot.slane %v497_v24, 5  ;;  %v503_v38 = vrot.slane %v501_v27, 4  ;;  %v320_v42 = vshrl.u32 %v6332_v29, 16  ;;  %v6360_v58 = vld [vmem:[%s6295_s29 + $0x70] sm:$0xf] }
  0x18   : > { %v303_v36 = vrot.slane %v302_v25, 4  ;;  %v313_v37 = vrot.slane %v312_v26, 4  ;;  %v509_v39 = vrot.slane %v507_v28, 5  ;;  %v323_v43 = vshll.u32 %v6332_v29, 16  ;;  %v6368_v63 = vld [vmem:[%s6295_s29 + $0x74] sm:$0x1] }
  0x19   : > { %v494_v40 = vor.u32 %v493_v34, %v490_v33  ;;  %v329_v44 = vshll.u32 %v6335_v30, 16  ;;  %v504_v47 = vor.u32 %v503_v38, %v499_v35  ;;  %v333_v48 = vshrl.u32 %v6335_v30, 16  ;;  %v6374_v8 = vld [vmem:[%s6295_s29 + $0x18] sm:$0xf]  ;;  %v6387_v25 = vld [vmem:[%s6295_s29 + $0x20] sm:$0x1] }
  0x1a   : > { %v308_v45 = vsel %vm6339_vm4, %v303_v36, %v307_v19  ;;  %v318_v46 = vsel %vm6339_vm4, %v313_v37, %v317_v21  ;;  %v322_v51 = vrot.slane %v320_v42, 4  ;;  %v325_v52 = vrot.slane %v323_v43, 5  ;;  %v6381_v21 = vld [vmem:[%s6295_s29 + $0x1c] sm:$0xf] }
  0x1b   : > { %v5160_v49 = vcombine.low %v308_v45, %v318_v46  ;;  %v495_v50 = vrot.slane %v494_v40, 4  ;;  %v505_v54 = vrot.slane %v504_v47, 4  ;;  %v331_v55 = vrot.slane %v329_v44, 5  ;;  %v6400_v40 = vld [vmem:[%s9050_s1 + $0x8] sm:$0x3] }
  0x1c   : > { %v335_v56 = vrot.slane %v333_v48, 4  ;;  %v339_v57 = vshll.u32 %v6345_v41, 16  ;;  %v326_v60 = vor.u32 %v325_v52, %v322_v51  ;;  %v512_v3 = vshrl.u32 %v6356_v53, 16  ;;  %v6405_v46 = vld [vmem:[%s6295_s29 + $0x7c] sm:$0xf] }
  0x1d   : > { %5854 = vmatprep.mubr.msk.bf16.mxu0 %vm729_vm3, %v5160_v49  ;;  %v500_v59 = vsel %vm6339_vm4, %v495_v50, %v499_v35  ;;  %v510_v0 = vsel %vm6339_vm4, %v505_v54, %v509_v39  ;;  %v515_v11 = vshll.u32 %v6356_v53, 16  ;;  %v521_v13 = vshll.u32 %v6360_v58, 16  ;;  %v6394_v35 = vld [vmem:[%s6295_s29 + $0x78] sm:$0xf] }
  0x1e   : > { %v336_v1 = vor.u32 %v335_v56, %v331_v55  ;;  %v341_v2 = vrot.slane %v339_v57, 5  ;;  %v5168_v9 = vcombine.low %v500_v59, %v510_v0  ;;  %v327_v10 = vrot.slane %v326_v60, 4  ;;  %v6412_v56 = vld [vmem:[%s6295_s29 + $0x80] sm:$0x1] }
  0x1f   : > { %v514_v18 = vrot.slane %v512_v3, 4  ;;  %v525_v19 = vshrl.u32 %v6360_v58, 16  ;;  %v531_v20 = vshll.u32 %v6368_v63, 16  ;;  %v517_v23 = vrot.slane %v515_v11, 5  ;;  %9090 = vst [vmem:[#allocation2_spill] sm:$0xff] %v6412_v56 }
  0x20   : > { %v337_v17 = vrot.slane %v336_v1, 4  ;;  %5870 = vmatprep.mubr.msk.bf16.mxu1 %vm729_vm3, %v5168_v9  ;;  %v332_v22 = vsel %vm6339_vm4, %v327_v10, %v331_v55  ;;  %v523_v24 = vrot.slane %v521_v13, 5  ;;  %v344_v26 = vshrl.u32 %v6374_v8, 16  ;;  %v6418_v1 = vld [vmem:[%s6295_s29 + $0x24] sm:$0xf] }
  0x21   : > { %v527_v28 = vrot.slane %v525_v19, 4  ;;  %v533_v33 = vrot.slane %v531_v20, 5  ;;  %v347_v34 = vshll.u32 %v6374_v8, 16  ;;  %v518_v37 = vor.u32 %v517_v23, %v514_v18  ;;  %v6426_v10 = vld [vmem:[%s6295_s29 + $0x28] sm:$0xf] }
  0x22   : > { %v342_v27 = vsel %vm6339_vm4, %v337_v17, %v341_v2  ;;  %v346_v38 = vrot.slane %v344_v26, 4  ;;  %v353_v39 = vshll.u32 %v6381_v21, 16  ;;  %v357_v44 = vshrl.u32 %v6381_v21, 16  ;;  %v6432_v19 = vld [vmem:[%s9050_s1 + $0x6] sm:$0x3] }
  0x23   : > { %v5161_v36 = vcombine.low %v332_v22, %v342_v27  ;;  %v528_v42 = vor.u32 %v527_v28, %v523_v24  ;;  %v349_v43 = vrot.slane %v347_v34, 5  ;;  %v363_v45 = vshll.u32 %v6387_v25, 16 }
  0x24   : > { %v519_v47 = vrot.slane %v518_v37, 4  ;;  %v355_v48 = vrot.slane %v353_v39, 5  ;;  %v536_v49 = vshrl.u32 %v6394_v35, 16  ;;  %v539_v50 = vshll.u32 %v6394_v35, 16 }
  0x25   : > { %5855 = vmatmul.mubr.msk.bf16.vlgmr.msra.gmra.mxu0 %vm729_vm3, %v5161_v36  ;;  %v529_v51 = vrot.slane %v528_v42, 4  ;;  %v350_v52 = vor.u32 %v349_v43, %v346_v38  ;;  %v359_v54 = vrot.slane %v357_v44, 4  ;;  %v365_v55 = vrot.slane %v363_v45, 5  ;;  %v6444_v36 = vld [vmem:[%s6295_s29 + $0x84] sm:$0xf] }
  0x26   : > { %5921 = vmatpush3.bf16.msra.mxu0 %v6324_v16  ;;  %v524_v57 = vsel %vm6339_vm4, %v519_v47, %v523_v24  ;;  %v538_v59 = vrot.slane %v536_v49, 4  ;;  %v541_v60 = vrot.slane %v539_v50, 5  ;;  %v545_v0 = vshll.u32 %v6405_v46, 16  ;;  %v6437_v24 = vld [vmem:[%s6295_s29 + $0x2c] sm:$0x1] }
  0x27   : > { %6165 = vmatprep.subr.msk.bf16.mxu0 %vm778_vm0, %v6400_v40  ;;  %v534_v16 = vsel %vm6339_vm4, %v529_v51, %v533_v33  ;;  %v351_v2 = vrot.slane %v350_v52, 4  ;;  %v360_v3 = vor.u32 %v359_v54, %v355_v48  ;;  %v549_v9 = vshrl.u32 %v6405_v46, 16  ;;  %v6451_v43 = vld [vmem:[%s6295_s29 + $0x88] sm:$0xf]  ;;  %v6459_v51 = vld [vmem:[%s6295_s29 + $0x8c] sm:$0x1] }
  0x28   : > { %v5169_v11 = vcombine.low %v524_v57, %v534_v16  ;;  %v542_v13 = vor.u32 %v541_v60, %v538_v59  ;;  %v547_v17 = vrot.slane %v545_v0, 5  ;;  %v555_v18 = vshll.u32 %v6412_v56, 16  ;;  %9091 = vst [vmem:[#allocation3_spill] sm:$0xff] %v6459_v51  ;;  %v6467_v60 = vld [vmem:[%s6295_s29 + $0x30] sm:$0xf] }
  0x29   : > { %v356_v20 = vsel %vm6339_vm4, %v351_v2, %v355_v48  ;;  %v361_v22 = vrot.slane %v360_v3, 4  ;;  %v551_v23 = vrot.slane %v549_v9, 4  ;;  %v368_v26 = vshrl.u32 %v6418_v1, 16  ;;  %v6472_v9 = vld [vmem:[%s6295_s29 + $0x34] sm:$0xf] }
  0x2a   : > { %5871 = vmatmul.mubr.msk.bf16.vlgmr.msra.gmra.mxu1 %vm729_vm3, %v5169_v11  ;;  %v543_v27 = vrot.slane %v542_v13, 4  ;;  %v557_v28 = vrot.slane %v555_v18, 5  ;;  %v371_v33 = vshll.u32 %v6418_v1, 16  ;;  %v377_v34 = vshll.u32 %v6426_v10, 16 }
  0x2b   : > { %5887 = vmatpush3.bf16.msra.mxu1 %v6298_v4  ;;  %v366_v37 = vsel %vm6339_vm4, %v361_v22, %v365_v55  ;;  %v552_v38 = vor.u32 %v551_v23, %v547_v17  ;;  %v370_v39 = vrot.slane %v368_v26, 4  ;;  %v381_v42 = vshrl.u32 %v6426_v10, 16 }
  0x2c   : > { %v5162_v44 = vcombine.low %v356_v20, %v366_v37  ;;  %v548_v45 = vsel %vm6339_vm4, %v543_v27, %v547_v17  ;;  %v373_v47 = vrot.slane %v371_v33, 5  ;;  %v379_v48 = vrot.slane %v377_v34, 5  ;;  %6164 = vmatprep.subr.msk.bf16.mxu1 %vm778_vm0, %v6432_v19  ;;  %v6480_v33 = vld [vmem:[%s6295_s29 + $0x38] sm:$0x1] }
  0x2d   : > { %v553_v4 = vrot.slane %v552_v38, 4  ;;  %v383_v49 = vrot.slane %v381_v42, 4  ;;  %v387_v50 = vshll.u32 %v6437_v24, 16  ;;  %v560_v52 = vshrl.u32 %v6444_v36, 16  ;;  %v6485_v38 = vld [vmem:[%s6295_s29 + $0x90] sm:$0xf] }
  0x2e   : > { %5858 = vmatprep.mubr.msk.bf16.mxu0 %vm729_vm3, %v5162_v44  ;;  %v374_v54 = vor.u32 %v373_v47, %v370_v39  ;;  %v563_v55 = vshll.u32 %v6444_v36, 16  ;;  %v569_v57 = vshll.u32 %v6451_v43, 16  ;;  %v573_v59 = vshrl.u32 %v6451_v43, 16  ;;  %9092 = vst [vmem:[#allocation4_spill] sm:$0xff] %v6485_v38  ;;  %v6490_v47 = vld [vmem:[%s6295_s29 + $0x94] sm:$0xf] }
  0x2f   : > { %v558_v0 = vsel %vm6339_vm4, %v553_v4, %v557_v28  ;;  %v384_v16 = vor.u32 %v383_v49, %v379_v48  ;;  %v389_v2 = vrot.slane %v387_v50, 5  ;;  %v562_v3 = vrot.slane %v560_v52, 4  ;;  %9093 = vst [vmem:[#allocation5_spill] sm:$0xff] %v6490_v47 }
  0x30   : > { %v5170_v11 = vcombine.low %v548_v45, %v558_v0  ;;  %v375_v13 = vrot.slane %v374_v54, 4  ;;  %v565_v17 = vrot.slane %v563_v55, 5  ;;  %v571_v18 = vrot.slane %v569_v57, 5 }
  0x31   : > { %v385_v20 = vrot.slane %v384_v16, 4  ;;  %v575_v22 = vrot.slane %v573_v59, 4  ;;  %v579_v23 = vshll.u32 %v6459_v51, 16  ;;  %v392_v26 = vshrl.u32 %v6467_v60, 16  ;;  %v6499_v16 = vld [vmem:[%s6295_s29 + $0x98] sm:$0x1] }
  0x32   : > { %5874 = vmatprep.mubr.msk.bf16.mxu1 %vm729_vm3, %v5170_v11  ;;  %v380_v27 = vsel %vm6339_vm4, %v375_v13, %v379_v48  ;;  %v566_v28 = vor.u32 %v565_v17, %v562_v3  ;;  %v395_v34 = vshll.u32 %v6467_v60, 16  ;;  %v401_v37 = vshll.u32 %v6472_v9, 16  ;;  %9094 = vst [vmem:[#allocation6_spill] sm:$0xff] %v6499_v16  ;;  %v6504_v11 = vld [vmem:[%s6295_s29 + $0x3c] sm:$0xf] }
  0x33   : > { %v390_v39 = vsel %vm6339_vm4, %v385_v20, %v389_v2  ;;  %v576_v42 = vor.u32 %v575_v22, %v571_v18  ;;  %v581_v44 = vrot.slane %v579_v23, 5  ;;  %v394_v45 = vrot.slane %v392_v26, 4  ;;  %v6509_v23 = vld [vmem:[%s6295_s29 + $0x40] sm:$0xf]  ;;  %v1236_v51 = vld [vmem:[%s6295_s29 + $0xc] sm:$0xe] }
  0x34   : > { %v5163_v48 = vcombine.low %v380_v27, %v390_v39  ;;  %v567_v4 = vrot.slane %v566_v28, 4  ;;  %v397_v49 = vrot.slane %v395_v34, 5  ;;  %v403_v50 = vrot.slane %v401_v37, 5 }
  0x35   : > { %v577_v52 = vrot.slane %v576_v42, 4  ;;  %v405_v54 = vshrl.u32 %v6472_v9, 16  ;;  %v411_v55 = vshll.u32 %v6480_v33, 16  ;;  %v584_v57 = vshrl.u32 %v6485_v38, 16 }
  0x36   : > { %5859 = vmatmul.mubr.msk.bf16.gmra.mxu0 %vm729_vm3, %v5163_v48  ;;  %v572_v59 = vsel %vm6339_vm4, %v567_v4, %v571_v18  ;;  %v398_v0 = vor.u32 %v397_v49, %v394_v45  ;;  %v587_v2 = vshll.u32 %v6485_v38, 16  ;;  %v593_v3 = vshll.u32 %v6490_v47, 16  ;;  %v6518_v48 = vld [vmem:[%s6295_s29 + $0x44] sm:$0x1] }
  0x37   : > { %v582_v13 = vsel %vm6339_vm4, %v577_v52, %v581_v44  ;;  %v407_v17 = vrot.slane %v405_v54, 4  ;;  %v413_v20 = vrot.slane %v411_v55, 5  ;;  %v586_v22 = vrot.slane %v584_v57, 4  ;;  %v6523_v52 = vld [vmem:[%s6295_s29 + $0x9c] sm:$0xf] }
  0x38   : > { %v5171_v18 = vcombine.low %v572_v59, %v582_v13  ;;  %v399_v26 = vrot.slane %v398_v0, 4  ;;  %v589_v27 = vrot.slane %v587_v2, 5  ;;  %v595_v28 = vrot.slane %v593_v3, 5  ;;  %9095 = vst [vmem:[#allocation7_spill] sm:$0xff] %v6523_v52  ;;  %v6527_v13 = vld [vmem:[%s6295_s29 + $0xa0] sm:$0xf] }
  0x39   : > { %v408_v34 = vor.u32 %v407_v17, %v403_v50  ;;  %v597_v37 = vshrl.u32 %v6490_v47, 16  ;;  %v603_v39 = vshll.u32 %v6499_v16, 16  ;;  %v416_v42 = vshrl.u32 %v6504_v11, 16  ;;  %9096 = vst [vmem:[#allocation8_spill] sm:$0xff] %v6527_v13 }
  0x3a   : > { %5875 = vmatmul.mubr.msk.bf16.gmra.mxu1 %vm729_vm3, %v5171_v18  ;;  %v404_v44 = vsel %vm6339_vm4, %v399_v26, %v403_v50  ;;  %v590_v45 = vor.u32 %v589_v27, %v586_v22  ;;  %v419_v4 = vshll.u32 %v6504_v11, 16  ;;  %v425_v49 = vshll.u32 %v6509_v23, 16  ;;  %v6533_v26 = vld [vmem:[%s6295_s29 + $0xa4] sm:$0x1] }
  0x3b   : > { %v409_v54 = vrot.slane %v408_v34, 4  ;;  %v599_v55 = vrot.slane %v597_v37, 4  ;;  %v605_v57 = vrot.slane %v603_v39, 5  ;;  %v418_v59 = vrot.slane %v416_v42, 4  ;;  %9097 = vst [vmem:[#allocation9_spill] sm:$0xff] %v6533_v26 }
  0x3c   : > { %v591_v0 = vrot.slane %v590_v45, 4  ;;  %v421_v2 = vrot.slane %v419_v4, 5  ;;  %v427_v3 = vrot.slane %v425_v49, 5  ;;  %v429_v50 = vshrl.u32 %v6509_v23, 16  ;;  %v6537_v34 = vld [vmem:[%s6295_s29 + $0x48] sm:$0xf] }
  0x3d   : > { %v414_v17 = vsel %vm6339_vm4, %v409_v54, %v413_v20  ;;  %v600_v22 = vor.u32 %v599_v55, %v595_v28  ;;  %v435_v18 = vshll.u32 %v6518_v48, 16  ;;  %v608_v27 = vshrl.u32 %v6523_v52, 16 }
  0x3e   : > { %v5164_v37 = vcombine.low %v404_v44, %v414_v17  ;;  %v596_v39 = vsel %vm6339_vm4, %v591_v0, %v595_v28  ;;  %v422_v42 = vor.u32 %v421_v2, %v418_v59  ;;  %v431_v45 = vrot.slane %v429_v50, 4  ;;  %v6546_v17 = vld [vmem:[%s6295_s29 + $0x4c] sm:$0xf]  ;;  %v6552_v2 = vld [vmem:[%s6295_s29 + $0x50] sm:$0x1] }
  0x3f   : > { %v601_v4 = vrot.slane %v600_v22, 4  ;;  %v437_v49 = vrot.slane %v435_v18, 5  ;;  %v610_v20 = vrot.slane %v608_v27, 4  ;;  %v611_v54 = vshll.u32 %v6523_v52, 16 }
  0x40   : > { %5862 = vmatprep.mubr.msk.bf16.mxu0 %vm729_vm3, %v5164_v37  ;;  %v423_v55 = vrot.slane %v422_v42, 4  ;;  %v432_v62 = vor.u32 %v431_v45, %v427_v3  ;;  %v617_v32 = vshll.u32 %v6527_v13, 16  ;;  %v621_v44 = vshrl.u32 %v6527_v13, 16  ;;  %v6558_v42 = vld [vmem:[%s6295_s29 + $0xa8] sm:$0xf] }
  0x41   : > { %v606_v28 = vsel %vm6339_vm4, %v601_v4, %v605_v57  ;;  %v613_v59 = vrot.slane %v611_v54, 5  ;;  %v627_v0 = vshll.u32 %v6533_v26, 16  ;;  %v440_v50 = vshrl.u32 %v6537_v34, 16  ;;  %9098 = vst [vmem:[#allocation10_spill] sm:$0xff] %v6558_v42 }
  0x42   : > { %v5172_v22 = vcombine.low %v596_v39, %v606_v28  ;;  %v428_v18 = vsel %vm6339_vm4, %v423_v55, %v427_v3  ;;  %v433_v27 = vrot.slane %v432_v62, 4  ;;  %v619_v37 = vrot.slane %v617_v32, 5 }
  0x43   : > { %v614_v45 = vor.u32 %v613_v59, %v610_v20  ;;  %v623_v61 = vrot.slane %v621_v44, 4  ;;  %v629_v57 = vrot.slane %v627_v0, 5  ;;  %v442_v4 = vrot.slane %v440_v50, 4  ;;  %v6568_v44 = vld [vmem:[%s6295_s29 + $0xac] sm:$0xf] }
  0x44   : > { %5878 = vmatprep.mubr.msk.bf16.mxu1 %vm729_vm3, %v5172_v22  ;;  %v438_v54 = vsel %vm6339_vm4, %v433_v27, %v437_v49  ;;  %v443_v39 = vshll.u32 %v6537_v34, 16  ;;  %v449_v28 = vshll.u32 %v6546_v17, 16  ;;  %v453_v62 = vshrl.u32 %v6546_v17, 16  ;;  %9099 = vst [vmem:[#allocation11_spill] sm:$0xff] %v6568_v44  ;;  %v6571_v22 = vld [vmem:[%s6295_s29 + $0xb0] sm:$0x1] }
  0x45   : > { %v5165_v3 = vcombine.low %v428_v18, %v438_v54  ;;  %v615_v32 = vrot.slane %v614_v45, 4  ;;  %v624_v55 = vor.u32 %v623_v61, %v619_v37  ;;  %v459_v20 = vshll.u32 %v6552_v2, 16  ;;  %9100 = vst [vmem:[#allocation12_spill] sm:$0xff] %v6571_v22 }
  0x46   : > { %v445_v59 = vrot.slane %v443_v39, 5  ;;  %v451_v0 = vrot.slane %v449_v28, 5  ;;  %v455_v50 = vrot.slane %v453_v62, 4  ;;  %v632_v49 = vshrl.u32 %v6558_v42, 16  ;;  %v6580_v62 = vld [vmem:[%s6295_s29 + $0x54] sm:$0xf] }
  0x47   : > { %5863 = vmatmul.mubr.msk.bf16.gmra.mxu0 %vm729_vm3, %v5165_v3  ;;  %v620_v18 = vsel %vm6339_vm4, %v615_v32, %v619_v37  ;;  %v625_v27 = vrot.slane %v624_v55, 4  ;;  %v461_v61 = vrot.slane %v459_v20, 5  ;;  %v635_v45 = vshll.u32 %v6558_v42, 16  ;;  %v6587_v55 = vld [vmem:[%s6295_s29 + $0x58] sm:$0xf] }
  0x48   : > { %v446_v54 = vor.u32 %v445_v59, %v442_v4  ;;  %v456_v56 = vor.u32 %v455_v50, %v451_v0  ;;  %v634_v39 = vrot.slane %v632_v49, 4  ;;  %v641_v28 = vshll.u32 %v6568_v44, 16  ;;  %v6590_v49 = vld [vmem:[%s6295_s29 + $0x5c] sm:$0x1] }
  0x49   : > { %v630_v3 = vsel %vm6339_vm4, %v625_v27, %v629_v57  ;;  %v637_v26 = vrot.slane %v635_v45, 5  ;;  %v645_v37 = vshrl.u32 %v6568_v44, 16  ;;  %v651_v32 = vshll.u32 %v6571_v22, 16  ;;  %v1235_v22 = vld [vmem:[%s6295_s29] sm:$0xe] }
  0x4a   : > { %v5173_v4 = vcombine.low %v620_v18, %v630_v3  ;;  %v447_v20 = vrot.slane %v446_v54, 4  ;;  %v457_v59 = vrot.slane %v456_v56, 4  ;;  %v643_v50 = vrot.slane %v641_v28, 5  ;;  %v6601_v54 = vld [vmem:[%s6295_s29 + $0xb4] sm:$0xf] }
  0x4b   : > { %v638_v42 = vor.u32 %v637_v26, %v634_v39  ;;  %v647_v52 = vrot.slane %v645_v37, 4  ;;  %v653_v13 = vrot.slane %v651_v32, 5  ;;  %v464_v57 = vshrl.u32 %v6580_v62, 16  ;;  %9101 = vst [vmem:[#allocation13_spill] sm:$0xff] %v6601_v54  ;;  %v6604_v37 = vld [vmem:[%s6295_s29 + $0xb8] sm:$0xf] }
  0x4c   : > { %5879 = vmatmul.mubr.msk.bf16.gmra.mxu1 %vm729_vm3, %v5173_v4  ;;  %v452_v27 = vsel %vm6339_vm4, %v447_v20, %v451_v0  ;;  %v462_v18 = vsel %vm6339_vm4, %v457_v59, %v461_v61  ;;  %v467_v56 = vshll.u32 %v6580_v62, 16  ;;  %v473_v45 = vshll.u32 %v6587_v55, 16  ;;  %v6609_v61 = vld [vmem:[%s6295_s29 + $0xbc] sm:$0x1] }
  0x4d   : > { %v5166_v26 = vcombine.low %v452_v27, %v462_v18  ;;  %v639_v39 = vrot.slane %v638_v42, 4  ;;  %v648_v28 = vor.u32 %v647_v52, %v643_v50  ;;  %v466_v3 = vrot.slane %v464_v57, 4 }
  0x4e   : > { %v469_v32 = vrot.slane %v467_v56, 5  ;;  %v475_v4 = vrot.slane %v473_v45, 5  ;;  %v477_v0 = vshrl.u32 %v6587_v55, 16  ;;  %v483_v20 = vshll.u32 %v6590_v49, 16 }
  0x4f   : > { %5866 = vmatprep.mubr.msk.bf16.mxu0 %vm729_vm3, %v5166_v26  ;;  %v644_v59 = vsel %vm6339_vm4, %v639_v39, %v643_v50  ;;  %v649_v27 = vrot.slane %v648_v28, 4  ;;  %v656_v52 = vshrl.u32 %v6601_v54, 16  ;;  %v659_v42 = vshll.u32 %v6601_v54, 16 }
  0x50   : > { %v470_v57 = vor.u32 %v469_v32, %v466_v3  ;;  %v479_v18 = vrot.slane %v477_v0, 4  ;;  %v485_v56 = vrot.slane %v483_v20, 5  ;;  %v665_v45 = vshll.u32 %v6604_v37, 16 }
  0x51   : > { %v654_v44 = vsel %vm6339_vm4, %v649_v27, %v653_v13  ;;  %v658_v16 = vrot.slane %v656_v52, 4  ;;  %v661_v26 = vrot.slane %v659_v42, 5  ;;  %v669_v38 = vshrl.u32 %v6604_v37, 16 }
  0x52   : > { %v5174_v50 = vcombine.low %v644_v59, %v654_v44  ;;  %v471_v39 = vrot.slane %v470_v57, 4  ;;  %v480_v28 = vor.u32 %v479_v18, %v475_v4  ;;  %v667_v47 = vrot.slane %v665_v45, 5  ;;  %v1237_v57 = vld [vmem:[%s6295_s29 + $0x18] sm:$0xe] }
  0x53   : > { %v662_v54 = vor.u32 %v661_v26, %v658_v16  ;;  %v671_v3 = vrot.slane %v669_v38, 4  ;;  %v675_v32 = vshll.u32 %v6609_v61, 16  ;;  %v5224_v13 = vrot.slane %v1235_v22, 9 }
  0x54   : > { %5882 = vmatprep.mubr.msk.bf16.mxu1 %vm729_vm3, %v5174_v50  ;;  %v476_v44 = vsel %vm6339_vm4, %v471_v39, %v475_v4  ;;  %v481_v20 = vrot.slane %v480_v28, 4  ;;  %v1288_v59 = vrot.slane %v6304_v6, 5  ;;  %v5193_v38 = vcombine.low %v6332_v29, %v6335_v30 }
  0x55   : > { %v663_v16 = vrot.slane %v662_v54, 4  ;;  %v672_v27 = vor.u32 %v671_v3, %v667_v47  ;;  %v677_v52 = vrot.slane %v675_v32, 5  ;;  %v5225_v42 = vrot.slane %v1236_v51, 9 }
  0x56   : > { %v486_v18 = vsel %vm6339_vm4, %v481_v20, %v485_v56  ;;  %v1289_v22 = vsel %vm6625_vm7, %v5224_v13, %v1288_v59  ;;  %v1290_v45 = vrot.slane %v1288_v59, 4  ;;  %v9104_v4 = vrot.slane %v6335_v30, 5 }
  0x57   : > { %v5167_v50 = vcombine.low %v476_v44, %v486_v18  ;;  %v668_v54 = vsel %vm6339_vm4, %v663_v16, %v667_v47  ;;  %v673_v39 = vrot.slane %v672_v27, 4  ;;  %v5192_v51 = vcombine.low %v6301_v5, %v6304_v6  ;;  %v1238_v27 = vld [vmem:[%s6295_s29 + $0x24] sm:$0xe] }
  0x58   : > { %v1297_v26 = vrot.slane %v9104_v4, 4  ;;  %v9105_v28 = vrot.slane %v6307_v7, 5  ;;  %v9106_v3 = vmov %v9104_v4  ;;  %v5194_v13 = vcombine.low %v6374_v8, %v6381_v21  ;;  %v1240_v4 = vld [vmem:[%s6295_s29 + $0x3c] sm:$0xe] }
  0x59   : > { %v1296_v32 = vsel %vm6625_vm7, %v5225_v42, %v9106_v3  ;;  %v5226_v44 = vrot.slane %v1237_v57, 9  ;;  %5867 = vmatmul.mubr.msk.bf16.gmra.mxu0 %vm729_vm3, %v5167_v50  ;;  %v678_v47 = vsel %vm6339_vm4, %v673_v39, %v677_v52  ;;  %v9107_v6 = vrot.slane %v6345_v41, 5  ;;  %v1239_v42 = vld [vmem:[%s6295_s29 + $0x30] sm:$0xe]  ;;  %v1241_v39 = vld [vmem:[%s6295_s29 + $0x48] sm:$0xe] }
  0x5a   : > { %v1292_v56 = vsel %vm6625_vm7, %v1290_v45, %v9105_v28  ;;  %v1302_v20 = vrot.slane %v6381_v21, 5  ;;  %v5175_v59 = vcombine.low %v668_v54, %v678_v47  ;;  %v1305_v16 = vrot.slane %v6387_v25, 5  ;;  %v1242_v47 = vld [vmem:[%s6295_s29 + $0x54] sm:$0xe]  ;;  %v6920_v21 = vld [vmem:[%s6295_s29 + $0x2c] sm:$0x1] }
  0x5b   : > { %v5241_v5 = vcombine.low %v1289_v22, %v1292_v56  ;;  %v1299_v7 = vsel %vm6625_vm7, %v1297_v26, %v9107_v6  ;;  %v1856_v52 = vsel %vm778_vm0, %v6432_v19, 0  ;;  %v1309_v18 = vrot.slane %v6426_v10, 5 }
  0x5c   : > { %v1303_v41 = vsel %vm6625_vm7, %v5226_v44, %v1302_v20  ;;  %v1304_v57 = vrot.slane %v1302_v20, 4  ;;  %5883 = vmatmul.mubr.msk.bf16.gmra.mxu1 %vm729_vm3, %v5175_v59  ;;  %v5242_v22 = vcombine.low %v1296_v32, %v1299_v7  ;;  %v2582_v25 = vsel %vm778_vm0, %v6400_v40, 0 }
  0x5d   : > { %5922 = vmatprep.mubr.msk.bf16.mxu0 %vm729_vm3, %v5241_v5  ;;  %v1316_v45 = vrot.slane %v6472_v9, 5  ;;  %5888 = vmatprep.mubr.msk.bf16.mxu1 %vm729_vm3, %v5192_v51  ;;  %v5227_v26 = vrot.slane %v1238_v27, 9  ;;  %v1312_v50 = vrot.slane %v6437_v24, 5  ;;  %v5228_v54 = vrot.slane %v1239_v42, 9  ;;  %v6692_v24 = vld [vmem:[%s9050_s1 + $0xc] sm:$0x3] }
  0x5e   : > { %v1306_v19 = vsel %vm6625_vm7, %v1304_v57, %v1305_v16  ;;  %v1311_v56 = vrot.slane %v1309_v18, 4  ;;  %v1319_v32 = vrot.slane %v6480_v33, 5  ;;  %v5229_v44 = vrot.slane %v1240_v4, 9 }
  0x5f   : > { %v5243_v28 = vcombine.low %v1303_v41, %v1306_v19  ;;  %v1318_v3 = vrot.slane %v1316_v45, 4  ;;  %v1323_v40 = vrot.slane %v6509_v23, 5  ;;  %v1347_v5 = vrot.slane %v6321_v15, 5 }
  0x60   : > { %v1326_v51 = vrot.slane %v6518_v48, 5  ;;  %v5230_v6 = vrot.slane %v1241_v39, 9  ;;  %v1330_v7 = vrot.slane %v6546_v17, 5  ;;  %v5195_v33 = vcombine.low %v6418_v1, %v6426_v10  ;;  %v1243_v1 = vld [vmem:[%s6295_s29 + $0x60] sm:$0xe] }
  0x61   : > { %5923 = vmatmul.mubr.msk.bf16.vlgmr.msra.gmra.mxu0 %vm729_vm3, %v5242_v22  ;;  %v1310_v20 = vsel %vm6625_vm7, %v5227_v26, %v1309_v18  ;;  %v1325_v59 = vrot.slane %v1323_v40, 4  ;;  %v1333_v16 = vrot.slane %v6552_v2, 5  ;;  %v1313_v48 = vsel %vm6625_vm7, %v1311_v56, %v1312_v50  ;;  %v6720_v22 = vld [vmem:[%s9050_s1 + $0xa] sm:$0x3]  ;;  %v6745_v50 = vld [vmem:[%s6295_s29 + $0x6c] sm:$0xe] }
  0x62   : > { %5989 = vmatpush3.bf16.msra.mxu0 %v2582_v25  ;;  %5926 = vmatprep.mubr.msk.bf16.mxu0 %vm729_vm3, %v5243_v28  ;;  %v1317_v27 = vsel %vm6625_vm7, %v5228_v54, %v1316_v45  ;;  %v1320_v42 = vsel %vm6625_vm7, %v1318_v3, %v1319_v32  ;;  %v1332_v41 = vrot.slane %v1330_v7, 4  ;;  %v6710_v10 = vsel %vm6625_vm7, %v5229_v44, %v1323_v40  ;;  %v1246_v39 = vld [vmem:[%s6295_s29 + $0x84] sm:$0xe]  ;;  %v6774_v44 = vld [vmem:[%s6295_s29 + $0x78] sm:$0xe] }
  0x63   : > { %v6714_v2 = vsel %vm6625_vm7, %v5230_v6, %v1330_v7  ;;  %v5231_v57 = vrot.slane %v1242_v47, 9  ;;  %v1337_v18 = vrot.slane %v6587_v55, 5  ;;  %6167 = vmatprep.subr.msk.bf16.mxu0 %vm778_vm0, %v6692_v24  ;;  %v6730_v25 = vsel %vm6625_vm7, %v1325_v59, %v1326_v51  ;;  %v1247_v40 = vld [vmem:[%s6295_s29 + $0x90] sm:$0xe] }
  0x64   : > { %5889 = vmatmul.mubr.msk.bf16.vlgmr.msra.gmra.mxu1 %vm729_vm3, %v5193_v38  ;;  %v6734_v45 = vsel %vm6625_vm7, %v1332_v41, %v1333_v16  ;;  %v1340_v4 = vrot.slane %v6590_v49, 5  ;;  %v1344_v19 = vrot.slane %v6318_v14, 5  ;;  %v5244_v29 = vcombine.low %v1310_v20, %v1313_v48  ;;  %v9108_v48 = vld [vmem:[#allocation3_spill] sm:$0xff] }
  0x65   : > { %5955 = vmatpush3.bf16.msra.mxu1 %v1856_v52  ;;  %5892 = vmatprep.mubr.msk.bf16.mxu1 %vm729_vm3, %v5194_v13  ;;  %v5196_v30 = vcombine.low %v6467_v60, %v6472_v9  ;;  %v1339_v38 = vrot.slane %v1337_v18, 4  ;;  %v5232_v26 = vrot.slane %v1243_v1, 9  ;;  %v5245_v49 = vcombine.low %v1317_v27, %v1320_v42  ;;  %v1248_v42 = vld [vmem:[%s6295_s29 + $0x9c] sm:$0xe] }
  0x66   : > { %v5197_v52 = vcombine.low %v6504_v11, %v6509_v23  ;;  %v5198_v8 = vcombine.low %v6537_v34, %v6546_v17  ;;  %6166 = vmatprep.subr.msk.bf16.mxu1 %vm778_vm0, %v6720_v22  ;;  %v5246_v60 = vcombine.low %v6710_v10, %v6730_v25  ;;  %v5247_v9 = vcombine.low %v6714_v2, %v6734_v45  ;;  %v9109_v10 = vld [vmem:[#allocation5_spill] sm:$0xff]  ;;  %v9110_v2 = vld [vmem:[#allocation4_spill] sm:$0xff] }
  0x67   : > { %v1346_v54 = vrot.slane %v1344_v19, 4  ;;  %v6764_v28 = vsel %vm6625_vm7, %v5231_v57, %v1337_v18  ;;  %v6768_v56 = vsel %vm6625_vm7, %v1339_v38, %v1340_v4  ;;  %v5233_v32 = vrot.slane %v6745_v50, 9  ;;  %v1249_v18 = vld [vmem:[%s6295_s29 + $0xa8] sm:$0xe]  ;;  %v9112_v38 = vld [vmem:[#allocation8_spill] sm:$0xff] }
  0x68   : > { %v6780_v47 = vsel %vm6625_vm7, %v5232_v26, %v1344_v19  ;;  %v1351_v51 = vrot.slane %v6360_v58, 5  ;;  %v1354_v6 = vrot.slane %v6368_v63, 5  ;;  %v5235_v59 = vrot.slane %v1246_v39, 9  ;;  %v9111_v19 = vld [vmem:[#allocation6_spill] sm:$0xff]  ;;  %v9113_v26 = vld [vmem:[#allocation7_spill] sm:$0xff] }
  0x69   : > { %5927 = vmatmul.mubr.msk.bf16.gmra.mxu0 %vm729_vm3, %v5244_v29  ;;  %v1365_v16 = vrot.slane %v6451_v43, 5  ;;  %v1368_v27 = vrot.slane %v9108_v48, 5  ;;  %v5248_v41 = vcombine.low %v6764_v28, %v6768_v56  ;;  %v6798_v63 = vsel %vm6625_vm7, %v1346_v54, %v1347_v5  ;;  %v9115_v48 = vld [vmem:[#allocation11_spill] sm:$0xff] }
  0x6a   : > { %5930 = vmatprep.mubr.msk.bf16.mxu0 %vm729_vm3, %v5245_v49  ;;  %v5234_v1 = vrot.slane %v6774_v44, 9  ;;  %v5236_v4 = vrot.slane %v1247_v40, 9  ;;  %v1372_v15 = vrot.slane %v9109_v10, 5  ;;  %v1353_v5 = vrot.slane %v1351_v51, 4  ;;  %v5338_v57 = vld [vmem:[%s6295_s29 + $0xc] sm:$0xf] }
  0x6b   : > { %v6807_v25 = vsel %vm6625_vm7, %v5235_v59, %v1365_v16  ;;  %v1367_v45 = vrot.slane %v1365_v16, 4  ;;  %v1375_v29 = vrot.slane %v9111_v19, 5  ;;  %v5237_v49 = vrot.slane %v1248_v42, 9  ;;  %v9114_v59 = vld [vmem:[#allocation9_spill] sm:$0xff]  ;;  %v9116_v42 = vld [vmem:[#allocation10_spill] sm:$0xff] }
  0x6c   : > { %5893 = vmatmul.mubr.msk.bf16.gmra.mxu1 %vm729_vm3, %v5195_v33  ;;  %v1358_v33 = vrot.slane %v6405_v46, 5  ;;  %v6821_v39 = vsel %vm6625_vm7, %v5236_v4, %v1372_v15  ;;  %v1374_v44 = vrot.slane %v1372_v15, 4  ;;  %v1379_v40 = vrot.slane %v9112_v38, 5  ;;  %v9117_v15 = vld [vmem:[#allocation12_spill] sm:$0xff] }
  0x6d   : > { %5896 = vmatprep.mubr.msk.bf16.mxu1 %vm729_vm3, %v5196_v30  ;;  %v6817_v54 = vsel %vm6625_vm7, %v1367_v45, %v1368_v27  ;;  %v1382_v16 = vrot.slane %v9114_v59, 5  ;;  %v5238_v45 = vrot.slane %v1249_v18, 9  ;;  %v1386_v4 = vrot.slane %v9115_v48, 5 }
  0x6e   : > { %v6831_v27 = vsel %vm6625_vm7, %v1374_v44, %v1375_v29  ;;  %v1389_v50 = vrot.slane %v9117_v15, 5  ;;  %v6841_v19 = vsel %vm6625_vm7, %v5237_v49, %v1379_v40  ;;  %v1381_v7 = vrot.slane %v1379_v40, 4  ;;  %v9118_v29 = vld [vmem:[#allocation13_spill] sm:$0xff]  ;;  %v9119_v15 = vld [vmem:[#allocation2_spill] sm:$0xff]  ;;  %v6856_v49 = vld [vmem:[%s6295_s29 + $0x10] sm:$0xf] }
  0x6f   : > { %v6848_v18 = vsel %vm6625_vm7, %v5233_v32, %v1351_v51  ;;  %v6853_v59 = vsel %vm6625_vm7, %v5238_v45, %v1386_v4  ;;  %v1388_v30 = vrot.slane %v1386_v4, 4  ;;  %v5341_v40 = vld [vmem:[%s6295_s29 + $0x18] sm:$0xf]  ;;  %v1360_v20 = vrot.slane %v1358_v33, 4 }
  0x70   : > { %v2100_v44 = vshrl.u32 %v5338_v57, 16  ;;  %v2103_v32 = vshll.u32 %v5338_v57, 16  ;;  %v5249_v51 = vcombine.low %v6780_v47, %v6798_v63  ;;  %v6871_v45 = vsel %vm6625_vm7, %v1353_v5, %v1354_v6  ;;  %v1250_v57 = vld [vmem:[%s6295_s29 + $0xb4] sm:$0xe]  ;;  %v6892_v47 = vld [vmem:[%s6295_s29 + $0x14] sm:$0x1] }
  0x71   : > { %5931 = vmatmul.mubr.msk.bf16.gmra.mxu0 %vm729_vm3, %v5246_v60  ;;  %v1361_v60 = vrot.slane %v9119_v15, 5  ;;  %v6886_v11 = vsel %vm6625_vm7, %v5234_v1, %v1358_v33  ;;  %v2109_v6 = vshll.u32 %v6856_v49, 16  ;;  %v5342_v63 = vld [vmem:[%s6295_s29 + $0x1c] sm:$0xf]  ;;  %v2113_v17 = vshrl.u32 %v6856_v49, 16 }
  0x72   : > { %5934 = vmatprep.mubr.msk.bf16.mxu0 %vm729_vm3, %v5247_v9  ;;  %v6861_v9 = vsel %vm6625_vm7, %v1381_v7, %v1382_v16  ;;  %v6877_v7 = vsel %vm6625_vm7, %v1388_v30, %v1389_v50  ;;  %v2102_v5 = vrot.slane %v2100_v44, 4  ;;  %v2105_v34 = vrot.slane %v2103_v32, 5  ;;  %v5344_v15 = vld [vmem:[%s6295_s29 + $0x24] sm:$0xf]  ;;  %v6905_v44 = vld [vmem:[%s6295_s29 + $0x28] sm:$0xf] }
  0x73   : > { %v2124_v50 = vshrl.u32 %v5341_v40, 16  ;;  %v1362_v1 = vsel %vm6625_vm7, %v1360_v20, %v1361_v60  ;;  %v5239_v33 = vrot.slane %v1250_v57, 9  ;;  %v6900_v30 = vrot.slane %v2109_v6, 5 }
  0x74   : > { %5897 = vmatmul.mubr.msk.bf16.gmra.mxu1 %vm729_vm3, %v5197_v52  ;;  %v1393_v52 = vrot.slane %v6604_v37, 5  ;;  %v2127_v16 = vshll.u32 %v5341_v40, 16  ;;  %v1396_v23 = vrot.slane %v6609_v61, 5  ;;  %v2115_v4 = vrot.slane %v2113_v17, 4 }
  0x75   : > { %5900 = vmatprep.mubr.msk.bf16.mxu1 %vm729_vm3, %v5198_v8  ;;  %v5343_v8 = vld [vmem:[%s6295_s29 + $0x20] sm:$0x1]  ;;  %v2126_v3 = vrot.slane %v2124_v50, 4  ;;  %v2133_v13 = vshll.u32 %v5342_v63, 16  ;;  %v2119_v20 = vshll.u32 %v6892_v47, 16  ;;  %v2137_v57 = vshrl.u32 %v5342_v63, 16 }
  0x76   : > { %v1395_v32 = vrot.slane %v1393_v52, 4  ;;  %v2129_v60 = vrot.slane %v2127_v16, 5  ;;  %v5250_v61 = vcombine.low %v6848_v18, %v6871_v45  ;;  %v5251_v40 = vcombine.low %v6886_v11, %v1362_v1 }
  0x77   : > { %v2106_v6 = vor.u32 %v2105_v34, %v2102_v5  ;;  %v6916_v17 = vrot.slane %v2133_v13, 5  ;;  %v2116_v28 = vor.u32 %v2115_v4, %v6900_v30  ;;  %v2143_v50 = vshll.u32 %v5343_v8, 16  ;;  %v6943_v5 = vld [vmem:[%s6295_s29 + $0x34] sm:$0xf] }
  0x78   : > { %v2130_v56 = vor.u32 %v2129_v60, %v2126_v3  ;;  %v6928_v18 = vsel %vm6625_vm7, %v5239_v33, %v1393_v52  ;;  %v2148_v13 = vshrl.u32 %v5344_v15, 16  ;;  %v2151_v45 = vshll.u32 %v5344_v15, 16  ;;  %v5347_v52 = vld [vmem:[%s6295_s29 + $0x30] sm:$0xf] }
  0x79   : > { %5935 = vmatmul.mubr.msk.bf16.gmra.mxu0 %vm729_vm3, %v5248_v41  ;;  %v2139_v41 = vrot.slane %v2137_v57, 4  ;;  %v2157_v11 = vshll.u32 %v6905_v44, 16  ;;  %v9121_v3 = vcombine.low %v6314_v12, %v6318_v14  ;;  %v6937_v4 = vsel %vm6625_vm7, %v1395_v32, %v1396_v23 }
  0x7a   : > { %5938 = vmatprep.mubr.msk.bf16.mxu0 %vm729_vm3, %v5249_v51  ;;  %v9120_v51 = vcombine.low %v6580_v62, %v6587_v55  ;;  %v2121_v62 = vrot.slane %v2119_v20, 5  ;;  %v2161_v63 = vshrl.u32 %v6905_v44, 16  ;;  %v2107_v34 = vrot.slane %v2106_v6, 4 }
  0x7b   : > { %v2140_v55 = vor.u32 %v2139_v41, %v6916_v17  ;;  %v2150_v8 = vrot.slane %v2148_v13, 4  ;;  %v2153_v1 = vrot.slane %v2151_v45, 5  ;;  %v6945_v33 = vrot.slane %v2157_v11, 5  ;;  %v6951_v41 = vld [vmem:[%s6295_s29 + $0x38] sm:$0x1] }
  0x7c   : > { %5901 = vmatmul.mubr.msk.bf16.gmra.mxu1 %vm729_vm3, %v9120_v51  ;;  %v2117_v12 = vrot.slane %v2116_v28, 4  ;;  %v2131_v14 = vrot.slane %v2130_v56, 4  ;;  %v2145_v16 = vrot.slane %v2143_v50, 5  ;;  %v2163_v23 = vrot.slane %v2161_v63, 4  ;;  %v5350_v13 = vld [vmem:[%s6295_s29 + $0x3c] sm:$0xf] }
  0x7d   : > { %5904 = vmatprep.mubr.msk.bf16.mxu1 %vm729_vm3, %v9121_v3  ;;  %v2141_v15 = vrot.slane %v2140_v55, 4  ;;  %v2167_v32 = vshll.u32 %v6920_v21, 16  ;;  %v2172_v20 = vshrl.u32 %v5347_v52, 16  ;;  %v2175_v60 = vshll.u32 %v5347_v52, 16 }
  0x7e   : > { %v2154_v57 = vor.u32 %v2153_v1, %v2150_v8  ;;  %v2164_v6 = vor.u32 %v2163_v23, %v6945_v33  ;;  %v2181_v28 = vshll.u32 %v6943_v5, 16  ;;  %v2185_v56 = vshrl.u32 %v6943_v5, 16  ;;  %v5353_v8 = vld [vmem:[%s6295_s29 + $0x48] sm:$0xf]  ;;  %v6978_v1 = vld [vmem:[%s6295_s29 + $0x4c] sm:$0xf] }
  0x7f   : > { %v2174_v50 = vrot.slane %v2172_v20, 4  ;;  %v2177_v51 = vrot.slane %v2175_v60, 5  ;;  %v9122_v3 = vcombine.low %v6356_v53, %v6360_v58  ;;  %v5256_v55 = vcombine.low %v6928_v18, %v6937_v4 }
  0x80   : > { %v6957_v45 = vrot.slane %v2181_v28, 5  ;;  %v2187_v11 = vrot.slane %v2185_v56, 4  ;;  %v2122_v63 = vsel %vm6339_vm4, %v2117_v12, %v2121_v62  ;;  %v2136_v52 = vsel %vm6339_vm4, %v2131_v14, %v6916_v17 }
  0x81   : > { %5939 = vmatmul.mubr.msk.bf16.gmra.mxu0 %vm729_vm3, %v5250_v61  ;;  %v6960_v61 = vld [vmem:[%s6295_s29 + $0x40] sm:$0xf]  ;;  %v9123_v53 = vcombine.low %v6394_v35, %v6405_v46  ;;  %v2146_v58 = vsel %vm6339_vm4, %v2141_v15, %v2145_v16  ;;  %v2155_v23 = vrot.slane %v2154_v57, 4  ;;  %v2178_v20 = vor.u32 %v2177_v51, %v2174_v50  ;;  %v7012_v50 = vld [vmem:[%s6295_s29 + $0x44] sm:$0x1] }
  0x82   : > { %5942 = vmatprep.mubr.msk.bf16.mxu0 %vm729_vm3, %v5251_v40  ;;  %v2112_v40 = vsel %vm6339_vm4, %v2107_v34, %v6900_v30  ;;  %v2165_v30 = vrot.slane %v2164_v6, 4  ;;  %v2169_v34 = vrot.slane %v2167_v32, 5  ;;  %v2191_v62 = vshll.u32 %v6951_v41, 16  ;;  %v5356_v51 = vld [vmem:[%s6295_s29 + $0x54] sm:$0xf] }
  0x83   : > { %v2196_v12 = vshrl.u32 %v5350_v13, 16  ;;  %v2199_v17 = vshll.u32 %v5350_v13, 16  ;;  %v6989_v14 = vsel %vm778_vm0, %v6720_v22, 0  ;;  %v2188_v35 = vor.u32 %v2187_v11, %v6957_v45 }
  0x84   : > { %5905 = vmatmul.mubr.msk.bf16.gmra.mxu1 %vm729_vm3, %v9122_v3  ;;  %v2205_v46 = vshll.u32 %v6960_v61, 16  ;;  %v2209_v16 = vshrl.u32 %v6960_v61, 16  ;;  %v6994_v15 = vcombine.low %v2112_v40, %v2122_v63  ;;  %v6998_v32 = vsel %vm778_vm0, %v6692_v24, 0  ;;  %v7021_v40 = vld [vmem:[%s6295_s29 + $0x58] sm:$0xf] }
  0x85   : > { %5908 = vmatprep.mubr.msk.bf16.mxu1 %vm729_vm3, %v9123_v53  ;;  %v2220_v60 = vshrl.u32 %v5353_v8, 16  ;;  %v2223_v57 = vshll.u32 %v5353_v8, 16  ;;  %v9124_v6 = vcombine.low %v6807_v25, %v6817_v54  ;;  %v7004_v22 = vcombine.low %v2136_v52, %v2146_v58  ;;  %v7026_v8 = vld [vmem:[%s6295_s29 + $0x50] sm:$0x1] }
  0x86   : > { %v2160_v28 = vsel %vm6339_vm4, %v2155_v23, %v6945_v33  ;;  %v2170_v56 = vsel %vm6339_vm4, %v2165_v30, %v2169_v34  ;;  %v2229_v24 = vshll.u32 %v6978_v1, 16  ;;  %v9125_v25 = vcombine.low %v6821_v39, %v6831_v27  ;;  %v5359_v34 = vld [vmem:[%s6295_s29 + $0x60] sm:$0xf] }
  0x87   : > { %v2179_v54 = vrot.slane %v2178_v20, 4  ;;  %v2193_v13 = vrot.slane %v2191_v62, 5  ;;  %v2198_v11 = vrot.slane %v2196_v12, 4  ;;  %v2201_v3 = vrot.slane %v2199_v17, 5 }
  0x88   : > { %v2189_v33 = vrot.slane %v2188_v35, 4  ;;  %v7023_v63 = vrot.slane %v2205_v46, 5  ;;  %v2211_v52 = vrot.slane %v2209_v16, 4  ;;  %v2233_v53 = vshrl.u32 %v6978_v1, 16  ;;  %v7043_v35 = vld [vmem:[%s6295_s29 + $0x5c] sm:$0x1] }
  0x89   : > { %5943 = vmatmul.mubr.msk.bf16.gmra.mxu0 %vm729_vm3, %v9124_v6  ;;  %v9126_v39 = vcombine.low %v6444_v36, %v6451_v43  ;;  %v2222_v27 = vrot.slane %v2220_v60, 4  ;;  %v2225_v58 = vrot.slane %v2223_v57, 5  ;;  %v2244_v23 = vshrl.u32 %v5356_v51, 16 }
  0x8a   : > { %5946 = vmatprep.mubr.msk.bf16.mxu0 %vm729_vm3, %v9125_v25  ;;  %v2247_v30 = vshll.u32 %v5356_v51, 16  ;;  %v9127_v20 = vcombine.low %v9110_v2, %v9109_v10  ;;  %v7038_v62 = vcombine.low %v2160_v28, %v2170_v56  ;;  %v7040_v12 = vrot.slane %v2229_v24, 5  ;;  %v7056_v28 = vld [vmem:[%s6295_s29 + $0x64] sm:$0xf] }
  0x8b   : > { %v2235_v17 = vrot.slane %v2233_v53, 4  ;;  %v2253_v36 = vshll.u32 %v7021_v40, 16  ;;  %v2215_v43 = vshll.u32 %v7012_v50, 16  ;;  %v2246_v46 = vrot.slane %v2244_v23, 4 }
  0x8c   : > { %5909 = vmatmul.mubr.msk.bf16.gmra.mxu1 %vm729_vm3, %v9126_v39  ;;  %v2249_v16 = vrot.slane %v2247_v30, 5  ;;  %v2257_v60 = vshrl.u32 %v7021_v40, 16  ;;  %v2184_v10 = vsel %vm6339_vm4, %v2179_v54, %v6957_v45  ;;  %v2194_v2 = vsel %vm6339_vm4, %v2189_v33, %v2193_v13  ;;  %v7078_v30 = vld [vmem:[%s6295_s29 + $0x68] sm:$0x1] }
  0x8d   : > { %5912 = vmatprep.mubr.msk.bf16.mxu1 %vm729_vm3, %v9127_v20  ;;  %v2202_v57 = vor.u32 %v2201_v3, %v2198_v11  ;;  %v7053_v6 = vrot.slane %v2253_v36, 5  ;;  %v2212_v56 = vor.u32 %v2211_v52, %v7023_v63  ;;  %v2226_v24 = vor.u32 %v2225_v58, %v2222_v27  ;;  %v5362_v3 = vld [vmem:[%s6295_s29 + $0x6c] sm:$0xf]  ;;  %v7075_v27 = vld [vmem:[%s6295_s29 + $0x70] sm:$0xf] }
  0x8e   : > { %v2239_v51 = vshll.u32 %v7026_v8, 16  ;;  %v2259_v25 = vrot.slane %v2257_v60, 4  ;;  %v9128_v53 = vcombine.low %v6841_v19, %v6861_v9  ;;  %v2236_v45 = vor.u32 %v2235_v17, %v7040_v12 }
  0x8f   : > { %v2250_v54 = vor.u32 %v2249_v16, %v2246_v46  ;;  %v2268_v13 = vshrl.u32 %v5359_v34, 16  ;;  %v2271_v11 = vshll.u32 %v5359_v34, 16  ;;  %v9129_v33 = vcombine.low %v6853_v59, %v6877_v7  ;;  %v5365_v16 = vld [vmem:[%s6295_s29 + $0x78] sm:$0xf] }
  0x90   : > { %v2260_v52 = vor.u32 %v2259_v25, %v7053_v6  ;;  %v2263_v39 = vshll.u32 %v7043_v35, 16  ;;  %v2277_v19 = vshll.u32 %v7056_v28, 16  ;;  %v2281_v9 = vshrl.u32 %v7056_v28, 16 }
  0x91   : > { %5947 = vmatmul.mubr.msk.bf16.gmra.mxu0 %vm729_vm3, %v9128_v53  ;;  %v2203_v58 = vrot.slane %v2202_v57, 4  ;;  %v2217_v23 = vrot.slane %v2215_v43, 5  ;;  %v2270_v34 = vrot.slane %v2268_v13, 4  ;;  %v2273_v20 = vrot.slane %v2271_v11, 5 }
  0x92   : > { %5950 = vmatprep.mubr.msk.bf16.mxu0 %vm729_vm3, %v9129_v33  ;;  %v9130_v59 = vcombine.low %v9113_v26, %v9112_v38  ;;  %v7084_v7 = vcombine.low %v2184_v10, %v2194_v2  ;;  %v2213_v17 = vrot.slane %v2212_v56, 4  ;;  %v2227_v36 = vrot.slane %v2226_v24, 4  ;;  %v7094_v2 = vld [vmem:[%s6295_s29 + $0x7c] sm:$0xf] }
  0x93   : > { %v7086_v46 = vrot.slane %v2277_v19, 5  ;;  %v9131_v43 = vcombine.low %v9116_v42, %v9115_v48  ;;  %v2237_v60 = vrot.slane %v2236_v45, 4  ;;  %v2241_v57 = vrot.slane %v2239_v51, 5  ;;  %9132 = vst [vmem:[#allocation3_spill] sm:$0xff] %v7094_v2  ;;  %v5368_v19 = vld [vmem:[%s6295_s29 + $0x84] sm:$0xf] }
  0x94   : > { %5913 = vmatmul.mubr.msk.bf16.gmra.mxu1 %vm729_vm3, %v9130_v59  ;;  %v2251_v25 = vrot.slane %v2250_v54, 4  ;;  %v2283_v38 = vrot.slane %v2281_v9, 4  ;;  %v2261_v26 = vrot.slane %v2260_v52, 4  ;;  %v2265_v53 = vrot.slane %v2263_v39, 5 }
  0x95   : > { %5916 = vmatprep.mubr.msk.bf16.mxu1 %vm729_vm3, %v9131_v43  ;;  %v2274_v13 = vor.u32 %v2273_v20, %v2270_v34  ;;  %v2292_v10 = vshrl.u32 %v5362_v3, 16  ;;  %v2208_v56 = vsel %vm6339_vm4, %v2203_v58, %v7023_v63  ;;  %v2295_v24 = vshll.u32 %v5362_v3, 16  ;;  %v6195_v63 = vld [vmem:[%s6295_s29 + $0xc] sm:$0xff]   ;;  %v7128_v34 = vld [vmem:[%s6295_s29 + $0x88] sm:$0xf] }
  0x96   : > { %v2301_v48 = vshll.u32 %v7075_v27, 16  ;;  %v2305_v42 = vshrl.u32 %v7075_v27, 16  ;;  %v2218_v51 = vsel %vm6339_vm4, %v2213_v17, %v2217_v23  ;;  %v2232_v45 = vsel %vm6339_vm4, %v2227_v36, %v7040_v12  ;;  %9133 = vst [vmem:[#allocation5_spill] sm:$0xff] %v7128_v34  ;;  %v7137_v36 = vld [vmem:[%s6295_s29 + $0x74] sm:$0x1] }
  0x97   : > { %v2284_v54 = vor.u32 %v2283_v38, %v7086_v46  ;;  %v2287_v11 = vshll.u32 %v7078_v30, 16  ;;  %v2242_v3 = vsel %vm6339_vm4, %v2237_v60, %v2241_v57  ;;  %v2256_v33 = vsel %vm6339_vm4, %v2251_v25, %v7053_v6  ;;  %9135 = vst [vmem:[#allocation4_spill] sm:$0xff] %v7137_v36  ;;  %v7147_v38 = vld [vmem:[%s6295_s29 + $0x80] sm:$0x1] }
  0x98   : > { %v2316_v52 = vshrl.u32 %v5365_v16, 16  ;;  %v2319_v12 = vshll.u32 %v5365_v16, 16  ;;  %v2266_v18 = vsel %vm6339_vm4, %v2261_v26, %v2265_v53  ;;  %v2275_v4 = vrot.slane %v2274_v13, 4  ;;  %9136 = vst [vmem:[#allocation6_spill] sm:$0xff] %v7147_v38  ;;  %v7150_v26 = vld [vmem:[%s6295_s29 + $0x8c] sm:$0x1] }
  0x99   : > { %5951 = vmatmul.mubr.msk.bf16.gmra.mxu0 %vm729_vm3, %v5256_v55  ;;  %v2294_v55 = vrot.slane %v2292_v10, 4  ;;  %v2325_v39 = vshll.u32 %v7094_v2, 16  ;;  %v2297_v9 = vrot.slane %v2295_v24, 5  ;;  %v7124_v58 = vrot.slane %v2301_v48, 5  ;;  %9137 = vst [vmem:[#allocation8_spill] sm:$0xff] %v7150_v26  ;;  %v6196_v10 = vld [vmem:[%s6295_s29 + $0x18] sm:$0xff]  }
  0x9a   : > { %5990 = vmatprep.mubr.msk.bf16.mxu0 %vm729_vm3, %v6994_v15  ;;  %v2307_v23 = vrot.slane %v2305_v42, 4  ;;  %v2329_v6 = vshrl.u32 %v7094_v2, 16  ;;  %v9134_v15 = vcombine.low %v9118_v29, %v6604_v37  ;;  %v7134_v20 = vcombine.low %v2208_v56, %v2218_v51  ;;  %v5371_v51 = vld [vmem:[%s6295_s29 + $0x90] sm:$0xf] }
  0x9b   : > { %v2285_v59 = vrot.slane %v2284_v54, 4  ;;  %v2289_v17 = vrot.slane %v2287_v11, 5  ;;  %v2318_v16 = vrot.slane %v2316_v52, 4  ;;  %v2321_v43 = vrot.slane %v2319_v12, 5 }
  0x9c   : > { %5917 = vmatmul.mubr.msk.bf16.gmra.mxu1 %vm729_vm3, %v9134_v15  ;;  %v7140_v60 = vrot.slane %v2325_v39, 5  ;;  %v2331_v57 = vrot.slane %v2329_v6, 4  ;;  %v2340_v25 = vshrl.u32 %v5368_v19, 16  ;;  %v7142_v37 = vcombine.low %v2232_v45, %v2242_v3  ;;  %v7161_v45 = vld [vmem:[%s6295_s29 + $0x94] sm:$0xf] }
  0x9d   : > { %5956 = vmatprep.mubr.msk.bf16.mxu1 %vm729_vm3, %v6195_v63  ;;  %v7144_v29 = vcombine.low %v2256_v33, %v2266_v18  ;;  %v2343_v53 = vshll.u32 %v5368_v19, 16  ;;  %v2349_v13 = vshll.u32 %v7128_v34, 16  ;;  %v2280_v56 = vsel %vm6339_vm4, %v2275_v4, %v7086_v46  ;;  %9138 = vst [vmem:[#allocation7_spill] sm:$0xff] %v7161_v45  ;;  %v7169_v33 = vld [vmem:[%s9050_s1 + $0x10] sm:$0x3]  ;;  %v6197_v46 = vld [vmem:[%s6295_s29 + $0x24] sm:$0xff]  }
  0x9e   : > { %v2298_v24 = vor.u32 %v2297_v9, %v2294_v55  ;;  %v2308_v48 = vor.u32 %v2307_v23, %v7124_v58  ;;  %v2311_v42 = vshll.u32 %v7137_v36, 16  ;;  %v2342_v54 = vrot.slane %v2340_v25, 4  ;;  %9139 = vst [vmem:[#allocation9_spill] sm:$0xff] %v7169_v33 }
  0x9f   : > { %v2345_v11 = vrot.slane %v2343_v53, 5  ;;  %v7163_v63 = vrot.slane %v2349_v13, 5  ;;  %v2353_v3 = vshrl.u32 %v7128_v34, 16  ;;  %v2290_v52 = vsel %vm6339_vm4, %v2285_v59, %v2289_v17 }
  0xa0   : > { %v2322_v12 = vor.u32 %v2321_v43, %v2318_v16  ;;  %v2332_v18 = vor.u32 %v2331_v57, %v7140_v60  ;;  %v2335_v4 = vshll.u32 %v7147_v38, 16  ;;  %v2364_v19 = vshrl.u32 %v5371_v51, 16  ;;  %v7203_v57 = vld [vmem:[%s6295_s29 + $0xa0] sm:$0xf] }
  0xa1   : > { %5991 = vmatmul.mubr.msk.bf16.vlgmr.msra.gmra.mxu0 %vm729_vm3, %v7004_v22  ;;  %v2346_v55 = vor.u32 %v2345_v11, %v2342_v54  ;;  %v2355_v39 = vrot.slane %v2353_v3, 4  ;;  %v2367_v9 = vshll.u32 %v5371_v51, 16  ;;  %v5374_v22 = vld [vmem:[%s6295_s29 + $0x9c] sm:$0xf]  ;;  %v7182_v23 = vrot.slane %v2298_v24, 4  ;;  %9141 = vst [vmem:[#allocation10_spill] sm:$0xff] %v7203_v57 }
  0xa2   : > { %6057 = vmatpush3.bf16.msra.mxu0 %v6998_v32  ;;  %5994 = vmatprep.mubr.msk.bf16.mxu0 %vm729_vm3, %v7038_v62  ;;  %v7184_v6 = vrot.slane %v2311_v42, 5  ;;  %v2359_v15 = vshll.u32 %v7150_v26, 16  ;;  %v2373_v59 = vshll.u32 %v7161_v45, 16  ;;  %v7191_v32 = vld [vmem:[%s9050_s1 + $0xe] sm:$0x3]  ;;  %v7196_v62 = vcombine.low %v2280_v56, %v2290_v52 }
  0xa3   : > { %9140 = vst [vmem:[#allocation11_spill] sm:$0xff] %v7191_v32  ;;  %6169 = vmatprep.subr.msk.bf16.mxu0 %vm778_vm0, %v7169_v33  ;;  %v7198_v17 = vrot.slane %v2308_v48, 4  ;;  %v2356_v16 = vor.u32 %v2355_v39, %v7163_v63  ;;  %v2377_v43 = vshrl.u32 %v7161_v45, 16  ;;  %v7207_v25 = vrot.slane %v2322_v12, 4  ;;  %v7216_v56 = vld [vmem:[%s6295_s29 + $0x98] sm:$0x1] }
  0xa4   : > { %5957 = vmatmul.mubr.msk.bf16.vlgmr.msra.gmra.mxu1 %vm729_vm3, %v6196_v10  ;;  %v7209_v53 = vrot.slane %v2332_v18, 4  ;;  %v7211_v13 = vrot.slane %v2335_v4, 5  ;;  %v7213_v10 = vrot.slane %v2346_v55, 4  ;;  %9142 = vst [vmem:[#allocation12_spill] sm:$0xff] %v7216_v56  ;;  %v2366_v24 = vrot.slane %v2364_v19, 4  ;;  %v6199_v19 = vld [vmem:[%s6295_s29 + $0x3c] sm:$0xff]  }
  0xa5   : > { %6023 = vmatpush3.bf16.msra.mxu1 %v6989_v14  ;;  %5960 = vmatprep.mubr.msk.bf16.mxu1 %vm729_vm3, %v6197_v46  ;;  %v2369_v48 = vrot.slane %v2367_v9, 5  ;;  %v2388_v42 = vshrl.u32 %v5374_v22, 16  ;;  %v2391_v51 = vshll.u32 %v5374_v22, 16  ;;  %v6198_v14 = vld [vmem:[%s6295_s29 + $0x30] sm:$0xff]   ;;  %v7225_v11 = vrot.slane %v2359_v15, 5 }
  0xa6   : > { %6168 = vmatprep.subr.msk.bf16.mxu1 %vm778_vm0, %v7191_v32  ;;  %v7227_v3 = vrot.slane %v2373_v59, 5  ;;  %v2397_v46 = vshll.u32 %v7203_v57, 16  ;;  %v5377_v52 = vld [vmem:[%s6295_s29 + $0xa8] sm:$0xf]  ;;  %v7231_v12 = vrot.slane %v2356_v16, 4  ;;  %v2379_v18 = vrot.slane %v2377_v43, 4 }
  0xa7   : > { %v2383_v4 = vshll.u32 %v7216_v56, 16  ;;  %v2401_v55 = vshrl.u32 %v7203_v57, 16  ;;  %v7236_v39 = vld [vmem:[%s6295_s29 + $0xac] sm:$0xf]  ;;  %v2370_v59 = vor.u32 %v2369_v48, %v2366_v24  ;;  %v7260_v16 = vld [vmem:[%s6295_s29 + $0xa4] sm:$0x1] }
  0xa8   : > { %9143 = vst [vmem:[#allocation13_spill] sm:$0xff] %v7236_v39  ;;  %9144 = vst [vmem:[#allocation2_spill] sm:$0xff] %v7260_v16  ;;  %v2390_v43 = vrot.slane %v2388_v42, 4  ;;  %v2393_v22 = vrot.slane %v2391_v51, 5  ;;  %v2412_v54 = vshrl.u32 %v5377_v52, 16  ;;  %v7262_v9 = vrot.slane %v2397_v46, 5 }
  0xa9   : > { %5995 = vmatmul.mubr.msk.bf16.gmra.mxu0 %vm729_vm3, %v7084_v7  ;;  %v2403_v32 = vrot.slane %v2401_v55, 4  ;;  %v2415_v15 = vshll.u32 %v5377_v52, 16  ;;  %v2421_v33 = vshll.u32 %v7236_v39, 16  ;;  %v5380_v57 = vld [vmem:[%s6295_s29 + $0xb4] sm:$0xf]  ;;  %v2380_v24 = vor.u32 %v2379_v18, %v7227_v3 }
  0xaa   : > { %5998 = vmatprep.mubr.msk.bf16.mxu0 %vm729_vm3, %v7134_v20  ;;  %v2362_v20 = vsel %vm6339_vm4, %v7231_v12, %v7225_v11  ;;  %v7272_v48 = vrot.slane %v2383_v4, 5  ;;  %v7275_v42 = vld [vmem:[%s6295_s29 + $0xb0] sm:$0x1]  ;;  %v2414_v51 = vrot.slane %v2412_v54, 4  ;;  %v7278_v46 = vld [vmem:[%s6295_s29 + $0xb8] sm:$0xf]  ;;  %v2394_v18 = vor.u32 %v2393_v22, %v2390_v43 }
  0xab   : > { %9145 = vst [vmem:[#allocation14_spill] sm:$0xff] %v7275_v42  ;;  %9146 = vst [vmem:[#allocation15_spill] sm:$0xff] %v7278_v46  ;;  %v2417_v52 = vrot.slane %v2415_v15, 5  ;;  %v7282_v55 = vrot.slane %v2421_v33, 5  ;;  %v2425_v11 = vshrl.u32 %v7236_v39, 16  ;;  %v7285_v12 = vrot.slane %v2370_v59, 4 }
  0xac   : > { %5961 = vmatmul.mubr.msk.bf16.gmra.mxu1 %vm729_vm3, %v6198_v14  ;;  %v2407_v14 = vshll.u32 %v7260_v16, 16  ;;  %v7288_v4 = vld [vmem:[%s6295_s29 + $0xbc] sm:$0x1]  ;;  %v2436_v54 = vshrl.u32 %v5380_v57, 16  ;;  %v2439_v7 = vshll.u32 %v5380_v57, 16  ;;  %v2404_v56 = vor.u32 %v2403_v32, %v7262_v9  ;;  %v6200_v16 = vld [vmem:[%s6295_s29 + $0x48] sm:$0xff]  }
  0xad   : > { %5964 = vmatprep.mubr.msk.bf16.mxu1 %vm729_vm3, %v6199_v19  ;;  %v2427_v45 = vrot.slane %v2425_v11, 4  ;;  %v2431_v19 = vshll.u32 %v7275_v42, 16  ;;  %v2445_v15 = vshll.u32 %v7278_v46, 16  ;;  %v5383_v33 = vld [vmem:[%s6295_s29 + $0xc0] sm:$0xf]  ;;  %v2418_v26 = vor.u32 %v2417_v52, %v2414_v51  ;;  %v6201_v57 = vld [vmem:[%s6295_s29 + $0x54] sm:$0xff]  }
  0xae   : > { %v2438_v39 = vrot.slane %v2436_v54, 4  ;;  %v2441_v34 = vrot.slane %v2439_v7, 5  ;;  %v2449_v59 = vshrl.u32 %v7278_v46, 16  ;;  %v7297_v22 = vld [vmem:[%s6295_s29 + $0xc4] sm:$0xf]  ;;  %v2381_v43 = vrot.slane %v2380_v24, 4 }
  0xaf   : > { %v2409_v32 = vrot.slane %v2407_v14, 5  ;;  %v2428_v11 = vor.u32 %v2427_v45, %v7282_v55  ;;  %v2447_v42 = vrot.slane %v2445_v15, 5  ;;  %v2455_v7 = vshll.u32 %v7288_v4, 16  ;;  %v7309_v45 = vld [vmem:[%s6295_s29 + $0xc8] sm:$0x1] }
  0xb0   : > { %v2442_v51 = vor.u32 %v2441_v34, %v2438_v39  ;;  %v2451_v52 = vrot.slane %v2449_v59, 4  ;;  %v2460_v54 = vshrl.u32 %v5383_v33, 16  ;;  %v2395_v46 = vrot.slane %v2394_v18, 4 }
  0xb1   : > { %5999 = vmatmul.mubr.msk.bf16.gmra.mxu0 %vm729_vm3, %v7142_v37  ;;  %v2405_v38 = vrot.slane %v2404_v56, 4  ;;  %v2463_v2 = vshll.u32 %v5383_v33, 16  ;;  %v2469_v37 = vshll.u32 %v7297_v22, 16  ;;  %v2419_v24 = vrot.slane %v2418_v26, 4 }
  0xb2   : > { %6002 = vmatprep.mubr.msk.bf16.mxu0 %vm729_vm3, %v7144_v29  ;;  %v2433_v14 = vrot.slane %v2431_v19, 5  ;;  %v2452_v36 = vor.u32 %v2451_v52, %v2447_v42  ;;  %v2462_v15 = vrot.slane %v2460_v54, 4  ;;  %v2429_v34 = vrot.slane %v2428_v11, 4 }
  0xb3   : > { %v2465_v29 = vrot.slane %v2463_v2, 5  ;;  %v7312_v39 = vrot.slane %v2469_v37, 5  ;;  %v2473_v56 = vshrl.u32 %v7297_v22, 16  ;;  %v9147_v26 = vsel %vm6339_vm4, %v7198_v17, %v7184_v6 }
  0xb4   : > { %5965 = vmatmul.mubr.msk.bf16.gmra.mxu1 %vm729_vm3, %v6200_v16  ;;  %v9148_v16 = vsel %vm6339_vm4, %v7182_v23, %v7124_v58  ;;  %v2443_v19 = vrot.slane %v2442_v51, 4  ;;  %v2453_v33 = vrot.slane %v2452_v36, 4  ;;  %v2457_v2 = vrot.slane %v2455_v7, 5  ;;  %v6202_v23 = vld [vmem:[%s6295_s29 + $0x60] sm:$0xff]  }
  0xb5   : > { %5968 = vmatprep.mubr.msk.bf16.mxu1 %vm729_vm3, %v6201_v57  ;;  %v5395_v18 = vcombine.low %v9148_v16, %v9147_v26  ;;  %v9149_v59 = vsel %vm6339_vm4, %v7209_v53, %v7211_v13  ;;  %v9150_v6 = vsel %vm6339_vm4, %v7207_v25, %v7140_v60  ;;  %v2466_v57 = vor.u32 %v2465_v29, %v2462_v15  ;;  %v5421_v13 = vld [vmem:[%s6295_s29 + $0x24] sm:$0xe]  ;;  %v5424_v26 = vld [vmem:[%s6295_s29 + $0x48] sm:$0xe] }
  0xb6   : > { %v5396_v17 = vcombine.low %v9150_v6, %v9149_v59  ;;  %v2475_v11 = vrot.slane %v2473_v56, 4  ;;  %v2479_v58 = vshll.u32 %v7309_v45, 16  ;;  %v9151_v36 = vsel %vm6339_vm4, %v7213_v10, %v7163_v63  ;;  %v6203_v63 = vld [vmem:[%s6295_s29 + $0x6c] sm:$0xff]   ;;  %v5425_v6 = vld [vmem:[%s6295_s29 + $0x54] sm:$0xe] }
  0xb7   : > { %v5397_v51 = vcombine.low %v9151_v36, %v2362_v20  ;;  %v2376_v53 = vsel %vm6339_vm4, %v7285_v12, %v7227_v3  ;;  %v2386_v60 = vsel %vm6339_vm4, %v2381_v43, %v7272_v48  ;;  %v2400_v25 = vsel %vm6339_vm4, %v2395_v46, %v7262_v9  ;;  %v7365_v12 = vld [vmem:[%s6295_s29 + $0xc] sm:$0xe] }
  0xb8   : > { %v2410_v10 = vsel %vm6339_vm4, %v2405_v38, %v2409_v32  ;;  %v2424_v3 = vsel %vm6339_vm4, %v2419_v24, %v7282_v55  ;;  %v2434_v20 = vsel %vm6339_vm4, %v2429_v34, %v2433_v14  ;;  %v2476_v48 = vor.u32 %v2475_v11, %v7312_v39  ;;  %v5422_v55 = vld [vmem:[%s6295_s29 + $0x30] sm:$0xe]  ;;  %v5423_v14 = vld [vmem:[%s6295_s29 + $0x3c] sm:$0xe] }
  0xb9   : > { %6003 = vmatmul.mubr.msk.bf16.gmra.mxu0 %vm729_vm3, %v7196_v62  ;;  %v2448_v62 = vsel %vm6339_vm4, %v2443_v19, %v2447_v42  ;;  %v2458_v38 = vsel %vm6339_vm4, %v2453_v33, %v2457_v2  ;;  %v7372_v9 = vrot.slane %v2466_v57, 4  ;;  %v2843_v46 = vrot.slane %v6856_v49, 5  ;;  %v6204_v57 = vld [vmem:[%s6295_s29 + $0x78] sm:$0xff]  }
  0xba   : > { %6006 = vmatprep.mubr.msk.bf16.mxu0 %vm729_vm3, %v5395_v18  ;;  %v7376_v43 = vcombine.low %v2376_v53, %v2386_v60  ;;  %v7378_v32 = vrot.slane %v2476_v48, 4  ;;  %v7380_v52 = vrot.slane %v2479_v58, 5  ;;  %v5437_v7 = vrot.slane %v5421_v13, 9  ;;  %v6205_v53 = vld [vmem:[%s6295_s29 + $0x84] sm:$0xff]   ;;  %v5426_v13 = vld [vmem:[%s6295_s29 + $0x60] sm:$0xe] }
  0xbb   : > { %v7383_v54 = vcombine.low %v2400_v25, %v2410_v10  ;;  %v7385_v42 = vcombine.low %v2424_v3, %v2434_v20  ;;  %v5435_v37 = vrot.slane %v7365_v12, 9  ;;  %v2857_v24 = vrot.slane %v6905_v44, 5  ;;  %v6211_v49 = vld [vmem:[%s6295_s29 + $0x18] sm:$0xff]  }
  0xbc   : > { %5969 = vmatmul.mubr.msk.bf16.gmra.mxu1 %vm729_vm3, %v6202_v23  ;;  %v7391_v15 = vcombine.low %v2448_v62, %v2458_v38  ;;  %v2846_v34 = vrot.slane %v6892_v47, 5  ;;  %v2860_v29 = vrot.slane %v6920_v21, 5  ;;  %v5438_v56 = vrot.slane %v5422_v55, 9  ;;  %v5428_v55 = vld [vmem:[%s6295_s29 + $0x78] sm:$0xe] }
  0xbd   : > { %5972 = vmatprep.mubr.msk.bf16.mxu1 %vm729_vm3, %v6203_v63  ;;  %v2472_v16 = vsel %vm6339_vm4, %v7372_v9, %v7312_v39  ;;  %v7402_v44 = vrot.slane %v2843_v46, 4  ;;  %v7406_v18 = vsel %vm6625_vm7, %v5437_v7, %v2857_v24  ;;  %v2859_v19 = vrot.slane %v2857_v24, 4 }
  0xbe   : > { %v2482_v21 = vsel %vm6339_vm4, %v7378_v32, %v7380_v52  ;;  %v2864_v33 = vrot.slane %v6943_v5, 5  ;;  %v2867_v2 = vrot.slane %v6951_v41, 5  ;;  %v5439_v59 = vrot.slane %v5423_v14, 9  ;;  %v6210_v52 = vld [vmem:[%s6295_s29 + $0xc0] sm:$0xff]  }
  0xbf   : > { %v7418_v11 = vsel %vm6625_vm7, %v2859_v19, %v2860_v29  ;;  %v2871_v58 = vrot.slane %v6960_v61, 5  ;;  %v2874_v23 = vrot.slane %v7012_v50, 5  ;;  %v5440_v36 = vrot.slane %v5424_v26, 9  ;;  %v5429_v19 = vld [vmem:[%s6295_s29 + $0x84] sm:$0xe] }
  0xc0   : > { %v5454_v5 = vcombine.low %v7406_v18, %v7418_v11  ;;  %v7428_v41 = vsel %vm6625_vm7, %v5438_v56, %v2864_v33  ;;  %v2866_v60 = vrot.slane %v2864_v33, 4  ;;  %v2878_v25 = vrot.slane %v6978_v1, 5 }
  0xc1   : > { %6007 = vmatmul.mubr.msk.bf16.gmra.mxu0 %vm729_vm3, %v5396_v17  ;;  %v7435_v61 = vsel %vm6625_vm7, %v5439_v59, %v2871_v58  ;;  %v2873_v50 = vrot.slane %v2871_v58, 4  ;;  %v2881_v17 = vrot.slane %v7026_v8, 5  ;;  %v5441_v63 = vrot.slane %v5425_v6, 9  ;;  %v9152_v59 = vld [vmem:[#allocation4_spill] sm:$0xff] }
  0xc2   : > { %6010 = vmatprep.mubr.msk.bf16.mxu0 %vm729_vm3, %v5397_v51  ;;  %v7440_v10 = vsel %vm6625_vm7, %v2866_v60, %v2867_v2  ;;  %v7444_v3 = vsel %vm6625_vm7, %v5440_v36, %v2878_v25  ;;  %v2880_v1 = vrot.slane %v2878_v25, 4  ;;  %v2885_v20 = vrot.slane %v7021_v40, 5  ;;  %v5427_v51 = vld [vmem:[%s6295_s29 + $0x6c] sm:$0xe]  ;;  %v6206_v58 = vld [vmem:[%s6295_s29 + $0x90] sm:$0xff]  }
  0xc3   : > { %v5455_v48 = vcombine.low %v7428_v41, %v7440_v10  ;;  %v7453_v8 = vsel %vm6625_vm7, %v2873_v50, %v2874_v23  ;;  %v2888_v62 = vrot.slane %v7043_v35, 5  ;;  %v5442_v38 = vrot.slane %v5426_v13, 9  ;;  %v9153_v36 = vld [vmem:[#allocation3_spill] sm:$0xff]  ;;  %v5430_v60 = vld [vmem:[%s6295_s29 + $0x90] sm:$0xe]  ;;  %v9154_v50 = vld [vmem:[#allocation6_spill] sm:$0xff] }
  0xc4   : > { %5973 = vmatmul.mubr.msk.bf16.gmra.mxu1 %vm729_vm3, %v6204_v57  ;;  %v5456_v40 = vcombine.low %v7435_v61, %v7453_v8  ;;  %v7462_v7 = vsel %vm6625_vm7, %v2880_v1, %v2881_v17  ;;  %v7466_v24 = vsel %vm6625_vm7, %v5441_v63, %v2885_v20  ;;  %v2887_v14 = vrot.slane %v2885_v20, 4 }
  0xc5   : > { %5976 = vmatprep.mubr.msk.bf16.mxu1 %vm729_vm3, %v6205_v53  ;;  %v5457_v35 = vcombine.low %v7444_v3, %v7462_v7  ;;  %v2892_v29 = vrot.slane %v7056_v28, 5  ;;  %v2895_v56 = vrot.slane %v7078_v30, 5  ;;  %v5443_v26 = vrot.slane %v5427_v51, 9  ;;  %v9155_v51 = vld [vmem:[#allocation5_spill] sm:$0xff]  ;;  %v5561_v3 = vld [vmem:[%s6295_s29 + $0x48] sm:$0xf] }
  0xc6   : > { %v7475_v33 = vsel %vm6625_vm7, %v2887_v14, %v2888_v62  ;;  %v2899_v2 = vrot.slane %v7075_v27, 5  ;;  %v2902_v6 = vrot.slane %v9152_v59, 5  ;;  %v5444_v57 = vrot.slane %v5428_v55, 9  ;;  %v6207_v27 = vld [vmem:[%s6295_s29 + $0x9c] sm:$0xff]   ;;  %v9163_v55 = vld [vmem:[#allocation15_spill] sm:$0xff] }
  0xc7   : > { %v5458_v23 = vcombine.low %v7466_v24, %v7475_v33  ;;  %v7484_v28 = vsel %vm6625_vm7, %v5442_v38, %v2892_v29  ;;  %v2894_v30 = vrot.slane %v2892_v29, 4  ;;  %v2906_v53 = vrot.slane %v9153_v36, 5  ;;  %v5431_v38 = vld [vmem:[%s6295_s29 + $0x9c] sm:$0xe]  ;;  %v9158_v36 = vld [vmem:[#allocation12_spill] sm:$0xff] }
  0xc8   : > { %v7493_v25 = vsel %vm6625_vm7, %v5443_v26, %v2899_v2  ;;  %v2901_v13 = vrot.slane %v2899_v2, 4  ;;  %v2909_v17 = vrot.slane %v9154_v50, 5  ;;  %v5445_v63 = vrot.slane %v5429_v19, 9  ;;  %v5432_v26 = vld [vmem:[%s6295_s29 + $0xa8] sm:$0xe] }
  0xc9   : > { %6011 = vmatmul.mubr.msk.bf16.gmra.mxu0 %vm729_vm3, %v7376_v43  ;;  %v7500_v1 = vsel %vm6625_vm7, %v2894_v30, %v2895_v56  ;;  %v7504_v43 = vsel %vm6625_vm7, %v5444_v57, %v2906_v53  ;;  %v2908_v20 = vrot.slane %v2906_v53, 4  ;;  %v2913_v62 = vrot.slane %v9155_v51, 5  ;;  %v5434_v57 = vld [vmem:[%s6295_s29 + $0xc0] sm:$0xe]  ;;  %v6208_v19 = vld [vmem:[%s6295_s29 + $0xa8] sm:$0xff]  }
  0xca   : > { %6014 = vmatprep.mubr.msk.bf16.mxu0 %vm729_vm3, %v7383_v54  ;;  %v7512_v14 = vsel %vm6625_vm7, %v2901_v13, %v2902_v6  ;;  %v9156_v54 = vld [vmem:[#allocation8_spill] sm:$0xff]  ;;  %v5446_v56 = vrot.slane %v5430_v60, 9  ;;  %v2923_v53 = vrot.slane %v9158_v36, 5  ;;  %v5447_v60 = vrot.slane %v5431_v38, 9  ;;  %v9161_v38 = vld [vmem:[#allocation13_spill] sm:$0xff] }
  0xcb   : > { %v2916_v29 = vrot.slane %v9156_v54, 5  ;;  %v7521_v2 = vsel %vm6625_vm7, %v2908_v20, %v2909_v17  ;;  %v7525_v59 = vsel %vm6625_vm7, %v5445_v63, %v2913_v62  ;;  %v2915_v6 = vrot.slane %v2913_v62, 4  ;;  %v5433_v13 = vld [vmem:[%s6295_s29 + $0xb4] sm:$0xe]  ;;  %v9159_v17 = vld [vmem:[#allocation10_spill] sm:$0xff] }
  0xcc   : > { %5977 = vmatmul.mubr.msk.bf16.gmra.mxu1 %vm729_vm3, %v6206_v58  ;;  %v9157_v58 = vld [vmem:[#allocation7_spill] sm:$0xff]  ;;  %v2927_v63 = vrot.slane %v9159_v17, 5  ;;  %v9160_v20 = vld [vmem:[#allocation2_spill] sm:$0xff]  ;;  %v5448_v62 = vrot.slane %v5432_v26, 9  ;;  %v2934_v36 = vrot.slane %v9161_v38, 5  ;;  %v5449_v26 = vrot.slane %v5433_v13, 9 }
  0xcd   : > { %5980 = vmatprep.mubr.msk.bf16.mxu1 %vm729_vm3, %v6207_v27  ;;  %v2920_v30 = vrot.slane %v9157_v58, 5  ;;  %v7535_v50 = vsel %vm6625_vm7, %v2915_v6, %v2916_v29  ;;  %v2930_v51 = vrot.slane %v9160_v20, 5  ;;  %v9162_v17 = vld [vmem:[#allocation14_spill] sm:$0xff]  ;;  %v6209_v27 = vld [vmem:[%s6295_s29 + $0xb4] sm:$0xff]   ;;  %v2847_v39 = vsel %vm6625_vm7, %v7402_v44, %v2846_v34  ;;  %v7752_v7 = vld [vmem:[%s6295_s29 + $0x4c] sm:$0xf] }
  0xce   : > { %v7550_v29 = vsel %vm6625_vm7, %v5447_v60, %v2927_v63  ;;  %v2929_v6 = vrot.slane %v2927_v63, 4  ;;  %v2937_v20 = vrot.slane %v9162_v17, 5  ;;  %v2936_v38 = vrot.slane %v2934_v36, 4  ;;  %v6228_v44 = vld [vmem:[%s6295_s29 + $0x20] sm:$0x1] }
  0xcf   : > { %v7543_v54 = vsel %vm6625_vm7, %v5446_v56, %v2920_v30  ;;  %v2922_v58 = vrot.slane %v2920_v30, 4  ;;  %v7562_v30 = vsel %vm6625_vm7, %v5448_v62, %v2934_v36  ;;  %v2941_v60 = vrot.slane %v9163_v55, 5 }
  0xd0   : > { %v5450_v63 = vrot.slane %v5434_v57, 9  ;;  %v7578_v55 = vsel %vm6625_vm7, %v2936_v38, %v2937_v20  ;;  %v2948_v57 = vrot.slane %v7297_v22, 5  ;;  %v2844_v22 = vsel %vm6625_vm7, %v5435_v37, %v2843_v46  ;;  %v6213_v38 = vld [vmem:[%s6295_s29 + $0x30] sm:$0xff]  }
  0xd1   : > { %6015 = vmatmul.mubr.msk.bf16.gmra.mxu0 %vm729_vm3, %v7385_v42  ;;  %v7558_v56 = vsel %vm6625_vm7, %v2922_v58, %v2923_v53  ;;  %v7571_v42 = vsel %vm6625_vm7, %v2929_v6, %v2930_v51  ;;  %v2944_v53 = vrot.slane %v7288_v4, 5  ;;  %v2943_v58 = vrot.slane %v2941_v60, 4 }
  0xd2   : > { %6018 = vmatprep.mubr.msk.bf16.mxu0 %vm729_vm3, %v7391_v15  ;;  %v7582_v15 = vsel %vm6625_vm7, %v5449_v26, %v2941_v60  ;;  %v2951_v51 = vrot.slane %v7309_v45, 5  ;;  %v5420_v45 = vld [vmem:[%s6295_s29 + $0x18] sm:$0xe]  ;;  %v7622_v9 = vsel %vm6625_vm7, %v5450_v63, %v2948_v57  ;;  %v2950_v46 = vrot.slane %v2948_v57, 4  ;;  %v6212_v26 = vld [vmem:[%s6295_s29 + $0x24] sm:$0xff]  }
  0xd3   : > { %v7610_v32 = vsel %vm6625_vm7, %v2943_v58, %v2944_v53  ;;  %v5436_v37 = vrot.slane %v5420_v45, 9  ;;  %v5452_v34 = vcombine.low %v2844_v22, %v2847_v39  ;;  %v9164_v60 = vld [vmem:[#allocation9_spill] sm:$0xff] }
  0xd4   : > { %5981 = vmatmul.mubr.msk.bf16.gmra.mxu1 %vm729_vm3, %v6208_v19  ;;  %v5402_v19 = vcombine.low %v2472_v16, %v2482_v21  ;;  %v7627_v47 = vsel %vm6625_vm7, %v2950_v46, %v2951_v51  ;;  %v2853_v21 = vrot.slane %v6228_v44, 5  ;;  %v4607_v53 = vsel %vm778_vm0, %v9164_v60, 0  ;;  %v5549_v63 = vld [vmem:[%s6295_s29 + $0x18] sm:$0xf]  ;;  %v5550_v57 = vld [vmem:[%s6295_s29 + $0x1c] sm:$0xf] }
  0xd5   : > { %5984 = vmatprep.mubr.msk.bf16.mxu1 %vm729_vm3, %v6209_v27  ;;  %v6227_v27 = vld [vmem:[%s6295_s29 + $0x1c] sm:$0xf]  ;;  %v5552_v51 = vld [vmem:[%s6295_s29 + $0x24] sm:$0xf]  ;;  %v3655_v45 = vshrl.u32 %v5549_v63, 16  ;;  %v3664_v39 = vshll.u32 %v5550_v57, 16 }
  0xd6   : > { %v2850_v36 = vrot.slane %v6227_v27, 5  ;;  %v3658_v27 = vshll.u32 %v5549_v63, 16  ;;  %v3679_v46 = vshrl.u32 %v5552_v51, 16  ;;  %v6215_v44 = vld [vmem:[%s6295_s29 + $0x48] sm:$0xff]   ;;  %v5630_v60 = vld [vmem:[%s6295_s29 + $0x18] sm:$0xe] }
  0xd7   : > { %v7668_v63 = vld [vmem:[%s6295_s29 + $0x2c] sm:$0x1] }
  0xd8   : > { %v2852_v16 = vrot.slane %v2850_v36, 4  ;;  %v2851_v17 = vsel %vm6625_vm7, %v5436_v37, %v2850_v36  ;;  %v7652_v36 = vld [vmem:[%s6295_s29 + $0x28] sm:$0xf]  ;;  %v6214_v37 = vld [vmem:[%s6295_s29 + $0x3c] sm:$0xff]   ;;  %v3681_v18 = vrot.slane %v3679_v46, 4 }
  0xd9   : > { %6019 = vmatmul.mubr.msk.bf16.gmra.mxu0 %vm729_vm3, %v5402_v19  ;;  %v9165_v19 = vld [vmem:[#allocation11_spill] sm:$0xff] }
  0xda   : > { %6058 = vmatprep.mubr.msk.bf16.mxu0 %vm729_vm3, %v6211_v49  ;;  %v2854_v20 = vsel %vm6625_vm7, %v2852_v16, %v2853_v21  ;;  %v4137_v22 = vsel %vm778_vm0, %v9165_v19, 0  ;;  %v3668_v49 = vshrl.u32 %v5550_v57, 16  ;;  %v3692_v16 = vshrl.u32 %v7652_v36, 16  ;;  %v5551_v21 = vld [vmem:[%s6295_s29 + $0x20] sm:$0x1] }
  0xdb   : > { %v5453_v58 = vcombine.low %v2851_v17, %v2854_v20  ;;  %v3657_v17 = vrot.slane %v3655_v45, 4  ;;  %v3660_v20 = vrot.slane %v3658_v27, 5  ;;  %v5555_v19 = vld [vmem:[%s6295_s29 + $0x30] sm:$0xf]  ;;  %v3674_v45 = vshll.u32 %v5551_v21, 16 }
  0xdc   : > { %5985 = vmatmul.mubr.msk.bf16.gmra.mxu1 %vm729_vm3, %v6210_v52  ;;  %v3682_v52 = vshll.u32 %v5552_v51, 16  ;;  %v3694_v51 = vrot.slane %v3692_v16, 4  ;;  %v5646_v27 = vrot.slane %v5630_v60, 9  ;;  %v4401_v46 = vrot.slane %v5551_v21, 5  ;;  %v5631_v16 = vld [vmem:[%s6295_s29 + $0x24] sm:$0xe] }
  0xdd   : > { %6024 = vmatprep.mubr.msk.bf16.mxu1 %vm729_vm3, %v5452_v34  ;;  %v3688_v34 = vshll.u32 %v7652_v36, 16  ;;  %v6216_v21 = vld [vmem:[%s6295_s29 + $0x54] sm:$0xff]   ;;  %v3706_v10 = vshll.u32 %v5555_v19, 16  ;;  %v6217_v60 = vld [vmem:[%s6295_s29 + $0x60] sm:$0xff]  }
  0xde   : > { %v3684_v11 = vrot.slane %v3682_v52, 5  ;;  %v3698_v52 = vshll.u32 %v7668_v63, 16 }
  0xe1   : > { %6059 = vmatmul.mubr.msk.bf16.vlgmr.msra.gmra.mxu0 %vm729_vm3, %v6212_v26  ;;  %v7664_v26 = vrot.slane %v3664_v39, 5 }
  0xe2   : > { %6125 = vmatpush3.bf16.msra.mxu0 %v4607_v53  ;;  %6062 = vmatprep.mubr.msk.bf16.mxu0 %vm729_vm3, %v6213_v38  ;;  %v3670_v38 = vrot.slane %v3668_v49, 4  ;;  %v4398_v53 = vrot.slane %v5550_v57, 5  ;;  %v7678_v57 = vld [vmem:[%s6295_s29 + $0x34] sm:$0xf] }
  0xe4   : > { %6025 = vmatmul.mubr.msk.bf16.vlgmr.msra.gmra.mxu1 %vm729_vm3, %v5453_v58  ;;  %v7673_v58 = vrot.slane %v3688_v34, 5  ;;  %v3671_v39 = vor.u32 %v3670_v38, %v7664_v26  ;;  %v4400_v49 = vrot.slane %v4398_v53, 4  ;;  %v3685_v34 = vor.u32 %v3684_v11, %v3681_v18 }
  0xe5   : > { %6091 = vmatpush3.bf16.msra.mxu1 %v4137_v22  ;;  %6028 = vmatprep.mubr.msk.bf16.mxu1 %vm729_vm3, %v5454_v5  ;;  %v7671_v5 = vpop.f32.mrf.mxu0  ;;  %v3661_v22 = vor.u32 %v3660_v20, %v3657_v17  ;;  %v3703_v17 = vshrl.u32 %v5555_v19, 16  ;;  %v3716_v38 = vshrl.u32 %v7678_v57, 16  ;;  %v7703_v61 = vsel %vm6625_vm7, %v5646_v27, %v4398_v53  ;;  %v5558_v19 = vld [vmem:[%s6295_s29 + $0x3c] sm:$0xf] }
  0xe6   : > { %v3695_v41 = vor.u32 %v3694_v51, %v7673_v58  ;;  %v3672_v8 = vrot.slane %v3671_v39, 4  ;;  %v3700_v11 = vrot.slane %v3698_v52, 5  ;;  %v5647_v51 = vrot.slane %v5631_v16, 9  ;;  %v7717_v39 = vld [vmem:[%s6295_s29 + $0x38] sm:$0x1] }
  0xe7   : > { %v7695_v20 = vpop.f32.mrf.mxu0  ;;  %v3662_v18 = vrot.slane %v3661_v22, 4  ;;  %v3686_v12 = vrot.slane %v3685_v34, 4  ;;  %v4408_v22 = vrot.slane %v7668_v63, 5  ;;  %v3718_v52 = vrot.slane %v3716_v38, 4 }
  0xe8   : > { %v3696_v27 = vrot.slane %v3695_v41, 4  ;;  %v3727_v34 = vshrl.u32 %v5558_v19, 16  ;;  %v3730_v16 = vshll.u32 %v5558_v19, 16  ;;  %v7730_v41 = vld [vmem:[%s6295_s29 + $0x40] sm:$0xf] }
  0xe9   : > { %6063 = vmatmul.mubr.msk.bf16.gmra.mxu0 %vm729_vm3, %v6214_v37  ;;  %v7714_v53 = vpop.f32.mrf.mxu0  ;;  %v3667_v63 = vsel %vm6339_vm4, %v3662_v18, %v7664_v26  ;;  %v3691_v26 = vsel %vm6339_vm4, %v3686_v12, %v7673_v58  ;;  %v5632_v18 = vld [vmem:[%s6295_s29 + $0x30] sm:$0xe]  ;;  %v3736_v24 = vshll.u32 %v7730_v41, 16  ;;  %v3740_v33 = vshrl.u32 %v7730_v41, 16 }
  0xea   : > { %6066 = vmatprep.mubr.msk.bf16.mxu0 %vm729_vm3, %v6215_v44  ;;  %v7686_v37 = vpop.f32.mrf.mxu1  ;;  %v4405_v44 = vrot.slane %v7652_v36, 5  ;;  %v3676_v36 = vrot.slane %v3674_v45, 5  ;;  %v3705_v45 = vrot.slane %v3703_v17, 4  ;;  %v3701_v58 = vsel %vm6339_vm4, %v3696_v27, %v3700_v11 }
  0xeb   : > { %9166 = vst [vmem:[#allocation4_spill] sm:$0xff] %v7686_v37  ;;  %v7759_v12 = vpop.f32.mrf.mxu0  ;;  %v3732_v19 = vrot.slane %v3730_v16, 5  ;;  %v3764_v11 = vshrl.u32 %v7752_v7, 16 }
  0xec   : > { %6029 = vmatmul.mubr.msk.bf16.gmra.mxu1 %vm729_vm3, %v5455_v48  ;;  %v3712_v48 = vshll.u32 %v7678_v57, 16  ;;  %v7710_v6 = vpop.f32.mrf.mxu1  ;;  %v4407_v4 = vrot.slane %v4405_v44, 4  ;;  %v3677_v17 = vsel %vm6339_vm4, %v3672_v8, %v3676_v36  ;;  %v4412_v36 = vrot.slane %v7678_v57, 5  ;;  %v6219_v8 = vld [vmem:[%s6295_s29 + $0x78] sm:$0xff]  }
  0xed   : > { %6032 = vmatprep.mubr.msk.bf16.mxu1 %vm729_vm3, %v5456_v40  ;;  %v7707_v40 = vsel %vm6625_vm7, %v4400_v49, %v4401_v46  ;;  %9167 = vst [vmem:[#allocation3_spill] sm:$0xff] %v7710_v6  ;;  %v3708_v49 = vrot.slane %v3706_v10, 5  ;;  %v7773_v27 = vcombine.low %v3667_v63, %v3677_v17  ;;  %v7775_v57 = vcombine.low %v3691_v26, %v3701_v58  ;;  %v7789_v17 = vld [vmem:[%s6295_s29 + $0x58] sm:$0xf]  ;;  %v7795_v58 = vld [vmem:[%s6295_s29 + $0x44] sm:$0x1] }
  0xee   : > { %v7719_v46 = vrot.slane %v3712_v48, 5  ;;  %v7736_v10 = vpop.f32.mrf.mxu1  ;;  %v7743_v48 = vsel %vm6625_vm7, %v5647_v51, %v4405_v44  ;;  %v7747_v38 = vsel %vm6625_vm7, %v4407_v4, %v4408_v22  ;;  %v3729_v51 = vrot.slane %v3727_v34, 4  ;;  %v5564_v34 = vld [vmem:[%s6295_s29 + $0x54] sm:$0xf] }
  0xef   : > { %9168 = vst [vmem:[#allocation6_spill] sm:$0xff] %v7736_v10  ;;  %v3709_v44 = vor.u32 %v3708_v49, %v3705_v45  ;;  %v3754_v22 = vshll.u32 %v5561_v3, 16  ;;  %v4414_v13 = vrot.slane %v4412_v36, 4  ;;  %v4415_v63 = vrot.slane %v7717_v39, 5  ;;  %v5633_v49 = vld [vmem:[%s6295_s29 + $0x3c] sm:$0xe] }
  0xf0   : > { %v3719_v4 = vor.u32 %v3718_v52, %v7719_v46  ;;  %v7771_v45 = vpop.f32.mrf.mxu1  ;;  %v5648_v52 = vrot.slane %v5632_v18, 9  ;;  %v3733_v18 = vor.u32 %v3732_v19, %v3729_v51  ;;  %v9171_v6 = vcombine.low %v7484_v28, %v7500_v1 }
  0xf1   : > { %6067 = vmatmul.mubr.msk.bf16.gmra.mxu0 %vm729_vm3, %v6216_v21  ;;  %v3760_v21 = vshll.u32 %v7752_v7, 16  ;;  %9169 = vst [vmem:[#allocation5_spill] sm:$0xff] %v7771_v45  ;;  %v3756_v45 = vrot.slane %v3754_v22, 5  ;;  %v3775_v51 = vshrl.u32 %v5564_v34, 16  ;;  %v3778_v19 = vshll.u32 %v5564_v34, 16 }
  0xf2   : > { %6070 = vmatprep.mubr.msk.bf16.mxu0 %vm729_vm3, %v6217_v60  ;;  %v3722_v60 = vshll.u32 %v7717_v39, 16  ;;  %v7792_v26 = vrot.slane %v3719_v4, 4  ;;  %v3766_v39 = vrot.slane %v3764_v11, 4  ;;  %v7830_v22 = vsel %vm6625_vm7, %v4414_v13, %v4415_v63 }
  0xf3   : > { %v7800_v10 = vrot.slane %v3760_v21, 5  ;;  %v9173_v21 = vcombine.low %v7493_v25, %v7512_v14  ;;  %v4419_v25 = vrot.slane %v7730_v41, 5  ;;  %v6221_v14 = vld [vmem:[%s6295_s29 + $0x90] sm:$0xff]   ;;  %v5649_v1 = vrot.slane %v5633_v49, 9  ;;  %v5567_v41 = vld [vmem:[%s6295_s29 + $0x60] sm:$0xf] }
  0xf4   : > { %6033 = vmatmul.mubr.msk.bf16.gmra.mxu1 %vm729_vm3, %v5457_v35  ;;  %v6218_v35 = vld [vmem:[%s6295_s29 + $0x6c] sm:$0xff]   ;;  %v7785_v62 = vrot.slane %v3722_v60, 5  ;;  %v3777_v37 = vrot.slane %v3775_v51, 4 }
  0xf5   : > { %6036 = vmatprep.mubr.msk.bf16.mxu1 %vm729_vm3, %v5458_v23  ;;  %v3751_v23 = vshrl.u32 %v5561_v3, 16  ;;  %v7783_v3 = vrot.slane %v3709_v44, 4  ;;  %v3742_v44 = vrot.slane %v3740_v33, 4  ;;  %v3788_v33 = vshrl.u32 %v7789_v17, 16 }
  0xf6   : > { %v7781_v16 = vpop.f32.mrf.mxu0  ;;  %v3767_v13 = vor.u32 %v3766_v39, %v7800_v10  ;;  %v4426_v39 = vrot.slane %v7752_v7, 5  ;;  %v9177_v7 = vcombine.low %v7504_v43, %v7521_v2  ;;  %v9179_v43 = vcombine.low %v7525_v59, %v7535_v50  ;;  %v6222_v2 = vld [vmem:[%s6295_s29 + $0x9c] sm:$0xff]  }
  0xf7   : > { %9170 = vst [vmem:[#allocation8_spill] sm:$0xff] %v7781_v16  ;;  %v3753_v60 = vrot.slane %v3751_v23, 4  ;;  %v6220_v23 = vld [vmem:[%s6295_s29 + $0x84] sm:$0xff]   ;;  %v7857_v16 = vld [vmem:[%s6295_s29 + $0x5c] sm:$0x1]  ;;  %v4433_v59 = vrot.slane %v7789_v17, 5 }
  0xf8   : > { %v7818_v28 = vpop.f32.mrf.mxu0 }
  0xf9   : > { %6071 = vmatmul.mubr.msk.bf16.gmra.mxu0 %vm729_vm3, %v6218_v35  ;;  %v7797_v35 = vrot.slane %v3736_v24, 5  ;;  %v3784_v24 = vshll.u32 %v7789_v17, 16  ;;  %9174 = vst [vmem:[#allocation12_spill] sm:$0xff] %v7818_v28  ;;  %v3780_v28 = vrot.slane %v3778_v19, 5 }
  0xfa   : > { %6074 = vmatprep.mubr.msk.bf16.mxu0 %vm729_vm3, %v6219_v8  ;;  %v7806_v4 = vpop.f32.mrf.mxu1  ;;  %v7809_v8 = vld [vmem:[%s6295_s29 + $0x50] sm:$0x1]  ;;  %v7850_v49 = vpop.f32.mrf.mxu0 }
  0xfb   : > { %9172 = vst [vmem:[#allocation7_spill] sm:$0xff] %v7806_v4  ;;  %v3743_v34 = vor.u32 %v3742_v44, %v7797_v35  ;;  %v7840_v4 = vrot.slane %v3733_v18, 4  ;;  %v7847_v11 = vrot.slane %v3784_v24, 5  ;;  %v3790_v44 = vrot.slane %v3788_v33, 4  ;;  %9176 = vst [vmem:[#allocation2_spill] sm:$0xff] %v7850_v49 }
  0xfc   : > { %6037 = vmatmul.mubr.msk.bf16.gmra.mxu1 %vm729_vm3, %v9171_v6  ;;  %v7826_v6 = vsel %vm6625_vm7, %v5648_v52, %v4412_v36  ;;  %v3757_v36 = vor.u32 %v3756_v45, %v3753_v60  ;;  %v3770_v52 = vshll.u32 %v7809_v8, 16  ;;  %v7845_v63 = vpop.f32.mrf.mxu1  ;;  %v4421_v18 = vrot.slane %v4419_v25, 4  ;;  %v5634_v24 = vld [vmem:[%s6295_s29 + $0x48] sm:$0xe] }
  0xfd   : > { %6040 = vmatprep.mubr.msk.bf16.mxu1 %vm729_vm3, %v9173_v21  ;;  %v3746_v21 = vshll.u32 %v7795_v58, 16  ;;  %9175 = vst [vmem:[#allocation10_spill] sm:$0xff] %v7845_v63  ;;  %v4422_v60 = vrot.slane %v7795_v58, 5  ;;  %v3744_v51 = vrot.slane %v3743_v34, 4  ;;  %v3799_v33 = vshrl.u32 %v5567_v41, 16 }
  0xfe   : > { %v7863_v63 = vsel %vm6625_vm7, %v5649_v1, %v4419_v25  ;;  %v3758_v45 = vrot.slane %v3757_v36, 4  ;;  %v3768_v49 = vrot.slane %v3767_v13, 4  ;;  %v3772_v58 = vrot.slane %v3770_v52, 5  ;;  %v7878_v36 = vld [vmem:[%s6295_s29 + $0x64] sm:$0xf]  ;;  %v7885_v13 = vpop.f32.mrf.mxu0 }
  0xff   : > { %v3748_v19 = vrot.slane %v3746_v21, 5  ;;  %v3739_v34 = vsel %vm6339_vm4, %v7840_v4, %v7797_v35  ;;  %v3781_v21 = vor.u32 %v3780_v28, %v3777_v37  ;;  %v3791_v1 = vor.u32 %v3790_v44, %v7847_v11  ;;  %9180 = vst [vmem:[#allocation14_spill] sm:$0xff] %v7885_v13  ;;  %v5635_v28 = vld [vmem:[%s6295_s29 + $0x54] sm:$0xe]  ;;  %v6226_v13 = vld [vmem:[%s6295_s29 + $0xcc] sm:$0xff]  }
 0x100   : > { %v3794_v25 = vshll.u32 %v7857_v16, 16  ;;  %v7889_v52 = vsel %vm6625_vm7, %v4421_v18, %v4422_v60  ;;  %v5650_v35 = vrot.slane %v5634_v24, 9  ;;  %v4428_v37 = vrot.slane %v4426_v39, 4 }
 0x101   : > { %6075 = vmatmul.mubr.msk.bf16.gmra.mxu0 %vm729_vm3, %v6220_v23  ;;  %v3802_v23 = vshll.u32 %v5567_v41, 16  ;;  %v4429_v4 = vrot.slane %v7809_v8, 5  ;;  %v6223_v41 = vld [vmem:[%s6295_s29 + $0xa8] sm:$0xff]   ;;  %v3749_v44 = vsel %vm6339_vm4, %v3744_v51, %v3748_v19  ;;  %v3801_v50 = vrot.slane %v3799_v33, 4 }
 0x102   : > { %6078 = vmatprep.mubr.msk.bf16.mxu0 %vm729_vm3, %v6221_v14  ;;  %v7869_v14 = vpop.f32.mrf.mxu1  ;;  %v3773_v18 = vsel %vm6339_vm4, %v3768_v49, %v3772_v58  ;;  %v3808_v60 = vshll.u32 %v7878_v36, 16  ;;  %v3812_v8 = vshrl.u32 %v7878_v36, 16  ;;  %v3792_v51 = vrot.slane %v3791_v1, 4  ;;  %v7907_v33 = vld [vmem:[%s6295_s29 + $0x68] sm:$0x1] }
 0x103   : > { %9178 = vst [vmem:[#allocation13_spill] sm:$0xff] %v7869_v14  ;;  %v3782_v14 = vrot.slane %v3781_v21, 4  ;;  %v3796_v17 = vrot.slane %v3794_v25, 5  ;;  %v5651_v19 = vrot.slane %v5635_v28, 9  ;;  %v9183_v49 = vsel %vm6339_vm4, %v7792_v26, %v7785_v62  ;;  %v5570_v25 = vld [vmem:[%s6295_s29 + $0x6c] sm:$0xf] }
 0x104   : > { %6041 = vmatmul.mubr.msk.bf16.gmra.mxu1 %vm729_vm3, %v9177_v7  ;;  %v3804_v7 = vrot.slane %v3802_v23, 5  ;;  %v7904_v24 = vpop.f32.mrf.mxu1  ;;  %v7928_v21 = vsel %vm6625_vm7, %v5650_v35, %v4426_v39  ;;  %v7932_v1 = vsel %vm6625_vm7, %v4428_v37, %v4429_v4  ;;  %v7935_v62 = vcombine.low %v3739_v34, %v3749_v44  ;;  %v5636_v4 = vld [vmem:[%s6295_s29 + $0x60] sm:$0xe]  ;;  %v5576_v44 = vld [vmem:[%s6295_s29 + $0x84] sm:$0xf] }
 0x105   : > { %6044 = vmatprep.mubr.msk.bf16.mxu1 %vm729_vm3, %v9179_v43  ;;  %v3763_v43 = vsel %vm6339_vm4, %v3758_v45, %v7800_v10  ;;  %9181 = vst [vmem:[#allocation15_spill] sm:$0xff] %v7904_v24  ;;  %v9184_v45 = vsel %vm6339_vm4, %v7783_v3, %v7719_v46  ;;  %v4435_v46 = vrot.slane %v4433_v59, 4  ;;  %v4436_v3 = vrot.slane %v7857_v16, 5 }
 0x106   : > { %v7922_v23 = vcombine.low %v9184_v45, %v9183_v49  ;;  %9185 = vst [vmem:[#allocation11_spill] sm:$0xff] %v7935_v62  ;;  %v3805_v26 = vor.u32 %v3804_v7, %v3801_v50  ;;  %v7942_v28 = vcombine.low %v3763_v43, %v3773_v18  ;;  %v7944_v39 = vrot.slane %v3808_v60, 5 }
 0x107   : > { %v7910_v10 = vpop.f32.mrf.mxu0  ;;  %v7946_v35 = vrot.slane %v3812_v8, 4  ;;  %v3818_v37 = vshll.u32 %v7907_v33, 16  ;;  %v9187_v34 = vcombine.low %v7543_v54, %v7558_v56  ;;  %v3787_v50 = vsel %vm6339_vm4, %v3782_v14, %v7847_v11  ;;  %v5573_v54 = vld [vmem:[%s6295_s29 + $0x78] sm:$0xf] }
 0x108   : > { %9182 = vst [vmem:[#allocation9_spill] sm:$0xff] %v7910_v10  ;;  %9186 = vst [vmem:[#allocation16_spill] sm:$0xff] %v7942_v28  ;;  %v3797_v7 = vsel %vm6339_vm4, %v3792_v51, %v3796_v17  ;;  %v7966_v43 = vsel %vm6625_vm7, %v5651_v19, %v4433_v59  ;;  %v9189_v56 = vcombine.low %v7550_v29, %v7571_v42  ;;  %v3823_v60 = vshrl.u32 %v5570_v25, 16  ;;  %v7978_v51 = vld [vmem:[%s6295_s29 + $0x7c] sm:$0xf]  ;;  %v6225_v59 = vld [vmem:[%s6295_s29 + $0xc0] sm:$0xff]  }
 0x109   : > { %6079 = vmatmul.mubr.msk.bf16.gmra.mxu0 %vm729_vm3, %v6222_v2  ;;  %v7940_v2 = vld [vmem:[%s6295_s29 + $0x70] sm:$0xf]  ;;  %v7973_v18 = vpop.f32.mrf.mxu0  ;;  %v3826_v8 = vshll.u32 %v5570_v25, 16  ;;  %v7983_v17 = vsel %vm6625_vm7, %v4435_v46, %v4436_v3  ;;  %v7985_v29 = vrot.slane %v3805_v26, 4  ;;  %v5652_v42 = vrot.slane %v5636_v4, 9 }
 0x10a   : > { %6082 = vmatprep.mubr.msk.bf16.mxu0 %vm729_vm3, %v6223_v41  ;;  %v6224_v41 = vld [vmem:[%s6295_s29 + $0xb4] sm:$0xff]   ;;  %9190 = vst [vmem:[#allocation18_spill] sm:$0xff] %v7973_v18  ;;  %v3832_v11 = vshll.u32 %v7940_v2, 16  ;;  %v3836_v14 = vshrl.u32 %v7940_v2, 16  ;;  %v4440_v19 = vrot.slane %v7878_v36, 5  ;;  %v7988_v49 = vcombine.low %v3787_v50, %v3797_v7 }
 0x10b   : > { %v3815_v45 = vor.u32 %v7946_v35, %v7944_v39  ;;  %v7992_v25 = vrot.slane %v3818_v37, 5  ;;  %v3847_v46 = vshrl.u32 %v5573_v54, 16  ;;  %v3850_v3 = vshll.u32 %v5573_v54, 16  ;;  %v8004_v4 = vld [vmem:[%s6295_s29 + $0x88] sm:$0xf]  ;;  %v8007_v35 = vpop.f32.mrf.mxu0 }
 0x10c   : > { %6045 = vmatmul.mubr.msk.bf16.gmra.mxu1 %vm729_vm3, %v9187_v34  ;;  %v7954_v16 = vpop.f32.mrf.mxu1  ;;  %9191 = vst [vmem:[#allocation19_spill] sm:$0xff] %v7988_v49  ;;  %v4443_v34 = vrot.slane %v7907_v33, 5  ;;  %v3856_v36 = vshll.u32 %v7978_v51, 16  ;;  %v3860_v26 = vshrl.u32 %v7978_v51, 16  ;;  %9193 = vst [vmem:[#allocation21_spill] sm:$0xff] %v8007_v35  ;;  %v3825_v33 = vrot.slane %v3823_v60, 4 }
 0x10d   : > { %9188 = vst [vmem:[#allocation17_spill] sm:$0xff] %v7954_v16  ;;  %6048 = vmatprep.mubr.msk.bf16.mxu1 %vm729_vm3, %v9189_v56  ;;  %v7996_v56 = vld [vmem:[%s6295_s29 + $0x74] sm:$0x1]  ;;  %v3828_v37 = vrot.slane %v3826_v8, 5  ;;  %v8009_v50 = vrot.slane %v3832_v11, 5  ;;  %v3838_v7 = vrot.slane %v3836_v14, 4  ;;  %v9194_v54 = vcombine.low %v7562_v30, %v7578_v55  ;;  %v8037_v49 = vpop.f32.mrf.mxu0 }
 0x10e   : > { %v7999_v58 = vpop.f32.mrf.mxu1  ;;  %v4442_v16 = vrot.slane %v4440_v19, 4  ;;  %v8022_v60 = vld [vmem:[%s6295_s29 + $0x80] sm:$0x1]  ;;  %v8025_v8 = vld [vmem:[%s6295_s29 + $0x6c] sm:$0xe]  ;;  %v3871_v11 = vshrl.u32 %v5576_v44, 16 }
 0x10f   : > { %9192 = vst [vmem:[#allocation20_spill] sm:$0xff] %v7999_v58  ;;  %v8018_v58 = vsel %vm6625_vm7, %v5652_v42, %v4440_v19  ;;  %v3874_v14 = vshll.u32 %v5576_v44, 16  ;;  %v3884_v24 = vshrl.u32 %v8004_v4, 16  ;;  %v3849_v19 = vrot.slane %v3847_v46, 4  ;;  %9196 = vst [vmem:[#allocation23_spill] sm:$0xff] %v8037_v49 }
 0x110   : > { %v8033_v42 = vpop.f32.mrf.mxu1  ;;  %v3852_v35 = vrot.slane %v3850_v3, 5  ;;  %v8035_v18 = vrot.slane %v3856_v36, 5  ;;  %v3862_v10 = vrot.slane %v3860_v26, 4  ;;  %v9197_v44 = vcombine.low %v7582_v15, %v7610_v32  ;;  %v8056_v32 = vld [vmem:[%s6295_s29 + $0x8c] sm:$0x1] }
 0x111   : > { %6083 = vmatmul.mubr.msk.bf16.gmra.mxu0 %vm729_vm3, %v6224_v41  ;;  %v3842_v41 = vshll.u32 %v7996_v56, 16  ;;  %9195 = vst [vmem:[#allocation22_spill] sm:$0xff] %v8033_v42  ;;  %v3829_v30 = vor.u32 %v3828_v37, %v3825_v33  ;;  %v3839_v55 = vor.u32 %v3838_v7, %v8009_v50  ;;  %v3866_v46 = vshll.u32 %v8022_v60, 16  ;;  %v5638_v33 = vld [vmem:[%s6295_s29 + $0x78] sm:$0xe] }
 0x112   : > { %6086 = vmatprep.mubr.msk.bf16.mxu0 %vm729_vm3, %v6225_v59  ;;  %v3880_v59 = vshll.u32 %v8004_v4, 16  ;;  %v8047_v3 = vrot.slane %v3815_v45, 4  ;;  %v8051_v36 = vsel %vm6625_vm7, %v4442_v16, %v4443_v34  ;;  %v5653_v26 = vrot.slane %v8025_v8, 9  ;;  %v8061_v42 = vpop.f32.mrf.mxu1  ;;  %v5579_v8 = vld [vmem:[%s6295_s29 + $0x90] sm:$0xf] }
 0x113   : > { %v4454_v15 = vrot.slane %v7978_v51, 5  ;;  %v3873_v37 = vrot.slane %v3871_v11, 4  ;;  %v3876_v7 = vrot.slane %v3874_v14, 5  ;;  %9198 = vst [vmem:[#allocation24_spill] sm:$0xff] %v8061_v42  ;;  %v3844_v45 = vrot.slane %v3842_v41, 5 }
 0x114   : > { %6049 = vmatmul.mubr.msk.bf16.gmra.mxu1 %vm729_vm3, %v9194_v54  ;;  %v4447_v54 = vrot.slane %v7940_v2, 5  ;;  %v8059_v2 = vrot.slane %v3880_v59, 5  ;;  %v4450_v49 = vrot.slane %v7996_v56, 5  ;;  %v3853_v16 = vor.u32 %v3852_v35, %v3849_v19  ;;  %v8070_v59 = vld [vmem:[%s6295_s29 + $0x94] sm:$0xf] }
 0x115   : > { %6052 = vmatprep.mubr.msk.bf16.mxu1 %vm729_vm3, %v9197_v44  ;;  %v3886_v44 = vrot.slane %v3884_v24, 4  ;;  %v3863_v34 = vor.u32 %v3862_v10, %v8035_v18  ;;  %v3830_v51 = vrot.slane %v3829_v30, 4  ;;  %v3840_v11 = vrot.slane %v3839_v55, 4 }
 0x116   : > { %v4449_v62 = vrot.slane %v4447_v54, 4  ;;  %v3868_v14 = vrot.slane %v3866_v46, 5  ;;  %v9199_v24 = vcombine.low %v7703_v61, %v7707_v40  ;;  %v5654_v56 = vrot.slane %v5638_v33, 9 }
 0x117   : > { %v4456_v35 = vrot.slane %v4454_v15, 4  ;;  %v4457_v10 = vrot.slane %v8022_v60, 5  ;;  %v3890_v41 = vshll.u32 %v8056_v32, 16  ;;  %v3887_v30 = vor.u32 %v3886_v44, %v8059_v2 }
 0x118   : > { %v3895_v55 = vshrl.u32 %v5579_v8, 16  ;;  %v3898_v46 = vshll.u32 %v5579_v8, 16  ;;  %v9201_v61 = vcombine.low %v7622_v9, %v7627_v47  ;;  %v3854_v40 = vrot.slane %v3853_v16, 4 }
 0x119   : > { %v8066_v28 = vpop.f32.mrf.mxu0  ;;  %6087 = vmatmul.mubr.msk.bf16.gmra.mxu0 %vm729_vm3, %v6226_v13  ;;  %v3877_v13 = vor.u32 %v3876_v7, %v3873_v37  ;;  %v3864_v33 = vrot.slane %v3863_v34, 4  ;;  %v3904_v60 = vshll.u32 %v8070_v59, 16  ;;  %v3821_v37 = vsel %vm6339_vm4, %v8047_v3, %v7992_v25 }
 0x11a   : > { %6126 = vmatprep.mubr.msk.bf16.mxu0 %vm729_vm3, %v9199_v24  ;;  %v3908_v24 = vshrl.u32 %v8070_v59, 16  ;;  %v3835_v9 = vsel %vm6339_vm4, %v3830_v51, %v8009_v50  ;;  %v8102_v47 = vsel %vm6625_vm7, %v5653_v26, %v4447_v54  ;;  %v8106_v7 = vsel %vm6625_vm7, %v4449_v62, %v4450_v49  ;;  %v5639_v54 = vld [vmem:[%s6295_s29 + $0x84] sm:$0xe]  ;;  %v9240_v31 = vld [vmem:[#allocation24_spill] sm:$0xff] }
 0x11b   : > { %v8078_v19 = vpop.f32.mrf.mxu0  ;;  %v8114_v25 = vsel %vm6625_vm7, %v5654_v56, %v4454_v15  ;;  %v8118_v50 = vsel %vm6625_vm7, %v4456_v35, %v4457_v10  ;;  %v3892_v3 = vrot.slane %v3890_v41, 5  ;;  %v3878_v62 = vrot.slane %v3877_v13, 4  ;;  %v8142_v13 = vld [vmem:[%s6295_s29 + $0x98] sm:$0x1] }
 0x11c   : > { %9200 = vst [vmem:[#allocation25_spill] sm:$0xff] %v8078_v19  ;;  %v8081_v42 = vpop.f32.mrf.mxu1  ;;  %6053 = vmatmul.mubr.msk.bf16.gmra.mxu1 %vm729_vm3, %v9201_v61  ;;  %v3888_v49 = vrot.slane %v3887_v30, 4  ;;  %v3897_v16 = vrot.slane %v3895_v55, 4  ;;  %v3900_v34 = vrot.slane %v3898_v46, 5  ;;  %v3859_v15 = vsel %vm6339_vm4, %v3854_v40, %v8035_v18  ;;  %v5582_v30 = vld [vmem:[%s6295_s29 + $0x9c] sm:$0xf] }
 0x11d   : > { %v8089_v19 = vpop.f32.mrf.mxu0  ;;  %6092 = vmatprep.mubr.msk.bf16.mxu1 %vm729_vm3, %v7773_v27  ;;  %v3845_v27 = vsel %vm6339_vm4, %v3840_v11, %v3844_v45  ;;  %v3869_v45 = vsel %vm6339_vm4, %v3864_v33, %v3868_v14  ;;  %v8130_v51 = vrot.slane %v3904_v60, 5  ;;  %v3910_v11 = vrot.slane %v3908_v24, 4  ;;  %v8173_v24 = vld [vmem:[%s6295_s29 + $0xa0] sm:$0xf] }
 0x11e   : > { %v8108_v44 = vpop.f32.mrf.mxu1  ;;  %v9202_v35 = vcombine.low %v7743_v48, %v7747_v38  ;;  %v5668_v10 = vcombine.low %v7966_v43, %v7983_v17  ;;  %v5669_v41 = vcombine.low %v8018_v58, %v8051_v36  ;;  %v5655_v18 = vrot.slane %v5639_v54, 9 }
 0x11f   : > { %v8121_v26 = vpop.f32.mrf.mxu0  ;;  %v4461_v14 = vrot.slane %v8004_v4, 5  ;;  %v9203_v48 = vcombine.low %v7826_v6, %v7830_v22  ;;  %v9204_v38 = vsel %vm6339_vm4, %v7985_v29, %v7944_v39  ;;  %v8158_v61 = vcombine.low %v3835_v9, %v3845_v27  ;;  %v5640_v29 = vld [vmem:[%s6295_s29 + $0x90] sm:$0xe]  ;;  %v9211_v4 = vld [vmem:[#allocation2_spill] sm:$0xff] }
 0x120   : > { %v8123_v8 = vpop.f32.mrf.mxu1  ;;  %v8156_v46 = vcombine.low %v9204_v38, %v3821_v37  ;;  %v8164_v60 = vcombine.low %v3859_v15, %v3869_v45  ;;  %v3883_v6 = vsel %vm6339_vm4, %v3878_v62, %v8059_v2  ;;  %v3893_v22 = vsel %vm6339_vm4, %v3888_v49, %v3892_v3 }
 0x121   : > { %v5924_v56 = vpop.f32.mrf.mxu0  ;;  %6127 = vmatmul.mubr.msk.bf16.vlgmr.msra.gmra.mxu0 %vm729_vm3, %v9202_v35  ;;  %v3901_v39 = vor.u32 %v3900_v34, %v3897_v16  ;;  %v3911_v9 = vor.u32 %v3910_v11, %v8130_v51  ;;  %v3914_v27 = vshll.u32 %v8142_v13, 16  ;;  %v3919_v54 = vshrl.u32 %v5582_v30, 16 }
 0x122   : > { %v8145_v55 = vpop.f32.mrf.mxu1  ;;  %6130 = vmatprep.mubr.msk.bf16.mxu0 %vm729_vm3, %v9203_v48  ;;  %v3922_v15 = vshll.u32 %v5582_v30, 16  ;;  %v8184_v3 = vsel %vm6625_vm7, %v5655_v18, %v4461_v14  ;;  %v4463_v62 = vrot.slane %v4461_v14, 4  ;;  %v4464_v49 = vrot.slane %v8056_v32, 5 }
 0x123   : > { %v1533_v33 = vpop.f32.mrf.mxu0  ;;  %v5656_v16 = vrot.slane %v5640_v29, 9  ;;  %v4468_v34 = vrot.slane %v8070_v59, 5  ;;  %v3928_v11 = vshll.u32 %v8173_v24, 16  ;;  %v3932_v35 = vshrl.u32 %v8173_v24, 16 }
 0x124   : > { %v5890_v37 = vpop.f32.mrf.mxu1  ;;  %6093 = vmatmul.mubr.msk.bf16.vlgmr.msra.gmra.mxu1 %vm729_vm3, %v7775_v57  ;;  %v8193_v48 = vcombine.low %v3883_v6, %v3893_v22  ;;  %v8195_v18 = vrot.slane %v3901_v39, 4  ;;  %v3912_v32 = vrot.slane %v3911_v9, 4  ;;  %v3916_v38 = vrot.slane %v3914_v27, 5  ;;  %v5585_v22 = vld [vmem:[%s6295_s29 + $0xa8] sm:$0xf] }
 0x125   : > { %v1117_v45 = vadd.f32 %v5890_v37, %v7671_v5  ;;  %v5925_v2 = vpop.f32.mrf.mxu0  ;;  %6096 = vmatprep.mubr.msk.bf16.mxu1 %vm729_vm3, %v7922_v23  ;;  %v3921_v29 = vrot.slane %v3919_v54, 4  ;;  %v3924_v59 = vrot.slane %v3922_v15, 5  ;;  %v4471_v6 = vrot.slane %v8142_v13, 5  ;;  %v8221_v27 = vld [vmem:[%s6295_s29 + $0xac] sm:$0xf] }
 0x126   : > { %v1108_v57 = vpop.f32.mrf.mxu1  ;;  %v3934_v9 = vrot.slane %v3932_v35, 4  ;;  %v9208_v35 = vld [vmem:[#allocation8_spill] sm:$0xff] }
 0x127   : > { %v8190_v5 = vadd.f32 %v5924_v56, %v1117_v45  ;;  %v1109_v23 = vadd.f32 %v1108_v57, %v7695_v20  ;;  %v1536_v30 = vpop.f32.mrf.mxu0  ;;  %v9205_v45 = vcombine.low %v7863_v63, %v7889_v52  ;;  %v8206_v20 = vsel %vm6625_vm7, %v4463_v62, %v4464_v49  ;;  %v5641_v62 = vld [vmem:[%s6295_s29 + $0x9c] sm:$0xe] }
 0x128   : > { %v5891_v14 = vpop.f32.mrf.mxu1  ;;  %v4470_v63 = vrot.slane %v4468_v34, 4  ;;  %v8218_v52 = vrot.slane %v3928_v11, 5  ;;  %v4475_v49 = vrot.slane %v8173_v24, 5  ;;  %v3952_v24 = vshll.u32 %v8221_v27, 16 }
 0x129   : > { %v8197_v37 = vadd.f32 %v1533_v33, %v1109_v23  ;;  %v1120_v40 = vadd.f32 %v5891_v14, %v7714_v53  ;;  %v5928_v56 = vpop.f32.mrf.mxu0  ;;  %6131 = vmatmul.mubr.msk.bf16.gmra.mxu0 %vm729_vm3, %v9205_v45  ;;  %v9206_v33 = vcombine.low %v7928_v21, %v7932_v1  ;;  %v8216_v53 = vsel %vm6625_vm7, %v5656_v16, %v4468_v34  ;;  %v5584_v1 = vld [vmem:[%s6295_s29 + $0xa4] sm:$0x1]  ;;  %v9207_v16 = vld [vmem:[#allocation11_spill] sm:$0xff] }
 0x12a   : > { %v1111_v39 = vpop.f32.mrf.mxu1  ;;  %v3907_v21 = vsel %vm6339_vm4, %v8195_v18, %v8130_v51  ;;  %v3943_v34 = vshrl.u32 %v5585_v22, 16  ;;  %v9209_v51 = vld [vmem:[#allocation16_spill] sm:$0xff]  ;;  %v3956_v18 = vshrl.u32 %v8221_v27, 16 }
 0x12b   : > { %6134 = vmatprep.mubr.msk.bf16.mxu0 %vm729_vm3, %v9206_v33  ;;  %v8223_v54 = vadd.f32 %v5925_v2, %v1120_v40  ;;  %v1112_v13 = vadd.f32 %v1111_v39, %v7759_v12  ;;  %v1549_v15 = vpop.f32.mrf.mxu0  ;;  %v3917_v40 = vsel %vm6339_vm4, %v3912_v32, %v3916_v38  ;;  %v3925_v2 = vor.u32 %v3924_v59, %v3921_v29  ;;  %v9210_v59 = vld [vmem:[#allocation12_spill] sm:$0xff] }
 0x12c   : > { %v5894_v57 = vpop.f32.mrf.mxu1  ;;  %6097 = vmatmul.mubr.msk.bf16.gmra.mxu1 %vm729_vm3, %v9207_v16  ;;  %v3946_v12 = vshll.u32 %v5585_v22, 16  ;;  %v8246_v39 = vsel %vm6625_vm7, %v4470_v63, %v4471_v6  ;;  %v3935_v32 = vor.u32 %v3934_v9, %v8218_v52  ;;  %v3938_v38 = vshll.u32 %v5584_v1, 16 }
 0x12d   : > { %v8237_v11 = vadd.f32 %v1536_v30, %v1112_v13  ;;  %v1133_v23 = vadd.f32 %v5894_v57, %v9208_v35  ;;  %v5929_v14 = vpop.f32.mrf.mxu0  ;;  %6100 = vmatprep.mubr.msk.bf16.mxu1 %vm729_vm3, %v9209_v51  ;;  %v5657_v30 = vrot.slane %v5641_v62, 9  ;;  %v4477_v13 = vrot.slane %v4475_v49, 4 }
 0x12e   : > { %v1124_v45 = vpop.f32.mrf.mxu1  ;;  %v4478_v57 = vrot.slane %v5584_v1, 5  ;;  %v8254_v51 = vrot.slane %v3925_v2, 4  ;;  %v3945_v6 = vrot.slane %v3943_v34, 4  ;;  %v3948_v63 = vrot.slane %v3946_v12, 5  ;;  %v8264_v1 = vld [vmem:[%s6295_s29 + $0xb0] sm:$0x1] }
 0x12f   : > { %v8249_v29 = vadd.f32 %v5928_v56, %v1133_v23  ;;  %v1125_v22 = vadd.f32 %v1124_v45, %v9210_v59  ;;  %v1552_v33 = vpop.f32.mrf.mxu0  ;;  %v8266_v23 = vrot.slane %v3952_v24, 5  ;;  %v3958_v2 = vrot.slane %v3956_v18, 4  ;;  %v9212_v12 = vld [vmem:[#allocation14_spill] sm:$0xff] }
 0x130   : > { %v5895_v16 = vpop.f32.mrf.mxu1  ;;  %v8276_v43 = vrot.slane %v3935_v32, 4  ;;  %v8278_v17 = vrot.slane %v3938_v38, 5  ;;  %v8286_v58 = vsel %vm6625_vm7, %v5657_v30, %v4475_v49  ;;  %v8290_v36 = vsel %vm6625_vm7, %v4477_v13, %v4478_v57  ;;  %v8302_v30 = vld [vmem:[%s6295_s29 + $0xb8] sm:$0xf] }
 0x131   : > { %v8256_v9 = vadd.f32 %v1549_v15, %v1125_v22  ;;  %v1136_v62 = vadd.f32 %v5895_v16, %v9211_v4  ;;  %v5932_v56 = vpop.f32.mrf.mxu0  ;;  %6135 = vmatmul.mubr.msk.bf16.gmra.mxu0 %vm729_vm3, %v5668_v10  ;;  %v8272_v15 = vcombine.low %v3907_v21, %v3917_v40  ;;  %v5642_v10 = vld [vmem:[%s6295_s29 + $0xa8] sm:$0xe]  ;;  %v3949_v32 = vor.u32 %v3948_v63, %v3945_v6  ;;  %v9214_v22 = vld [vmem:[#allocation9_spill] sm:$0xff] }
 0x132   : > { %v1127_v45 = vpop.f32.mrf.mxu1  ;;  %6138 = vmatprep.mubr.msk.bf16.mxu0 %vm729_vm3, %v5669_v41  ;;  %v5588_v41 = vld [vmem:[%s6295_s29 + $0xb4] sm:$0xf]  ;;  %v9213_v40 = vld [vmem:[#allocation19_spill] sm:$0xff]  ;;  %v3962_v38 = vshll.u32 %v8264_v1, 16  ;;  %v4482_v49 = vrot.slane %v8221_v27, 5  ;;  %v3959_v16 = vor.u32 %v3958_v2, %v8266_v23  ;;  %v3941_v27 = vsel %vm6339_vm4, %v8276_v43, %v8278_v17 }
 0x133   : > { %v8281_v34 = vadd.f32 %v5929_v14, %v1136_v62  ;;  %v1128_v24 = vadd.f32 %v1127_v45, %v9212_v12  ;;  %v1565_v18 = vpop.f32.mrf.mxu0  ;;  %v5658_v62 = vrot.slane %v5642_v10, 9  ;;  %v3967_v6 = vshrl.u32 %v5588_v41, 16 }
 0x134   : > { %v5898_v21 = vpop.f32.mrf.mxu1  ;;  %6101 = vmatmul.mubr.msk.bf16.gmra.mxu1 %vm729_vm3, %v9213_v40  ;;  %v3970_v63 = vshll.u32 %v5588_v41, 16  ;;  %v3976_v2 = vshll.u32 %v8302_v30, 16  ;;  %v3980_v10 = vshrl.u32 %v8302_v30, 16  ;;  %v5591_v40 = vld [vmem:[%s6295_s29 + $0xc0] sm:$0xf]  ;;  %v3950_v4 = vrot.slane %v3949_v32, 4 }
 0x135   : > { %v8304_v59 = vadd.f32 %v1552_v33, %v1128_v24  ;;  %v1149_v13 = vadd.f32 %v5898_v21, %v9214_v22  ;;  %v5933_v57 = vpop.f32.mrf.mxu0  ;;  %6104 = vmatprep.mubr.msk.bf16.mxu1 %vm729_vm3, %v8156_v46  ;;  %v9216_v24 = vld [vmem:[#allocation18_spill] sm:$0xff]  ;;  %v3964_v43 = vrot.slane %v3962_v38, 5  ;;  %v4484_v17 = vrot.slane %v4482_v49, 4 }
 0x136   : > { %v1140_v45 = vpop.f32.mrf.mxu1  ;;  %v4485_v33 = vrot.slane %v8264_v1, 5  ;;  %v8332_v14 = vsel %vm6625_vm7, %v5658_v62, %v4482_v49  ;;  %v8335_v32 = vld [vmem:[%s6295_s29 + $0xc4] sm:$0xf]  ;;  %v9220_v1 = vcombine.low %v8114_v25, %v8118_v50  ;;  %v8347_v62 = vrot.slane %v3976_v2, 5 }
 0x137   : > { %v8316_v12 = vadd.f32 %v5932_v56, %v1149_v13  ;;  %v1141_v21 = vadd.f32 %v1140_v45, %v9216_v24  ;;  %v1568_v46 = vpop.f32.mrf.mxu0  ;;  %v9218_v56 = vld [vmem:[#allocation21_spill] sm:$0xff]  ;;  %v9219_v45 = vcombine.low %v8102_v47, %v8106_v7  ;;  %v3960_v24 = vrot.slane %v3959_v16, 4  ;;  %v9221_v16 = vld [vmem:[#allocation23_spill] sm:$0xff] }
 0x138   : > { %v5899_v22 = vpop.f32.mrf.mxu1  ;;  %v3991_v47 = vshrl.u32 %v5591_v40, 16  ;;  %v3994_v7 = vshll.u32 %v5591_v40, 16  ;;  %v3955_v25 = vsel %vm6339_vm4, %v3950_v4, %v8266_v23  ;;  %v8356_v50 = vsel %vm6625_vm7, %v4484_v17, %v4485_v33  ;;  %v5643_v40 = vld [vmem:[%s6295_s29 + $0xb4] sm:$0xe] }
 0x139   : > { %9215 = vst [vmem:[#allocation11_spill] sm:$0xff] %v8316_v12  ;;  %v8323_v35 = vadd.f32 %v1565_v18, %v1141_v21  ;;  %v1152_v41 = vadd.f32 %v5899_v22, %v9218_v56  ;;  %v5936_v13 = vpop.f32.mrf.mxu0  ;;  %6139 = vmatmul.mubr.msk.bf16.gmra.mxu0 %vm729_vm3, %v9219_v45  ;;  %v8342_v18 = vld [vmem:[%s6295_s29 + $0xbc] sm:$0x1]  ;;  %v3969_v21 = vrot.slane %v3967_v6, 4  ;;  %v3972_v22 = vrot.slane %v3970_v63, 5 }
 0x13a   : > { %v1143_v38 = vpop.f32.mrf.mxu1  ;;  %6142 = vmatprep.mubr.msk.bf16.mxu0 %vm729_vm3, %v9220_v1  ;;  %v4004_v6 = vshrl.u32 %v8335_v32, 16  ;;  %v3986_v23 = vshll.u32 %v8342_v18, 16  ;;  %v4489_v17 = vrot.slane %v8302_v30, 5  ;;  %v9222_v1 = vld [vmem:[#allocation25_spill] sm:$0xff] }
 0x13b   : > { %9217 = vst [vmem:[#allocation8_spill] sm:$0xff] %v8323_v35  ;;  %v8344_v56 = vadd.f32 %v5933_v57, %v1152_v41  ;;  %v1144_v45 = vadd.f32 %v1143_v38, %v9221_v16  ;;  %v1581_v49 = vpop.f32.mrf.mxu0  ;;  %v3982_v35 = vrot.slane %v3980_v10, 4  ;;  %v4000_v57 = vshll.u32 %v8335_v32, 16 }
 0x13c   : > { %v5902_v12 = vpop.f32.mrf.mxu1  ;;  %6105 = vmatmul.mubr.msk.bf16.gmra.mxu1 %vm729_vm3, %v8158_v61  ;;  %v3965_v61 = vsel %vm6339_vm4, %v3960_v24, %v3964_v43  ;;  %v3973_v33 = vor.u32 %v3972_v22, %v3969_v21  ;;  %v3993_v41 = vrot.slane %v3991_v47, 4  ;;  %v3996_v38 = vrot.slane %v3994_v7, 5 }
 0x13d   : > { %v8360_v63 = vadd.f32 %v1568_v46, %v1144_v45  ;;  %v1165_v2 = vadd.f32 %v5902_v12, %v8066_v28  ;;  %v5937_v10 = vpop.f32.mrf.mxu0  ;;  %6108 = vmatprep.mubr.msk.bf16.mxu1 %vm729_vm3, %v8164_v60  ;;  %v9223_v60 = vsel %vm6339_vm4, %v8254_v51, %v8218_v52  ;;  %v3983_v24 = vor.u32 %v3982_v35, %v8347_v62 }
 0x13e   : > { %v1156_v4 = vpop.f32.mrf.mxu1  ;;  %v8378_v43 = vcombine.low %v9223_v60, %v3941_v27  ;;  %v8381_v30 = vcombine.low %v3955_v25, %v3965_v61  ;;  %v8385_v22 = vrot.slane %v4000_v57, 5  ;;  %v4006_v47 = vrot.slane %v4004_v6, 4  ;;  %v5593_v27 = vld [vmem:[%s6295_s29 + $0xc8] sm:$0x1] }
 0x13f   : > { %v8370_v46 = vadd.f32 %v5936_v13, %v1165_v2  ;;  %v1157_v28 = vadd.f32 %v1156_v4, %v9222_v1  ;;  %v1584_v12 = vpop.f32.mrf.mxu0  ;;  %v5675_v13 = vcombine.low %v8332_v14, %v8356_v50  ;;  %v9224_v52 = vcombine.low %v8184_v3, %v8206_v20  ;;  %v5594_v14 = vld [vmem:[%s6295_s29 + $0xcc] sm:$0xf]  ;;  %v8406_v20 = vld [vmem:[%s6295_s29 + $0xd0] sm:$0xf]  ;;  %v5644_v4 = vld [vmem:[%s6295_s29 + $0xc0] sm:$0xe] }
 0x140   : > { %v5903_v21 = vpop.f32.mrf.mxu1  ;;  %v8394_v35 = vrot.slane %v3986_v23, 5  ;;  %v5659_v51 = vrot.slane %v5643_v40, 9  ;;  %v9225_v50 = vcombine.low %v8216_v53, %v8246_v39  ;;  %v4492_v57 = vrot.slane %v8342_v18, 5 }
 0x141   : > { %v8387_v7 = vadd.f32 %v1581_v49, %v1157_v28  ;;  %v1168_v16 = vadd.f32 %v5903_v21, %v8089_v19  ;;  %v5940_v45 = vpop.f32.mrf.mxu0  ;;  %6143 = vmatmul.mubr.msk.bf16.gmra.mxu0 %vm729_vm3, %v9224_v52  ;;  %v8402_v49 = vrot.slane %v3973_v33, 4  ;;  %v4491_v19 = vrot.slane %v4489_v17, 4 }
 0x142   : > { %v1159_v25 = vpop.f32.mrf.mxu1  ;;  %6146 = vmatprep.mubr.msk.bf16.mxu0 %vm729_vm3, %v9225_v50  ;;  %v3997_v3 = vor.u32 %v3996_v38, %v3993_v41  ;;  %v8411_v23 = vrot.slane %v3983_v24, 4  ;;  %v4496_v53 = vrot.slane %v8335_v32, 5  ;;  %v4007_v33 = vor.u32 %v4006_v47, %v8385_v22 }
 0x143   : > { %v8408_v6 = vadd.f32 %v5937_v10, %v1168_v16  ;;  %v1160_v2 = vadd.f32 %v1159_v25, %v8121_v26  ;;  %v1597_v61 = vpop.f32.mrf.mxu0  ;;  %v4010_v18 = vshll.u32 %v5593_v27, 16  ;;  %v4015_v40 = vshrl.u32 %v5594_v14, 16  ;;  %v9228_v10 = vld [vmem:[#allocation4_spill] sm:$0xff]  ;;  %v9229_v16 = vld [vmem:[#allocation3_spill] sm:$0xff] }
 0x144   : > { %v5906_v39 = vpop.f32.mrf.mxu1  ;;  %6109 = vmatmul.mubr.msk.bf16.gmra.mxu1 %vm729_vm3, %v8193_v48  ;;  %v4018_v41 = vshll.u32 %v5594_v14, 16  ;;  %v4024_v28 = vshll.u32 %v8406_v20, 16  ;;  %v4028_v32 = vshrl.u32 %v8406_v20, 16  ;;  %v4490_v48 = vsel %vm6625_vm7, %v5659_v51, %v4489_v17  ;;  %v9230_v17 = vld [vmem:[#allocation6_spill] sm:$0xff] }
 0x145   : > { %9226 = vst [vmem:[#allocation16_spill] sm:$0xff] %v8408_v6  ;;  %v8418_v38 = vadd.f32 %v1584_v12, %v1160_v2  ;;  %v1181_v1 = vadd.f32 %v5906_v39, %v9228_v10  ;;  %v5941_v26 = vpop.f32.mrf.mxu0  ;;  %6112 = vmatprep.mubr.msk.bf16.mxu1 %vm729_vm3, %v8272_v15  ;;  %v4493_v24 = vsel %vm6625_vm7, %v4491_v19, %v4492_v57  ;;  %v3998_v21 = vrot.slane %v3997_v3, 4 }
 0x146   : > { %v1172_v60 = vpop.f32.mrf.mxu1  ;;  %v5660_v12 = vrot.slane %v5644_v4, 9  ;;  %v4498_v25 = vrot.slane %v4496_v53, 4  ;;  %v4499_v15 = vrot.slane %v5593_v27, 5  ;;  %v4008_v2 = vrot.slane %v4007_v33, 4  ;;  %v5596_v33 = vld [vmem:[%s6295_s29 + $0xd4] sm:$0x1] }
 0x147   : > { %9227 = vst [vmem:[#allocation12_spill] sm:$0xff] %v8418_v38  ;;  %v8429_v47 = vadd.f32 %v5940_v45, %v1181_v1  ;;  %v1173_v52 = vadd.f32 %v1172_v60, %v9229_v16  ;;  %v1600_v14 = vpop.f32.mrf.mxu0  ;;  %v4012_v39 = vrot.slane %v4010_v18, 5  ;;  %v4017_v10 = vrot.slane %v4015_v40, 4  ;;  %v9232_v18 = vld [vmem:[#allocation5_spill] sm:$0xff] }
 0x148   : > { %v5907_v50 = vpop.f32.mrf.mxu1  ;;  %v4020_v38 = vrot.slane %v4018_v41, 5  ;;  %v9231_v45 = vcombine.low %v8286_v58, %v8290_v36  ;;  %v8439_v57 = vrot.slane %v4024_v28, 5  ;;  %v4030_v27 = vrot.slane %v4028_v32, 4 }
 0x149   : > { %v8432_v6 = vadd.f32 %v1597_v61, %v1173_v52  ;;  %v1184_v51 = vadd.f32 %v5907_v50, %v9230_v17  ;;  %v5944_v19 = vpop.f32.mrf.mxu0  ;;  %v3979_v61 = vsel %vm6339_vm4, %v8402_v49, %v8347_v62  ;;  %v3989_v4 = vsel %vm6339_vm4, %v8411_v23, %v8394_v35  ;;  %v5645_v62 = vld [vmem:[%s6295_s29 + $0xcc] sm:$0xe] }
 0x14a   : > { %6147 = vmatmul.mubr.msk.bf16.gmra.mxu0 %vm729_vm3, %v9231_v45  ;;  %v1175_v3 = vpop.f32.mrf.mxu1  ;;  %v4503_v58 = vrot.slane %v8406_v20, 5  ;;  %v4500_v1 = vsel %vm6625_vm7, %v4498_v25, %v4499_v15  ;;  %v5676_v35 = vcombine.low %v4490_v48, %v4493_v24  ;;  %v4003_v20 = vsel %vm6339_vm4, %v3998_v21, %v8385_v22  ;;  %v9234_v25 = vld [vmem:[#allocation10_spill] sm:$0xff] }
 0x14b   : > { %6150 = vmatprep.mubr.msk.bf16.mxu0 %vm729_vm3, %v5675_v13  ;;  %v8452_v36 = vadd.f32 %v5941_v26, %v1184_v51  ;;  %v1176_v40 = vadd.f32 %v1175_v3, %v9232_v18  ;;  %v1613_v41 = vpop.f32.mrf.mxu0  ;;  %v4497_v13 = vsel %vm6625_vm7, %v5660_v12, %v4496_v53  ;;  %v4013_v23 = vsel %vm6339_vm4, %v4008_v2, %v4012_v39  ;;  %v9233_v53 = vld [vmem:[#allocation7_spill] sm:$0xff] }
 0x14c   : > { %v5910_v49 = vpop.f32.mrf.mxu1  ;;  %6113 = vmatmul.mubr.msk.bf16.gmra.mxu1 %vm729_vm3, %v8378_v43  ;;  %v4021_v26 = vor.u32 %v4020_v38, %v4017_v10  ;;  %v4031_v12 = vor.u32 %v4030_v27, %v8439_v57  ;;  %v4034_v43 = vshll.u32 %v5596_v33, 16  ;;  %v5677_v24 = vcombine.low %v4497_v13, %v4500_v1 }
 0x14d   : > { %v8467_v28 = vadd.f32 %v1600_v14, %v1176_v40  ;;  %v1197_v32 = vadd.f32 %v5910_v49, %v9233_v53  ;;  %v5945_v60 = vpop.f32.mrf.mxu0  ;;  %6116 = vmatprep.mubr.msk.bf16.mxu1 %vm729_vm3, %v8381_v30  ;;  %v5661_v16 = vrot.slane %v5645_v62, 9  ;;  %v4505_v52 = vrot.slane %v4503_v58, 4  ;;  %v9235_v30 = vld [vmem:[#allocation13_spill] sm:$0xff] }
 0x14e   : > { %v1188_v48 = vpop.f32.mrf.mxu1  ;;  %v4506_v22 = vrot.slane %v5596_v33, 5  ;;  %v5611_v50 = vcombine.low %v3979_v61, %v3989_v4  ;;  %v5612_v2 = vcombine.low %v4003_v20, %v4013_v23  ;;  %v4022_v39 = vrot.slane %v4021_v26, 4  ;;  %v9236_v33 = vld [vmem:[#allocation15_spill] sm:$0xff]  ;;  %v9237_v62 = vld [vmem:[#allocation17_spill] sm:$0xff]  ;;  %v9238_v26 = vld [vmem:[#allocation20_spill] sm:$0xff] }
 0x14f   : > { %v8473_v21 = vadd.f32 %v5944_v19, %v1197_v32  ;;  %v1189_v38 = vadd.f32 %v1188_v48, %v9234_v25  ;;  %v1616_v14 = vpop.f32.mrf.mxu0  ;;  %v4032_v45 = vrot.slane %v4031_v12, 4  ;;  %v4036_v27 = vrot.slane %v4034_v43, 5  ;;  %v9239_v43 = vld [vmem:[#allocation22_spill] sm:$0xff] }
 0x150   : > { %v5911_v15 = vpop.f32.mrf.mxu1  ;;  %v4504_v19 = vsel %vm6625_vm7, %v5661_v16, %v4503_v58  ;;  %v4507_v61 = vsel %vm6625_vm7, %v4505_v52, %v4506_v22  ;;  %v4027_v13 = vsel %vm6339_vm4, %v4022_v39, %v8439_v57 }
 0x151   : > { %v8476_v10 = vadd.f32 %v1613_v41, %v1189_v38  ;;  %v1200_v17 = vadd.f32 %v5911_v15, %v9235_v30  ;;  %v5948_v51 = vpop.f32.mrf.mxu0  ;;  %v4037_v0 = vsel %vm6339_vm4, %v4032_v45, %v4036_v27 }
 0x152   : > { %6151 = vmatmul.mubr.msk.bf16.gmra.mxu0 %vm729_vm3, %v5676_v35  ;;  %v1191_v3 = vpop.f32.mrf.mxu1  ;;  %v5678_v35 = vcombine.low %v4504_v19, %v4507_v61  ;;  %v5613_v12 = vcombine.low %v4027_v13, %v4037_v0 }
 0x153   : > { %6154 = vmatprep.mubr.msk.bf16.mxu0 %vm729_vm3, %v5677_v24  ;;  %v8485_v4 = vadd.f32 %v5945_v60, %v1200_v17  ;;  %v1192_v18 = vadd.f32 %v1191_v3, %v9236_v33  ;;  %v1629_v40 = vpop.f32.mrf.mxu0 }
 0x154   : > { %v5914_v41 = vpop.f32.mrf.mxu1  ;;  %6117 = vmatmul.mubr.msk.bf16.gmra.mxu1 %vm729_vm3, %v5611_v50 }
 0x155   : > { %v8492_v1 = vadd.f32 %v1616_v14, %v1192_v18  ;;  %v1213_v49 = vadd.f32 %v5914_v41, %v9237_v62  ;;  %v5949_v58 = vpop.f32.mrf.mxu0  ;;  %6120 = vmatprep.mubr.msk.bf16.mxu1 %vm729_vm3, %v5612_v2 }
 0x156   : > { %v1204_v20 = vpop.f32.mrf.mxu1 }
 0x157   : > { %v8498_v23 = vadd.f32 %v5948_v51, %v1213_v49  ;;  %v1205_v53 = vadd.f32 %v1204_v20, %v9238_v26  ;;  %v1632_v32 = vpop.f32.mrf.mxu0 }
 0x158   : > { %v5915_v60 = vpop.f32.mrf.mxu1 }
 0x159   : > { %v8501_v57 = vadd.f32 %v1629_v40, %v1205_v53  ;;  %v1216_v48 = vadd.f32 %v5915_v60, %v9239_v43  ;;  %v5952_v24 = vpop.f32.mrf.mxu0 }
 0x15a   : > { %6155 = vmatmul.mubr.msk.bf16.gmra.mxu0 %vm729_vm3, %v5678_v35  ;;  %v1207_v16 = vpop.f32.mrf.mxu1 }
 0x15b   : > { %v8505_v52 = vadd.f32 %v5949_v58, %v1216_v48  ;;  %v1208_v22 = vadd.f32 %v1207_v16, %v9240_v31  ;;  %v1645_v25 = vpop.f32.mrf.mxu0 }
 0x15c   : > { %v5918_v38 = vpop.f32.mrf.mxu1  ;;  %6121 = vmatmul.mubr.msk.bf16.gmra.mxu1 %vm729_vm3, %v5613_v12 }
 0x15d   : > { %v8509_v14 = vadd.f32 %v1632_v32, %v1208_v22  ;;  %v1229_v15 = vadd.f32 %v5918_v38, %v8081_v42  ;;  %v5953_v50 = vpop.f32.mrf.mxu0 }
 0x15e   : > { %v1220_v2 = vpop.f32.mrf.mxu1 }
 0x15f   : > { %v8512_v39 = vadd.f32 %v5952_v24, %v1229_v15  ;;  %v1221_v30 = vadd.f32 %v1220_v2, %v8108_v44  ;;  %v1648_v17 = vpop.f32.mrf.mxu0 }
 0x160   : > { %v5919_v51 = vpop.f32.mrf.mxu1 }
 0x161   : > { %v8515_v45 = vadd.f32 %v1645_v25, %v1221_v30  ;;  %v1232_v27 = vadd.f32 %v5919_v51, %v8123_v8  ;;  %v5992_v3 = vpop.f32.mrf.mxu0  ;;  %v9241_v30 = vld [vmem:[#allocation11_spill] sm:$0xff] }
 0x162   : > { %v1223_v19 = vpop.f32.mrf.mxu1 }
 0x163   : > { %v8518_v61 = vadd.f32 %v5953_v50, %v1232_v27  ;;  %v1224_v33 = vadd.f32 %v1223_v19, %v8145_v55  ;;  %v2618_v18 = vpop.f32.mrf.mxu0 }
 0x164   : > { %v5958_v42 = vpop.f32.mrf.mxu1 }
 0x165   : > { %v8521_v40 = vadd.f32 %v1648_v17, %v1224_v33  ;;  %v2021_v41 = vadd.f32 %v5958_v42, %v8190_v5  ;;  %v5993_v13 = vpop.f32.mrf.mxu0 }
 0x166   : > { %v1892_v44 = vpop.f32.mrf.mxu1 }
 0x167   : > { %v8524_v62 = vadd.f32 %v5992_v3, %v2021_v41  ;;  %v2019_v49 = vadd.f32 %v1892_v44, %v8197_v37  ;;  %v2621_v58 = vpop.f32.mrf.mxu0  ;;  %v9242_v3 = vld [vmem:[#allocation8_spill] sm:$0xff] }
 0x168   : > { %v5959_v8 = vpop.f32.mrf.mxu1 }
 0x169   : > { %v8527_v0 = vadd.f32 %v2618_v18, %v2019_v49  ;;  %v2022_v35 = vadd.f32 %v5959_v8, %v8223_v54  ;;  %v5996_v20 = vpop.f32.mrf.mxu0 }
 0x16a   : > { %v1895_v55 = vpop.f32.mrf.mxu1 }
 0x16b   : > { %v8530_v26 = vadd.f32 %v5993_v13, %v2022_v35  ;;  %v2020_v53 = vadd.f32 %v1895_v55, %v8237_v11  ;;  %v2634_v32 = vpop.f32.mrf.mxu0 }
 0x16c   : > { %v5962_v5 = vpop.f32.mrf.mxu1 }
 0x16d   : > { %v8533_v60 = vadd.f32 %v2621_v58, %v2020_v53  ;;  %v2025_v12 = vadd.f32 %v5962_v5, %v8249_v29  ;;  %v5997_v43 = vpop.f32.mrf.mxu0 }
 0x16e   : > { %v1908_v37 = vpop.f32.mrf.mxu1 }
 0x16f   : > { %v8536_v48 = vadd.f32 %v5996_v20, %v2025_v12  ;;  %v2023_v24 = vadd.f32 %v1908_v37, %v8256_v9  ;;  %v2637_v16 = vpop.f32.mrf.mxu0 }
 0x170   : > { %v5963_v54 = vpop.f32.mrf.mxu1 }
 0x171   : > { %v8539_v31 = vadd.f32 %v2634_v32, %v2023_v24  ;;  %v2026_v22 = vadd.f32 %v5963_v54, %v8281_v34  ;;  %v6000_v25 = vpop.f32.mrf.mxu0  ;;  %v9244_v54 = vld [vmem:[#allocation12_spill] sm:$0xff] }
 0x172   : > { %v1911_v11 = vpop.f32.mrf.mxu1 }
 0x173   : > { %v8542_v38 = vadd.f32 %v5997_v43, %v2026_v22  ;;  %v2024_v15 = vadd.f32 %v1911_v11, %v8304_v59  ;;  %v2650_v50 = vpop.f32.mrf.mxu0  ;;  %v9243_v43 = vld [vmem:[#allocation16_spill] sm:$0xff] }
 0x174   : > { %v5966_v29 = vpop.f32.mrf.mxu1 }
 0x175   : > { %v8545_v2 = vadd.f32 %v2637_v16, %v2024_v15  ;;  %v2029_v17 = vadd.f32 %v5966_v29, %v9241_v30  ;;  %v6001_v51 = vpop.f32.mrf.mxu0 }
 0x176   : > { %v1924_v9 = vpop.f32.mrf.mxu1 }
 0x177   : > { %v8548_v27 = vadd.f32 %v6000_v25, %v2029_v17  ;;  %v2027_v19 = vadd.f32 %v1924_v9, %v9242_v3  ;;  %v2653_v33 = vpop.f32.mrf.mxu0 }
 0x178   : > { %v5967_v34 = vpop.f32.mrf.mxu1 }
 0x179   : > { %v8551_v18 = vadd.f32 %v2650_v50, %v2027_v19  ;;  %v2030_v42 = vadd.f32 %v5967_v34, %v8344_v56  ;;  %v6004_v41 = vpop.f32.mrf.mxu0 }
 0x17a   : > { %v1927_v59 = vpop.f32.mrf.mxu1 }
 0x17b   : > { %v8554_v13 = vadd.f32 %v6001_v51, %v2030_v42  ;;  %v2028_v44 = vadd.f32 %v1927_v59, %v8360_v63  ;;  %v2666_v49 = vpop.f32.mrf.mxu0 }
 0x17c   : > { %v5970_v58 = vpop.f32.mrf.mxu1 }
 0x17d   : > { %v8557_v8 = vadd.f32 %v2653_v33, %v2028_v44  ;;  %v2033_v35 = vadd.f32 %v5970_v58, %v8370_v46  ;;  %v6005_v20 = vpop.f32.mrf.mxu0 }
 0x17e   : > { %v1940_v55 = vpop.f32.mrf.mxu1 }
 0x17f   : > { %v8560_v53 = vadd.f32 %v6004_v41, %v2033_v35  ;;  %v2031_v32 = vadd.f32 %v1940_v55, %v8387_v7  ;;  %v2669_v5 = vpop.f32.mrf.mxu0 }
 0x180   : > { %v5971_v56 = vpop.f32.mrf.mxu1 }
 0x181   : > { %v8563_v12 = vadd.f32 %v2666_v49, %v2031_v32  ;;  %v2034_v37 = vadd.f32 %v5971_v56, %v9243_v43  ;;  %v6008_v24 = vpop.f32.mrf.mxu0 }
 0x182   : > { %v1943_v63 = vpop.f32.mrf.mxu1 }
 0x183   : > { %v8566_v16 = vadd.f32 %v6005_v20, %v2034_v37  ;;  %v2032_v22 = vadd.f32 %v1943_v63, %v9244_v54  ;;  %v2682_v25 = vpop.f32.mrf.mxu0 }
 0x184   : > { %v5974_v46 = vpop.f32.mrf.mxu1 }
 0x185   : > { %v8569_v11 = vadd.f32 %v2669_v5, %v2032_v22  ;;  %v2037_v15 = vadd.f32 %v5974_v46, %v8429_v47  ;;  %v6009_v50 = vpop.f32.mrf.mxu0 }
 0x186   : > { %v1956_v7 = vpop.f32.mrf.mxu1 }
 0x187   : > { %v8572_v29 = vadd.f32 %v6008_v24, %v2037_v15  ;;  %v2035_v30 = vadd.f32 %v1956_v7, %v8432_v6  ;;  %v2685_v17 = vpop.f32.mrf.mxu0 }
 0x188   : > { %v5975_v51 = vpop.f32.mrf.mxu1 }
 0x189   : > { %v8575_v9 = vadd.f32 %v2682_v25, %v2035_v30  ;;  %v2038_v3 = vadd.f32 %v5975_v51, %v8452_v36  ;;  %v6012_v19 = vpop.f32.mrf.mxu0 }
 0x18a   : > { %v1959_v33 = vpop.f32.mrf.mxu1 }
 0x18b   : > { %v8578_v34 = vadd.f32 %v6009_v50, %v2038_v3  ;;  %v2036_v42 = vadd.f32 %v1959_v33, %v8467_v28  ;;  %v2698_v41 = vpop.f32.mrf.mxu0 }
 0x18c   : > { %v5978_v47 = vpop.f32.mrf.mxu1 }
 0x18d   : > { %v8581_v59 = vadd.f32 %v2685_v17, %v2036_v42  ;;  %v2041_v44 = vadd.f32 %v5978_v47, %v8473_v21  ;;  %v6013_v49 = vpop.f32.mrf.mxu0 }
 0x18e   : > { %v1972_v6 = vpop.f32.mrf.mxu1 }
 0x18f   : > { %9245 = vst [vmem:[#allocation2_spill] sm:$0xff] %v8581_v59  ;;  %v8584_v58 = vadd.f32 %v6012_v19, %v2041_v44  ;;  %v2039_v35 = vadd.f32 %v1972_v6, %v8476_v10  ;;  %v2701_v20 = vpop.f32.mrf.mxu0 }
 0x190   : > { %v5979_v36 = vpop.f32.mrf.mxu1 }
 0x191   : > { %9246 = vst [vmem:[#allocation14_spill] sm:$0xff] %v8584_v58  ;;  %v8587_v55 = vadd.f32 %v2698_v41, %v2039_v35  ;;  %v2042_v32 = vadd.f32 %v5979_v36, %v8485_v4  ;;  %v6016_v5 = vpop.f32.mrf.mxu0 }
 0x192   : > { %v1975_v28 = vpop.f32.mrf.mxu1 }
 0x193   : > { %9247 = vst [vmem:[#allocation19_spill] sm:$0xff] %v8587_v55  ;;  %v8590_v56 = vadd.f32 %v6013_v49, %v2042_v32  ;;  %v2040_v43 = vadd.f32 %v1975_v28, %v8492_v1  ;;  %v2714_v37 = vpop.f32.mrf.mxu0 }
 0x194   : > { %v5982_v21 = vpop.f32.mrf.mxu1 }
 0x195   : > { %9248 = vst [vmem:[#allocation9_spill] sm:$0xff] %v8590_v56  ;;  %v8593_v24 = vadd.f32 %v2701_v20, %v2040_v43  ;;  %v2045_v63 = vadd.f32 %v5982_v21, %v8498_v23  ;;  %v6017_v54 = vpop.f32.mrf.mxu0 }
 0x196   : > { %v1988_v10 = vpop.f32.mrf.mxu1 }
 0x197   : > { %9249 = vst [vmem:[#allocation18_spill] sm:$0xff] %v8593_v24  ;;  %v8596_v22 = vadd.f32 %v6016_v5, %v2045_v63  ;;  %v2043_v25 = vadd.f32 %v1988_v10, %v8501_v57  ;;  %v2717_v46 = vpop.f32.mrf.mxu0 }
 0x198   : > { %v5983_v4 = vpop.f32.mrf.mxu1 }
 0x199   : > { %9250 = vst [vmem:[#allocation21_spill] sm:$0xff] %v8596_v22  ;;  %v8599_v15 = vadd.f32 %v2714_v37, %v2043_v25  ;;  %v2046_v50 = vadd.f32 %v5983_v4, %v8505_v52  ;;  %v6020_v7 = vpop.f32.mrf.mxu0 }
 0x19a   : > { %v1991_v1 = vpop.f32.mrf.mxu1 }
 0x19b   : > { %9251 = vst [vmem:[#allocation23_spill] sm:$0xff] %v8599_v15  ;;  %v8602_v30 = vadd.f32 %v6017_v54, %v2046_v50  ;;  %v2044_v17 = vadd.f32 %v1991_v1, %v8509_v14  ;;  %v2730_v51 = vpop.f32.mrf.mxu0 }
 0x19c   : > { %v5986_v23 = vpop.f32.mrf.mxu1 }
 0x19d   : > { %9252 = vst [vmem:[#allocation25_spill] sm:$0xff] %v8602_v30  ;;  %v8605_v3 = vadd.f32 %v2717_v46, %v2044_v17  ;;  %v2049_v19 = vadd.f32 %v5986_v23, %v8512_v39  ;;  %v6021_v33 = vpop.f32.mrf.mxu0 }
 0x19e   : > { %v2004_v57 = vpop.f32.mrf.mxu1 }
 0x19f   : > { %9253 = vst [vmem:[#allocation4_spill] sm:$0xff] %v8605_v3  ;;  %v8608_v42 = vadd.f32 %v6020_v7, %v2049_v19  ;;  %v2047_v41 = vadd.f32 %v2004_v57, %v8515_v45  ;;  %v2733_v47 = vpop.f32.mrf.mxu0 }
 0x1a0   : > { %v5987_v52 = vpop.f32.mrf.mxu1 }
 0x1a1   : > { %9254 = vst [vmem:[#allocation3_spill] sm:$0xff] %v8608_v42  ;;  %v8611_v44 = vadd.f32 %v2730_v51, %v2047_v41  ;;  %v2050_v49 = vadd.f32 %v5987_v52, %v8518_v61  ;;  %v8614_v6 = vpop.f32.mrf.mxu0 }
 0x1a2   : > { %v2007_v14 = vpop.f32.mrf.mxu1 }
 0x1a3   : > { %9255 = vst [vmem:[#allocation6_spill] sm:$0xff] %v8611_v44  ;;  %v8616_v35 = vadd.f32 %v6021_v33, %v2050_v49  ;;  %v2048_v20 = vadd.f32 %v2007_v14, %v8521_v40  ;;  %v8619_v39 = vpop.f32.mrf.mxu0 }
 0x1a4   : > { %v6026_v36 = vpop.f32.mrf.mxu1 }
 0x1a5   : > { %9256 = vst [vmem:[#allocation5_spill] sm:$0xff] %v8616_v35  ;;  %v8621_v32 = vadd.f32 %v2733_v47, %v2048_v20  ;;  %v8623_v5 = vpop.f32.mrf.mxu0 }
 0x1a6   : > { %v3088_v45 = vpop.f32.mrf.mxu1 }
 0x1a7   : > { %9257 = vst [vmem:[#allocation7_spill] sm:$0xff] %v8621_v32  ;;  %v8625_v28 = vpop.f32.mrf.mxu0 }
 0x1a8   : > { %v6027_v43 = vpop.f32.mrf.mxu1 }
 0x1a9   : > { %v8627_v37 = vpop.f32.mrf.mxu0 }
 0x1aa   : > { %v3091_v61 = vpop.f32.mrf.mxu1 }
 0x1ab   : > { %v8629_v21 = vpop.f32.mrf.mxu0 }
 0x1ac   : > { %v6030_v63 = vpop.f32.mrf.mxu1 }
 0x1ad   : > { %v8631_v54 = vpop.f32.mrf.mxu0 }
 0x1ae   : > { %v3104_v40 = vpop.f32.mrf.mxu1 }
 0x1af   : > { %v8633_v10 = vpop.f32.mrf.mxu0 }
 0x1b0   : > { %v6031_v25 = vpop.f32.mrf.mxu1 }
 0x1b1   : > { %v8635_v46 = vpop.f32.mrf.mxu0 }
 0x1b2   : > { %v3107_v4 = vpop.f32.mrf.mxu1 }
 0x1b3   : > { %v8637_v50 = vpop.f32.mrf.mxu0 }
 0x1b4   : > { %v6034_v7 = vpop.f32.mrf.mxu1 }
 0x1b5   : > { %v8639_v1 = vpop.f32.mrf.mxu0 }
 0x1b6   : > { %v3120_v17 = vpop.f32.mrf.mxu1 }
 0x1b7   : > { %v8641_v51 = vpop.f32.mrf.mxu0 }
 0x1b8   : > { %v6035_v23 = vpop.f32.mrf.mxu1 }
 0x1b9   : > { %v8643_v19 = vpop.f32.mrf.mxu0 }
 0x1ba   : > { %v3123_v33 = vpop.f32.mrf.mxu1 }
 0x1bb   : > { %v8645_v57 = vpop.f32.mrf.mxu0 }
 0x1bc   : > { %v6038_v41 = vpop.f32.mrf.mxu1 }
 0x1bd   : > { %v8647_v47 = vpop.f32.mrf.mxu0 }
 0x1be   : > { %v3136_v52 = vpop.f32.mrf.mxu1 }
 0x1bf   : > { %v8649_v49 = vpop.f32.mrf.mxu0 }
 0x1c0   : > { %9258 = vst [vmem:[#allocation10_spill] sm:$0xff] %v8649_v49  ;;  %v6039_v14 = vpop.f32.mrf.mxu1 }
 0x1c1   : > { %v8651_v20 = vpop.f32.mrf.mxu0 }
 0x1c2   : > { %9259 = vst [vmem:[#allocation13_spill] sm:$0xff] %v8651_v20  ;;  %v3139_v32 = vpop.f32.mrf.mxu1 }
 0x1c3   : > { %v8653_v35 = vpop.f32.mrf.mxu0 }
 0x1c4   : > { %9260 = vst [vmem:[#allocation15_spill] sm:$0xff] %v8653_v35  ;;  %v6042_v44 = vpop.f32.mrf.mxu1 }
 0x1c5   : > { %v8655_v42 = vpop.f32.mrf.mxu0 }
 0x1c6   : > { %9261 = vst [vmem:[#allocation17_spill] sm:$0xff] %v8655_v42  ;;  %v3152_v3 = vpop.f32.mrf.mxu1 }
 0x1c7   : > { %v8657_v30 = vpop.f32.mrf.mxu0 }
 0x1c8   : > { %9262 = vst [vmem:[#allocation20_spill] sm:$0xff] %v8657_v30  ;;  %v6043_v15 = vpop.f32.mrf.mxu1 }
 0x1c9   : > { %v8659_v22 = vpop.f32.mrf.mxu0 }
 0x1ca   : > { %9263 = vst [vmem:[#allocation22_spill] sm:$0xff] %v8659_v22  ;;  %v8661_v24 = vpop.f32.mrf.mxu1 }
 0x1cb   : > { %9264 = vst [vmem:[#allocation24_spill] sm:$0xff] %v8661_v24  ;;  %v8663_v56 = vpop.f32.mrf.mxu0 }
 0x1cc   : > { %9265 = vst [vmem:[#allocation11_spill] sm:$0xff] %v8663_v56  ;;  %v8665_v55 = vpop.f32.mrf.mxu1 }
 0x1cd   : > { %9266 = vst [vmem:[#allocation8_spill] sm:$0xff] %v8665_v55  ;;  %v8667_v58 = vpop.f32.mrf.mxu0 }
 0x1ce   : > { %9267 = vst [vmem:[#allocation16_spill] sm:$0xff] %v8667_v58  ;;  %v8669_v59 = vpop.f32.mrf.mxu1 }
 0x1cf   : > { %9268 = vst [vmem:[#allocation12_spill] sm:$0xff] %v8669_v59  ;;  %v8671_v35 = vpop.f32.mrf.mxu0 }
 0x1d0   : > { %9269 = vst [vmem:[#allocation26_spill] sm:$0xff] %v8671_v35  ;;  %v8673_v20 = vpop.f32.mrf.mxu1  ;;  %v3217_v35 = vadd.f32 %v6026_v36, %v8524_v62  ;;  %v3221_v62 = vadd.f32 %v6030_v63, %v8536_v48  ;;  %v3224_v48 = vadd.f32 %v3123_v33, %v8557_v8  ;;  %v9280_v63 = vld [vmem:[#allocation10_spill] sm:$0xff] }
 0x1d1   : > { %9270 = vst [vmem:[#allocation27_spill] sm:$0xff] %v8673_v20  ;;  %v8675_v42 = vpop.f32.mrf.mxu0 }
 0x1d2   : > { %9271 = vst [vmem:[#allocation28_spill] sm:$0xff] %v8675_v42  ;;  %v8677_v30 = vpop.f32.mrf.mxu1  ;;  %v3215_v42 = vadd.f32 %v3088_v45, %v8527_v0  ;;  %v3222_v45 = vadd.f32 %v6031_v25, %v8542_v38  ;;  %v3230_v38 = vadd.f32 %v6039_v14, %v8566_v16  ;;  %v3234_v16 = vadd.f32 %v6043_v15, %v8578_v34  ;;  %v9282_v25 = vld [vmem:[#allocation15_spill] sm:$0xff] }
 0x1d3   : > { %9272 = vst [vmem:[#allocation29_spill] sm:$0xff] %v8677_v30  ;;  %v8679_v49 = vpop.f32.mrf.mxu0 }
 0x1d4   : > { %9273 = vst [vmem:[#allocation30_spill] sm:$0xff] %v8679_v49  ;;  %v8681_v22 = vpop.f32.mrf.mxu1  ;;  %v3218_v49 = vadd.f32 %v6027_v43, %v8530_v26  ;;  %v3219_v26 = vadd.f32 %v3104_v40, %v8539_v31  ;;  %v3220_v43 = vadd.f32 %v3107_v4, %v8545_v2  ;;  %v3227_v31 = vadd.f32 %v3136_v52, %v8563_v12  ;;  %v9281_v40 = vld [vmem:[#allocation13_spill] sm:$0xff]  ;;  %v9283_v4 = vld [vmem:[#allocation2_spill] sm:$0xff]  ;;  %v9288_v52 = vld [vmem:[#allocation19_spill] sm:$0xff] }
 0x1d5   : > { %9274 = vst [vmem:[#allocation31_spill] sm:$0xff] %v8681_v22  ;;  %v8683_v24 = vpop.f32.mrf.mxu0  ;;  %v8761_v34 = vadd.f32 %v8647_v47, %v3230_v38 }
 0x1d6   : > { %9275 = vst [vmem:[#allocation32_spill] sm:$0xff] %v8683_v24  ;;  %v8685_v56 = vpop.f32.mrf.mxu1  ;;  %v3216_v24 = vadd.f32 %v3091_v61, %v8533_v60  ;;  %v3577_v0 = vadd.f32 %v8623_v5, %v3218_v49  ;;  %v3225_v60 = vadd.f32 %v6034_v7, %v8548_v27  ;;  %v3229_v5 = vadd.f32 %v6038_v41, %v8560_v53  ;;  %v9289_v49 = vld [vmem:[#allocation12_spill] sm:$0xff] }
 0x1d7   : > { %9276 = vst [vmem:[#allocation33_spill] sm:$0xff] %v8685_v56  ;;  %v8687_v55 = vpop.f32.mrf.mxu0  ;;  %v8725_v61 = vadd.f32 %v8627_v37, %v3221_v62  ;;  %v3228_v27 = vadd.f32 %v3139_v32, %v8569_v11  ;;  %v8736_v53 = vadd.f32 %v8631_v54, %v3222_v45  ;;  %v8739_v12 = vadd.f32 %v8633_v10, %v3220_v43  ;;  %v9290_v62 = vld [vmem:[#allocation9_spill] sm:$0xff]  ;;  %v9292_v43 = vld [vmem:[#allocation18_spill] sm:$0xff] }
 0x1d8   : > { %9277 = vst [vmem:[#allocation34_spill] sm:$0xff] %v8687_v55  ;;  %v8689_v58 = vpop.f32.mrf.mxu1  ;;  %v3576_v55 = vadd.f32 %v8614_v6, %v3217_v35  ;;  %v3223_v6 = vadd.f32 %v3120_v17, %v8551_v18  ;;  %v3233_v18 = vadd.f32 %v6042_v44, %v8572_v29  ;;  %v8743_v11 = vadd.f32 %v8635_v46, %v3225_v60  ;;  %v9285_v17 = vld [vmem:[#allocation17_spill] sm:$0xff] }
 0x1d9   : > { %v8691_v59 = vpop.f32.mrf.mxu0  ;;  %v8755_v32 = vadd.f32 %v8643_v19, %v3229_v5  ;;  %v8758_v37 = vadd.f32 %v8645_v57, %v3227_v31  ;;  %v8765_v54 = vadd.f32 %v9280_v63, %v3228_v27  ;;  %v9287_v19 = vld [vmem:[#allocation8_spill] sm:$0xff]  ;;  %v3235_v14 = vadd.f32 %v9289_v49, %v9288_v52  ;;  %v9296_v31 = vld [vmem:[#allocation23_spill] sm:$0xff]  ;;  %v9299_v63 = vld [vmem:[#allocation25_spill] sm:$0xff] }
 0x1da   : > { %9278 = vst [vmem:[#allocation35_spill] sm:$0xff] %v8691_v59  ;;  %v8695_v20 = vpop.f32.mrf.mxu1  ;;  %v3574_v59 = vadd.f32 %v8619_v39, %v3215_v42  ;;  %v3226_v42 = vadd.f32 %v6035_v23, %v8554_v13  ;;  %v3575_v39 = vadd.f32 %v8625_v28, %v3216_v24  ;;  %v3231_v13 = vadd.f32 %v3152_v3, %v8575_v9  ;;  %v9286_v23 = vld [vmem:[#allocation14_spill] sm:$0xff]  ;;  %v9293_v60 = vld [vmem:[#allocation29_spill] sm:$0xff] }
 0x1db   : > { %v8698_v30 = vpop.f32.mrf.mxu0  ;;  %v8733_v24 = vadd.f32 %v8629_v21, %v3219_v26  ;;  %v8746_v29 = vadd.f32 %v8637_v50, %v3223_v6  ;;  %v8752_v3 = vadd.f32 %v8641_v51, %v3224_v48  ;;  %v8768_v10 = vadd.f32 %v9281_v40, %v3233_v18  ;;  %v9284_v50 = vld [vmem:[#allocation24_spill] sm:$0xff]  ;;  %v9291_v26 = vld [vmem:[#allocation27_spill] sm:$0xff] }
 0x1dc   : > { %9279 = vst [vmem:[#allocation36_spill] sm:$0xff] %v8698_v30  ;;  %v8700_v22 = vpop.f32.mrf.mxu1  ;;  %v8749_v9 = vadd.f32 %v8639_v1, %v3226_v42  ;;  %v8771_v46 = vadd.f32 %v9282_v25, %v3231_v13  ;;  %v3232_v7 = vadd.f32 %v9284_v50, %v9283_v4  ;;  %v8778_v1 = vld [vmem:[%s9051_s2] ss:$0 sm:$0xff]  ;;  %v8781_v51 = vadd.f32 %v9285_v17, %v3234_v16  ;;  %v9294_v42 = vld [vmem:[#allocation21_spill] sm:$0xff]  ;;  %v9295_v48 = vld [vmem:[#allocation31_spill] sm:$0xff] }
 0x1dd   : > { %v8703_v56 = vpop.f32.mrf.mxu0  ;;  %v3237_v33 = vadd.f32 %v9287_v19, %v9286_v23  ;;  %v3238_v45 = vadd.f32 %v9291_v26, %v9290_v62  ;;  %v3236_v6 = vadd.f32 %v9293_v60, %v9292_v43  ;;  %v3241_v5 = vadd.f32 %v9295_v48, %v9294_v42  ;;  %v9300_v25 = vld [vmem:[#allocation4_spill] sm:$0xff]  ;;  %v9301_v50 = vld [vmem:[#allocation3_spill] sm:$0xff]  ;;  %v9302_v23 = vld [vmem:[#allocation6_spill] sm:$0xff] }
 0x1de   : > { %v8708_v36 = vpop.f32.mrf.mxu1  ;;  %v9297_v38 = vld [vmem:[#allocation33_spill] sm:$0xff]  ;;  %v3242_v40 = vadd.f32 %v8689_v58, %v9299_v63  ;;  %v3240_v4 = vadd.f32 %v8695_v20, %v9300_v25  ;;  %v9304_v58 = vld [vmem:[#allocation22_spill] sm:$0xff]  ;;  %v9305_v20 = vld [vmem:[#allocation11_spill] sm:$0xff] }
 0x1df   : > { %v8714_v30 = vpop.f32.mrf.mxu0  ;;  %v3243_v19 = vadd.f32 %v8708_v36, %v9302_v23  ;;  %v8817_v52 = vadd.f32 %v9304_v58, %v3237_v33  ;;  %v8820_v49 = vadd.f32 %v9305_v20, %v3235_v14  ;;  %v9307_v43 = vld [vmem:[#allocation26_spill] sm:$0xff]  ;;  %v9308_v60 = vld [vmem:[#allocation28_spill] sm:$0xff] }
 0x1e0   : > { %v6055_v35 = vpop.f32.mrf.mxu1  ;;  %v8829_v42 = vadd.f32 %v9308_v60, %v3241_v5 }
 0x1e1   : > { %v6128_v2 = vpop.f32.mrf.mxu0  ;;  %v9312_v5 = vld [vmem:[#allocation35_spill] sm:$0xff] }
 0x1e2   : > { %v8730_v8 = vpop.f32.mrf.mxu1 }
 0x1e3   : > { %v4643_v28 = vpop.f32.mrf.mxu0 }
 0x1e4   : > { %v6094_v44 = vpop.f32.mrf.mxu1 }
 0x1e5   : > { %v4302_v15 = vadd.f32 %v6094_v44, %v3576_v55  ;;  %v6129_v21 = vpop.f32.mrf.mxu0  ;;  %v9298_v44 = vld [vmem:[#allocation20_spill] sm:$0xff] }
 0x1e6   : > { %v4173_v55 = vpop.f32.mrf.mxu1 }
 0x1e7   : > { %v4772_v57 = vadd.f32 %v6128_v2, %v4302_v15  ;;  %v4300_v41 = vadd.f32 %v4173_v55, %v3574_v59  ;;  %v4646_v47 = vpop.f32.mrf.mxu0  ;;  %v3239_v2 = vadd.f32 %v9297_v38, %v9296_v31  ;;  %v8802_v15 = vadd.f32 %v9298_v44, %v3232_v7 }
 0x1e8   : > { %v6095_v59 = vpop.f32.mrf.mxu1  ;;  %v3245_v55 = vadd.f32 %v8700_v22, %v9301_v50  ;;  %v9306_v22 = vld [vmem:[#allocation16_spill] sm:$0xff] }
 0x1e9   : > { %v4811_v27 = vadd.f32 %v8778_v1, %v4772_v57  ;;  %v4770_v18 = vadd.f32 %v4643_v28, %v4300_v41  ;;  %v4303_v13 = vadd.f32 %v6095_v59, %v3577_v0  ;;  %v6132_v16 = vpop.f32.mrf.mxu0  ;;  %v9303_v28 = vld [vmem:[#allocation5_spill] sm:$0xff]  ;;  %v8823_v62 = vadd.f32 %v9306_v22, %v3238_v45  ;;  %v9310_v59 = vld [vmem:[#allocation32_spill] sm:$0xff] }
 0x1ea   : > { %v4176_v17 = vpop.f32.mrf.mxu1  ;;  %v3246_v0 = vadd.f32 %v6055_v35, %v9303_v28  ;;  %v8826_v35 = vadd.f32 %v9307_v43, %v3236_v6  ;;  %v8838_v45 = vadd.f32 %v9310_v59, %v3242_v40 }
 0x1eb   : > { %4843 = vst.msk [vmem:[%s8796_s24 + $0x10] sm:$0xff] %vm729_vm3, %v4811_v27  ;;  %v4809_v7 = vadd.f32 %v8778_v1, %v4770_v18  ;;  %v4773_v57 = vadd.f32 %v6129_v21, %v4303_v13  ;;  %v4659_v41 = vpop.f32.mrf.mxu0  ;;  %v4301_v26 = vadd.f32 %v4176_v17, %v3575_v39  ;;  %v9309_v21 = vld [vmem:[#allocation30_spill] sm:$0xff]  ;;  %v8845_v13 = vadd.f32 %v9312_v5, %v3245_v55  ;;  %v9314_v55 = vld [vmem:[#allocation7_spill] sm:$0xff] }
 0x1ec   : > { %v6098_v36 = vpop.f32.mrf.mxu1  ;;  %v8832_v48 = vadd.f32 %v9309_v21, %v3239_v2  ;;  %v9311_v39 = vld [vmem:[#allocation34_spill] sm:$0xff]  ;;  %v9313_v2 = vld [vmem:[#allocation36_spill] sm:$0xff]  ;;  %v8851_v63 = vadd.f32 %v8703_v56, %v3246_v0  ;;  %v8859_v23 = vadd.f32 %v8730_v8, %v9314_v55 }
 0x1ed   : > { %4841 = vst.msk [vmem:[%s8796_s24] sm:$0xff] %vm729_vm3, %v4809_v7  ;;  %v4812_v33 = vadd.f32 %v8778_v1, %v4773_v57  ;;  %v6133_v14 = vpop.f32.mrf.mxu0  ;;  %v8841_v31 = vadd.f32 %v9311_v39, %v3240_v4  ;;  %v4771_v38 = vadd.f32 %v4646_v47, %v4301_v26  ;;  %v4306_v6 = vadd.f32 %v6098_v36, %v8725_v61 }
 0x1ee   : > { %v4189_v18 = vpop.f32.mrf.mxu1  ;;  %v8848_v44 = vadd.f32 %v9313_v2, %v3243_v19  ;;  %v4946_v4 = vmul.f32 %v4811_v27, %v4811_v27  ;;  %v4944_v47 = vmul.f32 %v4809_v7, %v4809_v7  ;;  %v4873_v19 = vsel %vm729_vm3, %v4809_v7, 0.0 }
 0x1ef   : > { %4844 = vst.msk [vmem:[%s8796_s24 + $0x18] sm:$0xff] %vm729_vm3, %v4812_v33  ;;  %v4304_v40 = vadd.f32 %v4189_v18, %v8733_v24  ;;  %v4662_v25 = vpop.f32.mrf.mxu0  ;;  %v4810_v61 = vadd.f32 %v8778_v1, %v4771_v38  ;;  %v4776_v50 = vadd.f32 %v6132_v16, %v4306_v6  ;;  %v4947_v57 = vmul.f32 %v4812_v33, %v4812_v33 }
 0x1f0   : > { %v6099_v17 = vpop.f32.mrf.mxu1  ;;  %v4979_v36 = vsel %vm729_vm3, %v4946_v4, 0.0  ;;  %v4976_v43 = vsel %vm729_vm3, %v4944_v47, 0.0  ;;  %v4878_v59 = vsel %vm729_vm3, %v4812_v33, 0.0 }
 0x1f1   : > { %v4774_v28 = vadd.f32 %v4659_v41, %v4304_v40  ;;  %v4307_v56 = vadd.f32 %v6099_v17, %v8736_v53  ;;  %v6136_v0 = vpop.f32.mrf.mxu0  ;;  %4842 = vst.msk [vmem:[%s8796_s24 + $0x8] sm:$0xff] %vm729_vm3, %v4810_v61  ;;  %v4874_v24 = vsel %vm729_vm3, %v4810_v61, 0.0  ;;  %v4945_v58 = vmul.f32 %v4810_v61, %v4810_v61 }
 0x1f2   : > { %v4815_v16 = vadd.f32 %v8778_v1, %v4776_v50  ;;  %v4192_v20 = vpop.f32.mrf.mxu1  ;;  %v4875_v22 = vadd.f32 %v4874_v24, %v4873_v19  ;;  %v4876_v53 = vsel %vm729_vm3, %v4811_v27, 0.0  ;;  %v4981_v27 = vsel %vm729_vm3, %v4947_v57, 0.0 }
 0x1f3   : > { %v4813_v8 = vadd.f32 %v8778_v1, %v4774_v28  ;;  %v4777_v26 = vadd.f32 %v6133_v14, %v4307_v56  ;;  %v4305_v7 = vadd.f32 %v4192_v20, %v8739_v12  ;;  %v4675_v41 = vpop.f32.mrf.mxu0  ;;  %v4977_v60 = vsel %vm729_vm3, %v4945_v58, 0.0 }
 0x1f4   : > { %4847 = vst.msk [vmem:[%s8796_s24 + $0x30] sm:$0xff] %vm729_vm3, %v4815_v16  ;;  %v6102_v21 = vpop.f32.mrf.mxu1  ;;  %v4877_v39 = vadd.f32 %v4876_v53, %v4875_v22  ;;  %v4978_v38 = vadd.f32 %v4977_v60, %v4976_v43  ;;  %v4950_v4 = vmul.f32 %v4815_v16, %v4815_v16 }
 0x1f5   : > { %4845 = vst.msk [vmem:[%s8796_s24 + $0x20] sm:$0xff] %vm729_vm3, %v4813_v8  ;;  %v4948_v12 = vmul.f32 %v4813_v8, %v4813_v8  ;;  %v6137_v14 = vpop.f32.mrf.mxu0  ;;  %v4816_v6 = vadd.f32 %v8778_v1, %v4777_v26  ;;  %v4775_v18 = vadd.f32 %v4662_v25, %v4305_v7  ;;  %v4310_v5 = vadd.f32 %v6102_v21, %v8743_v11 }
 0x1f6   : > { %v4205_v2 = vpop.f32.mrf.mxu1  ;;  %v4980_v40 = vadd.f32 %v4979_v36, %v4978_v38  ;;  %v4879_v47 = vadd.f32 %v4878_v59, %v4877_v39  ;;  %v4880_v50 = vsel %vm729_vm3, %v4813_v8, 0.0  ;;  %v4987_v36 = vsel %vm729_vm3, %v4950_v4, 0.0 }
 0x1f7   : > { %v4308_v33 = vadd.f32 %v4205_v2, %v8746_v29  ;;  %v4678_v61 = vpop.f32.mrf.mxu0  ;;  %v4983_v17 = vsel %vm729_vm3, %v4948_v12, 0.0  ;;  %4848 = vst.msk [vmem:[%s8796_s24 + $0x38] sm:$0xff] %vm729_vm3, %v4816_v6  ;;  %v4814_v55 = vadd.f32 %v8778_v1, %v4775_v18  ;;  %v4780_v19 = vadd.f32 %v6136_v0, %v4310_v5 }
 0x1f8   : > { %v6103_v25 = vpop.f32.mrf.mxu1  ;;  %v4881_v28 = vadd.f32 %v4880_v50, %v4879_v47  ;;  %v4982_v11 = vadd.f32 %v4981_v27, %v4980_v40  ;;  %v4951_v58 = vmul.f32 %v4816_v6, %v4816_v6  ;;  %v4886_v59 = vsel %vm729_vm3, %v4816_v6, 0.0 }
 0x1f9   : > { %v4778_v56 = vadd.f32 %v4675_v41, %v4308_v33  ;;  %v4311_v57 = vadd.f32 %v6103_v25, %v8749_v9  ;;  %v6140_v24 = vpop.f32.mrf.mxu0  ;;  %4846 = vst.msk [vmem:[%s8796_s24 + $0x28] sm:$0xff] %vm729_vm3, %v4814_v55  ;;  %v4882_v29 = vsel %vm729_vm3, %v4814_v55, 0.0  ;;  %v4949_v20 = vmul.f32 %v4814_v55, %v4814_v55 }
 0x1fa   : > { %v4819_v22 = vadd.f32 %v8778_v1, %v4780_v19  ;;  %v4208_v8 = vpop.f32.mrf.mxu1  ;;  %v4984_v26 = vadd.f32 %v4983_v17, %v4982_v11  ;;  %v4883_v0 = vadd.f32 %v4882_v29, %v4881_v28  ;;  %v4884_v9 = vsel %vm729_vm3, %v4815_v16, 0.0 }
 0x1fb   : > { %v4817_v7 = vadd.f32 %v8778_v1, %v4778_v56  ;;  %v4781_v53 = vadd.f32 %v6137_v14, %v4311_v57  ;;  %v4691_v41 = vpop.f32.mrf.mxu0  ;;  %v4985_v43 = vsel %vm729_vm3, %v4949_v20, 0.0  ;;  %v4309_v60 = vadd.f32 %v4208_v8, %v8752_v3 }
 0x1fc   : > { %4851 = vst.msk [vmem:[%s8796_s24 + $0x50] sm:$0xff] %vm729_vm3, %v4819_v22  ;;  %v6106_v21 = vpop.f32.mrf.mxu1  ;;  %v4885_v39 = vadd.f32 %v4884_v9, %v4883_v0  ;;  %v4986_v38 = vadd.f32 %v4985_v43, %v4984_v26  ;;  %v4989_v16 = vsel %vm729_vm3, %v4951_v58, 0.0  ;;  %v4954_v3 = vmul.f32 %v4819_v22, %v4819_v22 }
 0x1fd   : > { %4849 = vst.msk [vmem:[%s8796_s24 + $0x40] sm:$0xff] %vm729_vm3, %v4817_v7  ;;  %v4952_v12 = vmul.f32 %v4817_v7, %v4817_v7  ;;  %v6141_v14 = vpop.f32.mrf.mxu0  ;;  %v4820_v27 = vadd.f32 %v8778_v1, %v4781_v53  ;;  %v4779_v18 = vadd.f32 %v4678_v61, %v4309_v60  ;;  %v4314_v5 = vadd.f32 %v6106_v21, %v8755_v32 }
 0x1fe   : > { %v4221_v2 = vpop.f32.mrf.mxu1  ;;  %v4988_v40 = vadd.f32 %v4987_v36, %v4986_v38  ;;  %v4887_v4 = vadd.f32 %v4886_v59, %v4885_v39  ;;  %v4888_v33 = vsel %vm729_vm3, %v4817_v7, 0.0  ;;  %v4995_v7 = vsel %vm729_vm3, %v4954_v3, 0.0 }
 0x1ff   : > { %v4312_v6 = vadd.f32 %v4221_v2, %v8758_v37  ;;  %v4694_v47 = vpop.f32.mrf.mxu0  ;;  %v4991_v50 = vsel %vm729_vm3, %v4952_v12, 0.0  ;;  %4852 = vst.msk [vmem:[%s8796_s24 + $0x58] sm:$0xff] %vm729_vm3, %v4820_v27  ;;  %v4818_v17 = vadd.f32 %v8778_v1, %v4779_v18  ;;  %v4784_v55 = vadd.f32 %v6140_v24, %v4314_v5 }
 0x200   : > { %v6107_v61 = vpop.f32.mrf.mxu1  ;;  %v4889_v19 = vadd.f32 %v4888_v33, %v4887_v4  ;;  %v4990_v32 = vadd.f32 %v4989_v16, %v4988_v40  ;;  %v4955_v56 = vmul.f32 %v4820_v27, %v4820_v27  ;;  %v4894_v36 = vsel %vm729_vm3, %v4820_v27, 0.0 }
 0x201   : > { %v4782_v25 = vadd.f32 %v4691_v41, %v4312_v6  ;;  %v4315_v28 = vadd.f32 %v6107_v61, %v8761_v34  ;;  %v6144_v11 = vpop.f32.mrf.mxu0  ;;  %4850 = vst.msk [vmem:[%s8796_s24 + $0x48] sm:$0xff] %vm729_vm3, %v4818_v17  ;;  %v4890_v37 = vsel %vm729_vm3, %v4818_v17, 0.0  ;;  %v4953_v57 = vmul.f32 %v4818_v17, %v4818_v17 }
 0x202   : > { %v4823_v58 = vadd.f32 %v8778_v1, %v4784_v55  ;;  %v4224_v29 = vpop.f32.mrf.mxu1  ;;  %v4992_v20 = vadd.f32 %v4991_v50, %v4990_v32  ;;  %v4891_v24 = vadd.f32 %v4890_v37, %v4889_v19  ;;  %v4892_v34 = vsel %vm729_vm3, %v4819_v22, 0.0 }
 0x203   : > { %v4821_v8 = vadd.f32 %v8778_v1, %v4782_v25  ;;  %v4785_v26 = vadd.f32 %v6141_v14, %v4315_v28  ;;  %v4707_v0 = vpop.f32.mrf.mxu0  ;;  %v4993_v53 = vsel %vm729_vm3, %v4953_v57, 0.0  ;;  %v4313_v41 = vadd.f32 %v4224_v29, %v8765_v54 }
 0x204   : > { %4855 = vst.msk [vmem:[%s8796_s24 + $0x70] sm:$0xff] %vm729_vm3, %v4823_v58  ;;  %v6110_v9 = vpop.f32.mrf.mxu1  ;;  %v4893_v43 = vadd.f32 %v4892_v34, %v4891_v24  ;;  %v4994_v60 = vadd.f32 %v4993_v53, %v4992_v20  ;;  %v4997_v22 = vsel %vm729_vm3, %v4955_v56, 0.0  ;;  %v4958_v54 = vmul.f32 %v4823_v58, %v4823_v58 }
 0x205   : > { %4853 = vst.msk [vmem:[%s8796_s24 + $0x60] sm:$0xff] %vm729_vm3, %v4821_v8  ;;  %v4956_v21 = vmul.f32 %v4821_v8, %v4821_v8  ;;  %v6145_v59 = vpop.f32.mrf.mxu0  ;;  %v4824_v39 = vadd.f32 %v8778_v1, %v4785_v26  ;;  %v4783_v38 = vadd.f32 %v4694_v47, %v4313_v41  ;;  %v4318_v12 = vadd.f32 %v6110_v9, %v8768_v10 }
 0x206   : > { %v4237_v14 = vpop.f32.mrf.mxu1  ;;  %v4996_v16 = vadd.f32 %v4995_v7, %v4994_v60  ;;  %v4895_v18 = vadd.f32 %v4894_v36, %v4893_v43  ;;  %v4896_v2 = vsel %vm729_vm3, %v4821_v8, 0.0  ;;  %v5003_v57 = vsel %vm729_vm3, %v4958_v54, 0.0 }
 0x207   : > { %v4316_v27 = vadd.f32 %v4237_v14, %v8771_v46  ;;  %v4710_v5 = vpop.f32.mrf.mxu0  ;;  %v4999_v40 = vsel %vm729_vm3, %v4956_v21, 0.0  ;;  %4856 = vst.msk [vmem:[%s8796_s24 + $0x78] sm:$0xff] %vm729_vm3, %v4824_v39  ;;  %v4822_v3 = vadd.f32 %v8778_v1, %v4783_v38  ;;  %v4788_v4 = vadd.f32 %v6144_v11, %v4318_v12 }
 0x208   : > { %v6111_v6 = vpop.f32.mrf.mxu1  ;;  %v4897_v47 = vadd.f32 %v4896_v2, %v4895_v18  ;;  %v4998_v10 = vadd.f32 %v4997_v22, %v4996_v16  ;;  %v4959_v55 = vmul.f32 %v4824_v39, %v4824_v39  ;;  %v4902_v8 = vsel %vm729_vm3, %v4824_v39, 0.0 }
 0x209   : > { %v4786_v33 = vadd.f32 %v4707_v0, %v4316_v27  ;;  %v4319_v50 = vadd.f32 %v6111_v6, %v8781_v51  ;;  %4854 = vst.msk [vmem:[%s8796_s24 + $0x68] sm:$0xff] %vm729_vm3, %v4822_v3  ;;  %v4898_v46 = vsel %vm729_vm3, %v4822_v3, 0.0  ;;  %v4957_v61 = vmul.f32 %v4822_v3, %v4822_v3 }
 0x20a   : > { %v6148_v17 = vpop.f32.mrf.mxu0  ;;  %v4827_v19 = vadd.f32 %v8778_v1, %v4788_v4  ;;  %v4240_v32 = vpop.f32.mrf.mxu1  ;;  %v5000_v25 = vadd.f32 %v4999_v40, %v4998_v10  ;;  %v4899_v28 = vadd.f32 %v4898_v46, %v4897_v47  ;;  %v4900_v51 = vsel %vm729_vm3, %v4823_v58, 0.0 }
 0x20b   : > { %v4825_v11 = vadd.f32 %v8778_v1, %v4786_v33  ;;  %v4789_v56 = vadd.f32 %v6145_v59, %v4319_v50  ;;  %v5001_v29 = vsel %vm729_vm3, %v4957_v61, 0.0  ;;  %v4317_v20 = vadd.f32 %v4240_v32, %v8802_v15 }
 0x20c   : > { %v4723_v37 = vpop.f32.mrf.mxu0  ;;  %4859 = vst.msk [vmem:[%s8796_s24 + $0x90] sm:$0xff] %vm729_vm3, %v4827_v19  ;;  %v6114_v24 = vpop.f32.mrf.mxu1  ;;  %v4901_v26 = vadd.f32 %v4900_v51, %v4899_v28  ;;  %v5002_v0 = vadd.f32 %v5001_v29, %v5000_v25  ;;  %v5005_v58 = vsel %vm729_vm3, %v4959_v55, 0.0  ;;  %v4962_v15 = vmul.f32 %v4827_v19, %v4827_v19 }
 0x20d   : > { %4857 = vst.msk [vmem:[%s8796_s24 + $0x80] sm:$0xff] %vm729_vm3, %v4825_v11  ;;  %v4960_v34 = vmul.f32 %v4825_v11, %v4825_v11  ;;  %v4828_v53 = vadd.f32 %v8778_v1, %v4789_v56  ;;  %v4787_v41 = vadd.f32 %v4710_v5, %v4317_v20  ;;  %v4322_v9 = vadd.f32 %v6114_v24, %v8817_v52 }
 0x20e   : > { %v6149_v7 = vpop.f32.mrf.mxu0  ;;  %v4253_v36 = vpop.f32.mrf.mxu1  ;;  %v5004_v43 = vadd.f32 %v5003_v57, %v5002_v0  ;;  %v4903_v60 = vadd.f32 %v4902_v8, %v4901_v26  ;;  %v4904_v22 = vsel %vm729_vm3, %v4825_v11, 0.0  ;;  %v5011_v50 = vsel %vm729_vm3, %v4962_v15, 0.0 }
 0x20f   : > { %v4320_v21 = vadd.f32 %v4253_v36, %v8820_v49  ;;  %v5007_v39 = vsel %vm729_vm3, %v4960_v34, 0.0  ;;  %4860 = vst.msk [vmem:[%s8796_s24 + $0x98] sm:$0xff] %vm729_vm3, %v4828_v53  ;;  %v4826_v38 = vadd.f32 %v8778_v1, %v4787_v41  ;;  %v4792_v12 = vadd.f32 %v6148_v17, %v4322_v9 }
 0x210   : > { %v4726_v59 = vpop.f32.mrf.mxu0  ;;  %v6115_v14 = vpop.f32.mrf.mxu1  ;;  %v4905_v16 = vadd.f32 %v4904_v22, %v4903_v60  ;;  %v5006_v52 = vadd.f32 %v5005_v58, %v5004_v43  ;;  %v4963_v5 = vmul.f32 %v4828_v53, %v4828_v53  ;;  %v4910_v61 = vsel %vm729_vm3, %v4828_v53, 0.0 }
 0x211   : > { %v4790_v54 = vadd.f32 %v4723_v37, %v4320_v21  ;;  %v4323_v18 = vadd.f32 %v6115_v14, %v8823_v62  ;;  %4858 = vst.msk [vmem:[%s8796_s24 + $0x88] sm:$0xff] %vm729_vm3, %v4826_v38  ;;  %v4906_v49 = vsel %vm729_vm3, %v4826_v38, 0.0  ;;  %v4961_v2 = vmul.f32 %v4826_v38, %v4826_v38 }
 0x212   : > { %v6152_v27 = vpop.f32.mrf.mxu0  ;;  %v4831_v40 = vadd.f32 %v8778_v1, %v4792_v12  ;;  %v4256_v3 = vpop.f32.mrf.mxu1  ;;  %v5008_v4 = vadd.f32 %v5007_v39, %v5006_v52  ;;  %v4907_v6 = vadd.f32 %v4906_v49, %v4905_v16  ;;  %v4908_v62 = vsel %vm729_vm3, %v4827_v19, 0.0 }
 0x213   : > { %v4829_v47 = vadd.f32 %v8778_v1, %v4790_v54  ;;  %v4793_v10 = vadd.f32 %v6149_v7, %v4323_v18  ;;  %v5009_v17 = vsel %vm729_vm3, %v4961_v2, 0.0  ;;  %v4321_v55 = vadd.f32 %v4256_v3, %v8826_v35 }
 0x214   : > { %v4739_v33 = vpop.f32.mrf.mxu0  ;;  %4863 = vst.msk [vmem:[%s8796_s24 + $0xb0] sm:$0xff] %vm729_vm3, %v4831_v40  ;;  %v6118_v46 = vpop.f32.mrf.mxu1  ;;  %v4909_v32 = vadd.f32 %v4908_v62, %v4907_v6  ;;  %v5010_v25 = vadd.f32 %v5009_v17, %v5008_v4  ;;  %v5013_v19 = vsel %vm729_vm3, %v4963_v5, 0.0  ;;  %v4966_v35 = vmul.f32 %v4831_v40, %v4831_v40 }
 0x215   : > { %4861 = vst.msk [vmem:[%s8796_s24 + $0xa0] sm:$0xff] %vm729_vm3, %v4829_v47  ;;  %v4964_v28 = vmul.f32 %v4829_v47, %v4829_v47  ;;  %v4832_v56 = vadd.f32 %v8778_v1, %v4793_v10  ;;  %v4791_v37 = vadd.f32 %v4726_v59, %v4321_v55  ;;  %v4326_v51 = vadd.f32 %v6118_v46, %v8829_v42 }
 0x216   : > { %v6153_v11 = vpop.f32.mrf.mxu0  ;;  %v4269_v57 = vpop.f32.mrf.mxu1  ;;  %v5012_v29 = vadd.f32 %v5011_v50, %v5010_v25  ;;  %v4911_v20 = vadd.f32 %v4910_v61, %v4909_v32  ;;  %v4912_v26 = vsel %vm729_vm3, %v4829_v47, 0.0  ;;  %v3603_v12 = vadd.f32 %v8714_v30, %v8859_v23 }
 0x217   : > { %v4324_v24 = vadd.f32 %v4269_v57, %v8832_v48  ;;  %v5015_v0 = vsel %vm729_vm3, %v4964_v28, 0.0  ;;  %4864 = vst.msk [vmem:[%s8796_s24 + $0xb8] sm:$0xff] %vm729_vm3, %v4832_v56  ;;  %v4830_v34 = vadd.f32 %v8778_v1, %v4791_v37  ;;  %v4796_v7 = vadd.f32 %v6152_v27, %v4326_v51 }
 0x218   : > { %v4742_v8 = vpop.f32.mrf.mxu0  ;;  %v6119_v58 = vpop.f32.mrf.mxu1  ;;  %v4913_v53 = vadd.f32 %v4912_v26, %v4911_v20  ;;  %v5014_v42 = vadd.f32 %v5013_v19, %v5012_v29  ;;  %v4967_v43 = vmul.f32 %v4832_v56, %v4832_v56  ;;  %v5019_v54 = vsel %vm729_vm3, %v4966_v35, 0.0 }
 0x219   : > { %v4794_v41 = vadd.f32 %v4739_v33, %v4324_v24  ;;  %v4327_v9 = vadd.f32 %v6119_v58, %v8838_v45  ;;  %4862 = vst.msk [vmem:[%s8796_s24 + $0xa8] sm:$0xff] %vm729_vm3, %v4830_v34  ;;  %v4914_v48 = vsel %vm729_vm3, %v4830_v34, 0.0  ;;  %v4965_v15 = vmul.f32 %v4830_v34, %v4830_v34 }
 0x21a   : > { %v6156_v36 = vpop.f32.mrf.mxu0  ;;  %v4835_v60 = vadd.f32 %v8778_v1, %v4796_v7  ;;  %v4272_v21 = vpop.f32.mrf.mxu1  ;;  %v5016_v59 = vadd.f32 %v5015_v0, %v5014_v42  ;;  %v4915_v22 = vadd.f32 %v4914_v48, %v4913_v53  ;;  %v4916_v45 = vsel %vm729_vm3, %v4831_v40, 0.0 }
 0x21b   : > { %v4833_v39 = vadd.f32 %v8778_v1, %v4794_v41  ;;  %v4797_v38 = vadd.f32 %v6153_v11, %v4327_v9  ;;  %v5017_v14 = vsel %vm729_vm3, %v4965_v15, 0.0  ;;  %v4325_v16 = vadd.f32 %v4272_v21, %v8841_v31 }
 0x21c   : > { %4867 = vst.msk [vmem:[%s8796_s24 + $0xd0] sm:$0xff] %vm729_vm3, %v4835_v60  ;;  %v6122_v52 = vpop.f32.mrf.mxu1  ;;  %v4918_v18 = vsel %vm729_vm3, %v4832_v56, 0.0  ;;  %v4917_v27 = vadd.f32 %v4916_v45, %v4915_v22  ;;  %v5018_v5 = vadd.f32 %v5017_v14, %v5016_v59  ;;  %v4755_v49 = vpop.f32.mrf.mxu0  ;;  %v5021_v31 = vsel %vm729_vm3, %v4967_v43, 0.0 }
 0x21d   : > { %4865 = vst.msk [vmem:[%s8796_s24 + $0xc0] sm:$0xff] %vm729_vm3, %v4833_v39  ;;  %v4968_v30 = vmul.f32 %v4833_v39, %v4833_v39  ;;  %v4836_v23 = vadd.f32 %v8778_v1, %v4797_v38  ;;  %v4795_v2 = vadd.f32 %v4742_v8, %v4325_v16  ;;  %v4330_v40 = vadd.f32 %v6122_v52, %v8845_v13 }
 0x21e   : > { %v4285_v3 = vpop.f32.mrf.mxu1  ;;  %v5020_v4 = vadd.f32 %v5019_v54, %v5018_v5  ;;  %v4919_v6 = vadd.f32 %v4918_v18, %v4917_v27  ;;  %v4970_v10 = vmul.f32 %v4835_v60, %v4835_v60  ;;  %v4920_v33 = vsel %vm729_vm3, %v4833_v39, 0.0  ;;  %v6157_v32 = vpop.f32.mrf.mxu0 }
 0x21f   : > { %v4328_v47 = vadd.f32 %v4285_v3, %v8848_v44  ;;  %4868 = vst.msk [vmem:[%s8796_s24 + $0xd8] sm:$0xff] %vm729_vm3, %v4836_v23  ;;  %v4834_v62 = vadd.f32 %v8778_v1, %v4795_v2  ;;  %v4800_v50 = vadd.f32 %v6156_v36, %v4330_v40  ;;  %v5023_v25 = vsel %vm729_vm3, %v4968_v30, 0.0 }
 0x220   : > { %v6123_v17 = vpop.f32.mrf.mxu1  ;;  %v4921_v55 = vadd.f32 %v4920_v33, %v4919_v6  ;;  %v5022_v46 = vadd.f32 %v5021_v31, %v5020_v4  ;;  %v4924_v29 = vsel %vm729_vm3, %v4835_v60, 0.0  ;;  %v5027_v24 = vsel %vm729_vm3, %v4970_v10, 0.0  ;;  %v4758_v0 = vpop.f32.mrf.mxu0 }
 0x221   : > { %v4798_v13 = vadd.f32 %v4755_v49, %v4328_v47  ;;  %v4331_v61 = vadd.f32 %v6123_v17, %v8851_v63  ;;  %4866 = vst.msk [vmem:[%s8796_s24 + $0xc8] sm:$0xff] %vm729_vm3, %v4834_v62  ;;  %v4922_v44 = vsel %vm729_vm3, %v4834_v62, 0.0  ;;  %v4969_v28 = vmul.f32 %v4834_v62, %v4834_v62 }
 0x222   : > { %v4839_v11 = vadd.f32 %v8778_v1, %v4800_v50  ;;  %v4288_v19 = vpop.f32.mrf.mxu1  ;;  %v5024_v56 = vadd.f32 %v5023_v25, %v5022_v46  ;;  %v4923_v37 = vadd.f32 %v4922_v44, %v4921_v55  ;;  %v4971_v63 = vmul.f32 %v4836_v23, %v4836_v23 }
 0x223   : > { %v4837_v51 = vadd.f32 %v8778_v1, %v4798_v13  ;;  %v4801_v57 = vadd.f32 %v6157_v32, %v4331_v61  ;;  %v5025_v35 = vsel %vm729_vm3, %v4969_v28, 0.0  ;;  %v4329_v20 = vadd.f32 %v4288_v19, %v3603_v12 }
 0x224   : > { %4871 = vst.msk [vmem:[%s8796_s24 + $0xf0] sm:$0xff] %vm729_vm3, %v4839_v11  ;;  %v4925_v8 = vadd.f32 %v4924_v29, %v4923_v37  ;;  %v5026_v26 = vadd.f32 %v5025_v35, %v5024_v56  ;;  %v4926_v34 = vsel %vm729_vm3, %v4836_v23, 0.0  ;;  %v5029_v9 = vsel %vm729_vm3, %v4971_v63, 0.0 }
 0x225   : > { %4869 = vst.msk [vmem:[%s8796_s24 + $0xe0] sm:$0xff] %vm729_vm3, %v4837_v51  ;;  %v4972_v7 = vmul.f32 %v4837_v51, %v4837_v51  ;;  %v4840_v58 = vadd.f32 %v8778_v1, %v4801_v57  ;;  %v4799_v53 = vadd.f32 %v4758_v0, %v4329_v20  ;;  %v4928_v36 = vsel %vm729_vm3, %v4837_v51, 0.0 }
 0x226   : > { %v5028_v42 = vadd.f32 %v5027_v24, %v5026_v26  ;;  %v4927_v41 = vadd.f32 %v4926_v34, %v4925_v8  ;;  %v4974_v60 = vmul.f32 %v4839_v11, %v4839_v11  ;;  %v4932_v12 = vsel %vm729_vm3, %v4839_v11, 0.0 }
 0x227   : > { %4872 = vst.msk [vmem:[%s8796_s24 + $0xf8] sm:$0xff] %vm729_vm3, %v4840_v58  ;;  %v4838_v43 = vadd.f32 %v8778_v1, %v4799_v53  ;;  %v5031_v21 = vsel %vm729_vm3, %v4972_v7, 0.0  ;;  %v4975_v45 = vmul.f32 %v4840_v58, %v4840_v58  ;;  %v4934_v54 = vsel %vm729_vm3, %v4840_v58, 0.0 }
 0x228   : > { %v4929_v48 = vadd.f32 %v4928_v36, %v4927_v41  ;;  %v5030_v15 = vadd.f32 %v5029_v9, %v5028_v42  ;;  %v5035_v1 = vsel %vm729_vm3, %v4974_v60, 0.0 }
 0x229   : > { %4870 = vst.msk [vmem:[%s8796_s24 + $0xe8] sm:$0xff] %vm729_vm3, %v4838_v43  ;;  %v4930_v59 = vsel %vm729_vm3, %v4838_v43, 0.0  ;;  %v4973_v22 = vmul.f32 %v4838_v43, %v4838_v43  ;;  %v5037_v5 = vsel %vm729_vm3, %v4975_v45, 0.0 }
 0x22a   : > { %v5032_v39 = vadd.f32 %v5031_v21, %v5030_v15  ;;  %v4931_v38 = vadd.f32 %v4930_v59, %v4929_v48 }
 0x22b   : > { %v5033_v14 = vsel %vm729_vm3, %v4973_v22, 0.0 }
 0x22c   : > { %v4933_v16 = vadd.f32 %v4932_v12, %v4931_v38  ;;  %v5034_v52 = vadd.f32 %v5033_v14, %v5032_v39 }
 0x22e   : > { %v4935_v18 = vadd.f32 %v4934_v54, %v4933_v16  ;;  %v5036_v27 = vadd.f32 %v5035_v1, %v5034_v52 }
 0x230   : > { %v4936_v49 = vrot.slane %v4935_v18, 4  ;;  %v5038_v30 = vadd.f32 %v5037_v5, %v5036_v27 }
 0x232   : > { %v4937_v23 = vadd.f32 %v4936_v49, %v4935_v18  ;;  %v5039_v2 = vrot.slane %v5038_v30, 4 }
 0x234   : > { %v4938_v40 = vrot.slane %v4937_v23, 2  ;;  %v5040_v3 = vadd.f32 %v5039_v2, %v5038_v30 }
 0x236   : > { %v4939_v31 = vadd.f32 %v4938_v40, %v4937_v23  ;;  %v5041_v4 = vrot.slane %v5040_v3, 2 }
 0x238   : > { %v4940_v6 = vrot.slane %v4939_v31, 1  ;;  %v5042_v47 = vadd.f32 %v5041_v4, %v5040_v3 }
 0x23a   : > { %v4941_v10 = vadd.f32 %v4940_v6, %v4939_v31  ;;  %v5043_v33 = vrot.slane %v5042_v47, 1 }
 0x23c   : > { %4943 = vst.msk [vmem:[%s238_s27] sm:$0x1] %vm4942_vm8, %v4941_v10  ;;  %v5044_v62 = vadd.f32 %v5043_v33, %v5042_v47 }
 0x23e   : > { %5045 = vst.msk [vmem:[%s241_s30] sm:$0x1] %vm4942_vm8, %v5044_v62 }
 0x23f PF: > { %s16_s18 = sadd.s32 1, %s6235_s18  }
 0x240   : > { %p13_p4 = scmp.ge.s32.totalorder %s16_s18, 4  }
 0x242   :  { %15 = sbr.rel (!%p13_p4) target bundleno = 1 (0x1), region = 96 }

</bundles_post_ra>
